<compile_context>
chip_gen: v5e
topology: v5e:2x2
jax: 0.10.0
libtpu: 0.0.40
codegen_flags: <defaults>
</compile_context>

<pallas_src>
import math

import jax
import jax.numpy as jnp
import numpy as np
from jax.experimental import pallas as pl
from jax.experimental.pallas import tpu as pltpu

# ---- model config (mirrors Decoder.__init__) --------------------------------
NUM_CLASS = 3
IN_SIZE = 2
PRED_LEN = 12
EMBED = 32
NUM_LAYERS = 2
HEAD = 4
D_K = EMBED // HEAD
FWD_EXP = 2
BLOCKS = ["self", "cross"]                  # blocks[0] used by every DecoderLayer
BLOCK_TYPES = tuple(BLOCKS * NUM_LAYERS)    # flattened static schedule
NB = len(BLOCK_TYPES)                       # total transformer blocks
N_SELF = sum(1 for b in BLOCK_TYPES if b == "self")
N_CROSS = NB - N_SELF
EPS = 1e-6
PRED_OUT = IN_SIZE * PRED_LEN
HEAD_OUT = PRED_OUT + 1                     # fused pred(24) + score(1)
INV_SQRT_DK = 1.0 / math.sqrt(D_K)
NEG_INF = -1e9


# ---- in-kernel helpers (traced inside the Pallas kernel) ---------------------
def _layernorm(t, a, b):
    """t: [S, E]; a, b: [1, E]. torch.std uses Bessel's correction (ddof=1)."""
    mean = jnp.mean(t, axis=-1, keepdims=True)
    var = jnp.sum((t - mean) ** 2, axis=-1, keepdims=True) * (1.0 / (t.shape[-1] - 1))
    std = jnp.sqrt(var)
    inv = pl.reciprocal(std + EPS, approx=True)      # EUP, not a VPU divide
    return a * (t - mean) * inv + b


def _attention_heads(q, k, v, mask_add):
    """q: [K, E], k/v: [N, E], mask_add: None or [1, N] additive mask."""
    heads = []
    for h in range(HEAD):                            # static unroll over heads
        sl = slice(h * D_K, (h + 1) * D_K)
        s = jnp.einsum("kd,nd->kn", q[:, sl], k[:, sl],
                       preferred_element_type=jnp.float32) * INV_SQRT_DK
        if mask_add is not None:
            s = s + mask_add                         # precomputed additive mask
        m = jnp.max(s, axis=-1, keepdims=True)
        e = jnp.exp(s - m)
        p = e * pl.reciprocal(jnp.sum(e, axis=-1, keepdims=True), approx=True)
        heads.append(jnp.einsum("kn,nd->kd", p, v[:, sl],
                                preferred_element_type=jnp.float32))
    return jnp.concatenate(heads, axis=-1)           # [K, E]


# ---- the Pallas kernel: full decoder forward for one batch element -----------
def decoder_kernel(x_ref, nf_ref, nm_ref,
                   wqkv_s_ref, bqkv_s_ref,            # self blocks, fused QKV
                   wq_c_ref, bq_c_ref, wkv_c_ref, bkv_c_ref,   # cross blocks
                   wo_ref, bo_ref,
                   n1a_ref, n1b_ref, n2a_ref, n2b_ref,
                   w1_ref, b1_ref, w2_ref, b2_ref,
                   wh_ref, bh_ref,                    # fused pred+score head
                   out_ref):
    x = x_ref[...]                                    # [K, E]
    nf = nf_ref[...]                                  # [N, E]
    # additive neighbor mask, computed ONCE (not per layer / per head)
    addm = jnp.where(nm_ref[...] == 0.0, NEG_INF, 0.0)  # [1, N]

    si = 0
    ci = 0
    for i, bt in enumerate(BLOCK_TYPES):              # static unroll over blocks
        if bt == "self":
            qkv = jnp.dot(x, wqkv_s_ref[si],
                          preferred_element_type=jnp.float32) + bqkv_s_ref[si]
            q = qkv[:, :EMBED]
            k = qkv[:, EMBED:2 * EMBED]
            v = qkv[:, 2 * EMBED:]
            mask_add = None
            si += 1
        else:  # cross-attention over neighbor features with neighbor mask
            q = jnp.dot(x, wq_c_ref[ci],
                        preferred_element_type=jnp.float32) + bq_c_ref[ci]
            kv = jnp.dot(nf, wkv_c_ref[ci],
                         preferred_element_type=jnp.float32) + bkv_c_ref[ci]
            k = kv[:, :EMBED]
            v = kv[:, EMBED:]
            mask_add = addm
            ci += 1

        att = _attention_heads(q, k, v, mask_add)     # [K, E]
        logits = jnp.dot(att, wo_ref[i],
                         preferred_element_type=jnp.float32) + bo_ref[i]
        xa = _layernorm(logits + x, n1a_ref[i], n1b_ref[i])
        hid = jnp.maximum(
            jnp.dot(xa, w1_ref[i], preferred_element_type=jnp.float32) + b1_ref[i],
            0.0)
        ff = jnp.dot(hid, w2_ref[i],
                     preferred_element_type=jnp.float32) + b2_ref[i]
        x = _layernorm(ff + xa, n2a_ref[i], n2b_ref[i])
        # nn.Dropout(0.1) is identity in eval mode

    # fused pred + score head: one [K, E] x [E, 25] matmul, lane-denser store
    out_ref[...] = jnp.dot(x, wh_ref[...],
                           preferred_element_type=jnp.float32) + bh_ref[...]


# ---- host-side param packing (QKV fusion, head fusion) ------------------------
def pack_params(params):
    (wq, bq, wk, bk, wv, bv, wo, bo, n1a, n1b, n2a, n2b,
     w1, b1, w2, b2, wp, bp, ws, bs) = params
    self_idx = [i for i, bt in enumerate(BLOCK_TYPES) if bt == "self"]
    cross_idx = [i for i, bt in enumerate(BLOCK_TYPES) if bt == "cross"]

    wqkv_s = jnp.stack([jnp.concatenate([wq[i], wk[i], wv[i]], axis=-1)
                        for i in self_idx])                      # [NS, E, 3E]
    bqkv_s = jnp.stack([jnp.concatenate([bq[i], bk[i], bv[i]], axis=-1)
                        for i in self_idx])                      # [NS, 1, 3E]
    wq_c = jnp.stack([wq[i] for i in cross_idx])                 # [NC, E, E]
    bq_c = jnp.stack([bq[i] for i in cross_idx])                 # [NC, 1, E]
    wkv_c = jnp.stack([jnp.concatenate([wk[i], wv[i]], axis=-1)
                       for i in cross_idx])                      # [NC, E, 2E]
    bkv_c = jnp.stack([jnp.concatenate([bk[i], bv[i]], axis=-1)
                       for i in cross_idx])                      # [NC, 1, 2E]
    w_head = jnp.concatenate([wp, ws], axis=-1)                  # [E, 25]
    b_head = jnp.concatenate([bp, bs], axis=-1)                  # [1, 25]

    return [wqkv_s, bqkv_s, wq_c, bq_c, wkv_c, bkv_c,
            wo, bo, n1a, n1b, n2a, n2b, w1, b1, w2, b2, w_head, b_head]


def _cost_estimate(B, K, N, packed, n_in_elems, n_out_elems):
    E, H, D = EMBED, HEAD, D_K
    ffn = 2 * K * E * (FWD_EXP * E) + 2 * K * (FWD_EXP * E) * E
    per_self = 2 * K * E * 3 * E + H * (2 * K * K * D + 2 * K * K * D) \
        + 2 * K * E * E + ffn
    per_cross = 2 * K * E * E + 2 * N * E * 2 * E \
        + H * (2 * K * N * D + 2 * K * N * D) + 2 * K * E * E + ffn
    head = 2 * K * E * HEAD_OUT
    flops = B * (N_SELF * per_self + N_CROSS * per_cross + head)
    # exps + softmax reciprocals + layernorm sqrt/reciprocal, per block
    trans = B * NB * (H * K * max(K, N) + H * K + 4 * K)
    bytes_accessed = 4 * (n_in_elems + n_out_elems + sum(int(p.size) for p in packed))
    return pl.CostEstimate(flops=int(flops), transcendentals=int(trans),
                           bytes_accessed=int(bytes_accessed))


# ---- wrapper ------------------------------------------------------------------
def decoder_forward(params, x, nei_feats, nei_masks, self_labels):
    del self_labels  # only used in the pred_single=False branch (not implemented)
    B, K, E = x.shape
    N = nei_feats.shape[1]
    packed = pack_params(params)
    nm3 = nei_masks.reshape(B, 1, N)   # shape only; mask compare happens in-kernel

    act_specs = [
        pl.BlockSpec((None, K, E), lambda b: (b, 0, 0)),      # x
        pl.BlockSpec((None, N, E), lambda b: (b, 0, 0)),      # nei_feats
        pl.BlockSpec((None, 1, N), lambda b: (b, 0, 0)),      # nei_masks
    ]
    # weights: full-array VMEM blocks, invariant across the batch grid
    w_specs = [pl.BlockSpec(p.shape, lambda b, nd=p.ndim: (0,) * nd)
               for p in packed]
    out_spec = pl.BlockSpec((None, K, HEAD_OUT), lambda b: (b, 0, 0))

    cost = _cost_estimate(
        B, K, N, packed,
        n_in_elems=int(x.size + nei_feats.size + nm3.size),
        n_out_elems=B * K * HEAD_OUT)

    fused = pl.pallas_call(
        decoder_kernel,
        out_shape=jax.ShapeDtypeStruct((B, K, HEAD_OUT), jnp.float32),
        grid=(B,),
        in_specs=act_specs + w_specs,
        out_specs=out_spec,
        compiler_params=pltpu.CompilerParams(
            dimension_semantics=("parallel",)),   # v7x: 2 TCs split the batch
        cost_estimate=cost,
    )(x, nei_feats, nm3, *packed)

    preds = fused[..., :PRED_OUT].reshape(B, K, PRED_LEN, IN_SIZE)
    scores = fused[..., PRED_OUT]
    return preds, scores


# ---- deterministic parameter init (PyTorch-Linear-style uniform) --------------
def init_params(key):
    def lin(k, fi, fo):
        k1, k2 = jax.random.split(k)
        bound = 1.0 / math.sqrt(fi)
        w = jax.random.uniform(k1, (fi, fo), jnp.float32, -bound, bound)
        b = jax.random.uniform(k2, (1, fo), jnp.float32, -bound, bound)
        return w, b

    Wq, Bq, Wk, Bk, Wv, Bv, Wo, Bo = [], [], [], [], [], [], [], []
    W1, B1, W2, B2 = [], [], [], []
    for _ in range(NB):
        key, kq, kk, kv, ko, k1, k2 = jax.random.split(key, 7)
        w, b = lin(kq, EMBED, EMBED); Wq.append(w); Bq.append(b)
        w, b = lin(kk, EMBED, EMBED); Wk.append(w); Bk.append(b)
        w, b = lin(kv, EMBED, EMBED); Wv.append(w); Bv.append(b)
        w, b = lin(ko, EMBED, EMBED); Wo.append(w); Bo.append(b)
        w, b = lin(k1, EMBED, EMBED * FWD_EXP); W1.append(w); B1.append(b)
        w, b = lin(k2, EMBED * FWD_EXP, EMBED); W2.append(w); B2.append(b)
    ones = jnp.ones((NB, 1, EMBED), jnp.float32)
    zeros = jnp.zeros((NB, 1, EMBED), jnp.float32)
    key, kp, ks = jax.random.split(key, 3)
    wp, bp = lin(kp, EMBED, PRED_OUT)
    ws, bs = lin(ks, EMBED, 1)
    return [
        jnp.stack(Wq), jnp.stack(Bq), jnp.stack(Wk), jnp.stack(Bk),
        jnp.stack(Wv), jnp.stack(Bv), jnp.stack(Wo), jnp.stack(Bo),
        ones, zeros, ones, zeros,                       # norm1.a, norm1.b, norm2.a, norm2.b
        jnp.stack(W1), jnp.stack(B1), jnp.stack(W2), jnp.stack(B2),
        wp, bp, ws, bs,
    ]


# ---- pure-JAX reference (mirrors the PyTorch forward exactly) ------------------
def decoder_reference(params, x, nei_feats, nei_masks, self_labels):
    del self_labels
    (wq, bq, wk, bk, wv, bv, wo, bo, n1a, n1b, n2a, n2b,
     w1, b1, w2, b2, wp, bp, ws, bs) = params
    hp = jax.lax.Precision.HIGHEST

    def lin(t, w, b):
        return jnp.einsum("bse,ef->bsf", t, w, precision=hp) + b

    def ln(t, a, b):
        mean = t.mean(-1, keepdims=True)
        std = jnp.sqrt(((t - mean) ** 2).sum(-1, keepdims=True) / (t.shape[-1] - 1))
        return a * (t - mean) / (std + EPS) + b

    def mha(qi, kvi, i, mask):
        q = lin(qi, wq[i], bq[i]); k = lin(kvi, wk[i], bk[i]); v = lin(kvi, wv[i], bv[i])
        B, K, _ = q.shape; N = k.shape[1]
        qh = q.reshape(B, K, HEAD, D_K).transpose(0, 2, 1, 3)
        kh = k.reshape(B, N, HEAD, D_K).transpose(0, 2, 1, 3)
        vh = v.reshape(B, N, HEAD, D_K).transpose(0, 2, 1, 3)
        s = jnp.einsum("bhkd,bhnd->bhkn", qh, kh, precision=hp) / math.sqrt(D_K)
        if mask is not None:
            s = jnp.where(mask[:, None, None, :] == 0, -1e9, s)
        p = jax.nn.softmax(s, axis=-1)
        o = jnp.einsum("bhkn,bhnd->bhkd", p, vh, precision=hp)
        o = o.transpose(0, 2, 1, 3).reshape(B, K, HEAD * D_K)
        return lin(o, wo[i], bo[i])

    for i, bt in enumerate(BLOCK_TYPES):
        if bt == "self":
            logits = mha(x, x, i, None)
        else:
            logits = mha(x, nei_feats, i, nei_masks)
        xa = ln(logits + x, n1a[i], n1b[i])
        ff = lin(jax.nn.relu(lin(xa, w1[i], b1[i])), w2[i], b2[i])
        x = ln(ff + xa, n2a[i], n2b[i])
    B, K, _ = x.shape
    preds = (jnp.einsum("bke,ep->bkp", x, wp, precision=hp) + bp).reshape(B, K, PRED_LEN, IN_SIZE)
    scores = (jnp.einsum("bke,eo->bko", x, ws, precision=hp) + bs)[..., 0]
    return preds, scores


if __name__ == "__main__":
    key = jax.random.PRNGKey(0)
    kx, kn, kp = jax.random.split(key, 3)

    B, K, N = 2, 8, 8  # batch, num_init_trajs, num neighbors
    x = jax.random.normal(kx, (B, K, EMBED), jnp.float32)
    nei_feats = jax.random.normal(kn, (B, N, EMBED), jnp.float32)
    lengths = jnp.array([5, 8])
    nei_masks = (jnp.arange(N)[None, :] < lengths[:, None]).astype(jnp.float32)
    self_labels = jnp.zeros((B,), jnp.int32)

    params = init_params(kp)

    preds, scores = decoder_forward(params, x, nei_feats, nei_masks, self_labels)
    jax.block_until_ready((preds, scores))

    ref_preds, ref_scores = decoder_reference(params, x, nei_feats, nei_masks, self_labels)
    np.testing.assert_allclose(np.asarray(preds), np.asarray(ref_preds), rtol=2e-2, atol=2e-2)
    np.testing.assert_allclose(np.asarray(scores), np.asarray(ref_scores), rtol=2e-2, atol=2e-2)

    print("KERNEL_OK")
</pallas_src>

<mosaic_0001>
module attributes {stable_mosaic.version = 11 : i64} {
  func.func @decoder_kernel(%arg0: i32, %arg1: memref<1x8x32xf32, #tpu.memory_space<vmem>>, %arg2: memref<1x8x32xf32, #tpu.memory_space<vmem>>, %arg3: memref<1x1x8xf32, #tpu.memory_space<vmem>>, %arg4: memref<2x32x96xf32, #tpu.memory_space<vmem>>, %arg5: memref<2x1x96xf32, #tpu.memory_space<vmem>>, %arg6: memref<2x32x32xf32, #tpu.memory_space<vmem>>, %arg7: memref<2x1x32xf32, #tpu.memory_space<vmem>>, %arg8: memref<2x32x64xf32, #tpu.memory_space<vmem>>, %arg9: memref<2x1x64xf32, #tpu.memory_space<vmem>>, %arg10: memref<4x32x32xf32, #tpu.memory_space<vmem>>, %arg11: memref<4x1x32xf32, #tpu.memory_space<vmem>>, %arg12: memref<4x1x32xf32, #tpu.memory_space<vmem>>, %arg13: memref<4x1x32xf32, #tpu.memory_space<vmem>>, %arg14: memref<4x1x32xf32, #tpu.memory_space<vmem>>, %arg15: memref<4x1x32xf32, #tpu.memory_space<vmem>>, %arg16: memref<4x32x64xf32, #tpu.memory_space<vmem>>, %arg17: memref<4x1x64xf32, #tpu.memory_space<vmem>>, %arg18: memref<4x64x32xf32, #tpu.memory_space<vmem>>, %arg19: memref<4x1x32xf32, #tpu.memory_space<vmem>>, %arg20: memref<32x25xf32, #tpu.memory_space<vmem>>, %arg21: memref<1x25xf32, #tpu.memory_space<vmem>>, %arg22: memref<1x8x25xf32, #tpu.memory_space<vmem>>) attributes {dimension_semantics = [#tpu.dimension_semantics<parallel>], iteration_bounds = array<i64: 2>, scalar_prefetch = 0 : i64, scratch_operands = 0 : i64, tpu.core_type = #tpu.core_type<tc>, window_params = [{transform_indices = @transform_0, window_bounds = array<i64: 1, 8, 32>}, {transform_indices = @transform_1, window_bounds = array<i64: 1, 8, 32>}, {transform_indices = @transform_2, window_bounds = array<i64: 1, 1, 8>}, {pipeline_mode = #tpu.pipeline_mode<synchronous>, transform_indices = @transform_3, window_bounds = array<i64: 2, 32, 96>}, {pipeline_mode = #tpu.pipeline_mode<synchronous>, transform_indices = @transform_4, window_bounds = array<i64: 2, 1, 96>}, {pipeline_mode = #tpu.pipeline_mode<synchronous>, transform_indices = @transform_5, window_bounds = array<i64: 2, 32, 32>}, {pipeline_mode = #tpu.pipeline_mode<synchronous>, transform_indices = @transform_6, window_bounds = array<i64: 2, 1, 32>}, {pipeline_mode = #tpu.pipeline_mode<synchronous>, transform_indices = @transform_7, window_bounds = array<i64: 2, 32, 64>}, {pipeline_mode = #tpu.pipeline_mode<synchronous>, transform_indices = @transform_8, window_bounds = array<i64: 2, 1, 64>}, {pipeline_mode = #tpu.pipeline_mode<synchronous>, transform_indices = @transform_9, window_bounds = array<i64: 4, 32, 32>}, {pipeline_mode = #tpu.pipeline_mode<synchronous>, transform_indices = @transform_10, window_bounds = array<i64: 4, 1, 32>}, {pipeline_mode = #tpu.pipeline_mode<synchronous>, transform_indices = @transform_11, window_bounds = array<i64: 4, 1, 32>}, {pipeline_mode = #tpu.pipeline_mode<synchronous>, transform_indices = @transform_12, window_bounds = array<i64: 4, 1, 32>}, {pipeline_mode = #tpu.pipeline_mode<synchronous>, transform_indices = @transform_13, window_bounds = array<i64: 4, 1, 32>}, {pipeline_mode = #tpu.pipeline_mode<synchronous>, transform_indices = @transform_14, window_bounds = array<i64: 4, 1, 32>}, {pipeline_mode = #tpu.pipeline_mode<synchronous>, transform_indices = @transform_15, window_bounds = array<i64: 4, 32, 64>}, {pipeline_mode = #tpu.pipeline_mode<synchronous>, transform_indices = @transform_16, window_bounds = array<i64: 4, 1, 64>}, {pipeline_mode = #tpu.pipeline_mode<synchronous>, transform_indices = @transform_17, window_bounds = array<i64: 4, 64, 32>}, {pipeline_mode = #tpu.pipeline_mode<synchronous>, transform_indices = @transform_18, window_bounds = array<i64: 4, 1, 32>}, {pipeline_mode = #tpu.pipeline_mode<synchronous>, transform_indices = @transform_19, window_bounds = array<i64: 32, 25>}, {pipeline_mode = #tpu.pipeline_mode<synchronous>, transform_indices = @transform_20, window_bounds = array<i64: 1, 25>}, {transform_indices = @transform_21, window_bounds = array<i64: 1, 8, 25>}]} {
    %c0 = arith.constant 0 : index
    %c0_0 = arith.constant 0 : index
    %c0_1 = arith.constant 0 : index
    %0 = vector.load %arg1[%c0, %c0_0, %c0_1] : memref<1x8x32xf32, #tpu.memory_space<vmem>>, vector<1x8x32xf32>
    %1 = vector.shape_cast %0 : vector<1x8x32xf32> to vector<8x32xf32>
    %c0_2 = arith.constant 0 : index
    %c0_3 = arith.constant 0 : index
    %c0_4 = arith.constant 0 : index
    %2 = vector.load %arg2[%c0_2, %c0_3, %c0_4] : memref<1x8x32xf32, #tpu.memory_space<vmem>>, vector<1x8x32xf32>
    %3 = vector.shape_cast %2 : vector<1x8x32xf32> to vector<8x32xf32>
    %c0_5 = arith.constant 0 : index
    %c0_6 = arith.constant 0 : index
    %c0_7 = arith.constant 0 : index
    %4 = vector.load %arg3[%c0_5, %c0_6, %c0_7] : memref<1x1x8xf32, #tpu.memory_space<vmem>>, vector<1x1x8xf32>
    %5 = vector.shape_cast %4 : vector<1x1x8xf32> to vector<1x8xf32>
    %cst = arith.constant 0.000000e+00 : f32
    %6 = vector.broadcast %cst : f32 to vector<1x8xf32>
    %7 = arith.cmpf oeq, %5, %6 : vector<1x8xf32>
    %cst_8 = arith.constant -1.000000e+09 : f32
    %cst_9 = arith.constant 0.000000e+00 : f32
    %8 = vector.broadcast %cst_8 : f32 to vector<1x8xf32>
    %9 = vector.broadcast %cst_9 : f32 to vector<1x8xf32>
    %10 = arith.select %7, %8, %9 : vector<1x8xi1>, vector<1x8xf32>
    %c0_10 = arith.constant 0 : index
    %c0_11 = arith.constant 0 : index
    %c0_12 = arith.constant 0 : index
    %11 = vector.load %arg4[%c0_10, %c0_11, %c0_12] : memref<2x32x96xf32, #tpu.memory_space<vmem>>, vector<1x32x96xf32>
    %12 = vector.shape_cast %11 : vector<1x32x96xf32> to vector<32x96xf32>
    %cst_13 = arith.constant dense<0.000000e+00> : vector<8x96xf32>
    %13 = tpu.matmul %1, %12, %cst_13 {dimension_numbers = #tpu.dot_dimension_numbers<[1], [0], [0], [1], [0, 0, 1, 1], [], []>} : vector<8x32xf32>, vector<32x96xf32>, vector<8x96xf32> -> vector<8x96xf32>
    %c0_14 = arith.constant 0 : index
    %c0_15 = arith.constant 0 : index
    %c0_16 = arith.constant 0 : index
    %14 = vector.load %arg5[%c0_14, %c0_15, %c0_16] : memref<2x1x96xf32, #tpu.memory_space<vmem>>, vector<1x1x96xf32>
    %15 = vector.shape_cast %14 : vector<1x1x96xf32> to vector<1x96xf32>
    %16 = vector.broadcast %15 : vector<1x96xf32> to vector<8x96xf32>
    %17 = arith.addf %13, %16 : vector<8x96xf32>
    %18 = vector.extract_strided_slice %17 {offsets = [0, 0], sizes = [8, 32], strides = [1, 1]} : vector<8x96xf32> to vector<8x32xf32>
    %19 = vector.extract_strided_slice %17 {offsets = [0, 32], sizes = [8, 32], strides = [1, 1]} : vector<8x96xf32> to vector<8x32xf32>
    %20 = vector.extract_strided_slice %17 {offsets = [0, 64], sizes = [8, 32], strides = [1, 1]} : vector<8x96xf32> to vector<8x32xf32>
    %21 = vector.extract_strided_slice %18 {offsets = [0, 0], sizes = [8, 8], strides = [1, 1]} : vector<8x32xf32> to vector<8x8xf32>
    %22 = vector.extract_strided_slice %19 {offsets = [0, 0], sizes = [8, 8], strides = [1, 1]} : vector<8x32xf32> to vector<8x8xf32>
    "tpu.trace_start"() <{level = 10 : i32, message = "kd,nd->kn"}> : () -> ()
    %cst_17 = arith.constant dense<0.000000e+00> : vector<8x8xf32>
    %23 = tpu.matmul %21, %22, %cst_17 {dimension_numbers = #tpu.dot_dimension_numbers<[1], [1], [0], [0], [0, 0, 1, 0], [], []>} : vector<8x8xf32>, vector<8x8xf32>, vector<8x8xf32> -> vector<8x8xf32>
    "tpu.trace_stop"() : () -> ()
    %cst_18 = arith.constant 0.353553385 : f32
    %24 = vector.broadcast %cst_18 : f32 to vector<8x8xf32>
    %25 = arith.mulf %23, %24 : vector<8x8xf32>
    %cst_19 = arith.constant dense<0xFF800000> : vector<8xf32>
    %26 = vector.multi_reduction <maximumf>, %25, %cst_19 [1] : vector<8x8xf32> to vector<8xf32>
    %27 = vector.shape_cast %26 : vector<8xf32> to vector<8x1xf32>
    %28 = vector.broadcast %27 : vector<8x1xf32> to vector<8x8xf32>
    %29 = arith.subf %25, %28 : vector<8x8xf32>
    %30 = math.exp %29 : vector<8x8xf32>
    %cst_20 = arith.constant dense<0.000000e+00> : vector<8xf32>
    %31 = vector.multi_reduction <add>, %30, %cst_20 [1] : vector<8x8xf32> to vector<8xf32>
    %32 = vector.shape_cast %31 : vector<8xf32> to vector<8x1xf32>
    %33 = tpu.reciprocal %32 {approx = true} : vector<8x1xf32> -> vector<8x1xf32>
    %34 = vector.broadcast %33 : vector<8x1xf32> to vector<8x8xf32>
    %35 = arith.mulf %30, %34 : vector<8x8xf32>
    %36 = vector.extract_strided_slice %20 {offsets = [0, 0], sizes = [8, 8], strides = [1, 1]} : vector<8x32xf32> to vector<8x8xf32>
    "tpu.trace_start"() <{level = 10 : i32, message = "kn,nd->kd"}> : () -> ()
    %cst_21 = arith.constant dense<0.000000e+00> : vector<8x8xf32>
    %37 = tpu.matmul %35, %36, %cst_21 {dimension_numbers = #tpu.dot_dimension_numbers<[1], [0], [0], [1], [0, 0, 1, 1], [], []>} : vector<8x8xf32>, vector<8x8xf32>, vector<8x8xf32> -> vector<8x8xf32>
    "tpu.trace_stop"() : () -> ()
    %38 = vector.extract_strided_slice %18 {offsets = [0, 8], sizes = [8, 8], strides = [1, 1]} : vector<8x32xf32> to vector<8x8xf32>
    %39 = vector.extract_strided_slice %19 {offsets = [0, 8], sizes = [8, 8], strides = [1, 1]} : vector<8x32xf32> to vector<8x8xf32>
    "tpu.trace_start"() <{level = 10 : i32, message = "kd,nd->kn"}> : () -> ()
    %cst_22 = arith.constant dense<0.000000e+00> : vector<8x8xf32>
    %40 = tpu.matmul %38, %39, %cst_22 {dimension_numbers = #tpu.dot_dimension_numbers<[1], [1], [0], [0], [0, 0, 1, 0], [], []>} : vector<8x8xf32>, vector<8x8xf32>, vector<8x8xf32> -> vector<8x8xf32>
    "tpu.trace_stop"() : () -> ()
    %cst_23 = arith.constant 0.353553385 : f32
    %41 = vector.broadcast %cst_23 : f32 to vector<8x8xf32>
    %42 = arith.mulf %40, %41 : vector<8x8xf32>
    %cst_24 = arith.constant dense<0xFF800000> : vector<8xf32>
    %43 = vector.multi_reduction <maximumf>, %42, %cst_24 [1] : vector<8x8xf32> to vector<8xf32>
    %44 = vector.shape_cast %43 : vector<8xf32> to vector<8x1xf32>
    %45 = vector.broadcast %44 : vector<8x1xf32> to vector<8x8xf32>
    %46 = arith.subf %42, %45 : vector<8x8xf32>
    %47 = math.exp %46 : vector<8x8xf32>
    %cst_25 = arith.constant dense<0.000000e+00> : vector<8xf32>
    %48 = vector.multi_reduction <add>, %47, %cst_25 [1] : vector<8x8xf32> to vector<8xf32>
    %49 = vector.shape_cast %48 : vector<8xf32> to vector<8x1xf32>
    %50 = tpu.reciprocal %49 {approx = true} : vector<8x1xf32> -> vector<8x1xf32>
    %51 = vector.broadcast %50 : vector<8x1xf32> to vector<8x8xf32>
    %52 = arith.mulf %47, %51 : vector<8x8xf32>
    %53 = vector.extract_strided_slice %20 {offsets = [0, 8], sizes = [8, 8], strides = [1, 1]} : vector<8x32xf32> to vector<8x8xf32>
    "tpu.trace_start"() <{level = 10 : i32, message = "kn,nd->kd"}> : () -> ()
    %cst_26 = arith.constant dense<0.000000e+00> : vector<8x8xf32>
    %54 = tpu.matmul %52, %53, %cst_26 {dimension_numbers = #tpu.dot_dimension_numbers<[1], [0], [0], [1], [0, 0, 1, 1], [], []>} : vector<8x8xf32>, vector<8x8xf32>, vector<8x8xf32> -> vector<8x8xf32>
    "tpu.trace_stop"() : () -> ()
    %55 = vector.extract_strided_slice %18 {offsets = [0, 16], sizes = [8, 8], strides = [1, 1]} : vector<8x32xf32> to vector<8x8xf32>
    %56 = vector.extract_strided_slice %19 {offsets = [0, 16], sizes = [8, 8], strides = [1, 1]} : vector<8x32xf32> to vector<8x8xf32>
    "tpu.trace_start"() <{level = 10 : i32, message = "kd,nd->kn"}> : () -> ()
    %cst_27 = arith.constant dense<0.000000e+00> : vector<8x8xf32>
    %57 = tpu.matmul %55, %56, %cst_27 {dimension_numbers = #tpu.dot_dimension_numbers<[1], [1], [0], [0], [0, 0, 1, 0], [], []>} : vector<8x8xf32>, vector<8x8xf32>, vector<8x8xf32> -> vector<8x8xf32>
    "tpu.trace_stop"() : () -> ()
    %cst_28 = arith.constant 0.353553385 : f32
    %58 = vector.broadcast %cst_28 : f32 to vector<8x8xf32>
    %59 = arith.mulf %57, %58 : vector<8x8xf32>
    %cst_29 = arith.constant dense<0xFF800000> : vector<8xf32>
    %60 = vector.multi_reduction <maximumf>, %59, %cst_29 [1] : vector<8x8xf32> to vector<8xf32>
    %61 = vector.shape_cast %60 : vector<8xf32> to vector<8x1xf32>
    %62 = vector.broadcast %61 : vector<8x1xf32> to vector<8x8xf32>
    %63 = arith.subf %59, %62 : vector<8x8xf32>
    %64 = math.exp %63 : vector<8x8xf32>
    %cst_30 = arith.constant dense<0.000000e+00> : vector<8xf32>
    %65 = vector.multi_reduction <add>, %64, %cst_30 [1] : vector<8x8xf32> to vector<8xf32>
    %66 = vector.shape_cast %65 : vector<8xf32> to vector<8x1xf32>
    %67 = tpu.reciprocal %66 {approx = true} : vector<8x1xf32> -> vector<8x1xf32>
    %68 = vector.broadcast %67 : vector<8x1xf32> to vector<8x8xf32>
    %69 = arith.mulf %64, %68 : vector<8x8xf32>
    %70 = vector.extract_strided_slice %20 {offsets = [0, 16], sizes = [8, 8], strides = [1, 1]} : vector<8x32xf32> to vector<8x8xf32>
    "tpu.trace_start"() <{level = 10 : i32, message = "kn,nd->kd"}> : () -> ()
    %cst_31 = arith.constant dense<0.000000e+00> : vector<8x8xf32>
    %71 = tpu.matmul %69, %70, %cst_31 {dimension_numbers = #tpu.dot_dimension_numbers<[1], [0], [0], [1], [0, 0, 1, 1], [], []>} : vector<8x8xf32>, vector<8x8xf32>, vector<8x8xf32> -> vector<8x8xf32>
    "tpu.trace_stop"() : () -> ()
    %72 = vector.extract_strided_slice %18 {offsets = [0, 24], sizes = [8, 8], strides = [1, 1]} : vector<8x32xf32> to vector<8x8xf32>
    %73 = vector.extract_strided_slice %19 {offsets = [0, 24], sizes = [8, 8], strides = [1, 1]} : vector<8x32xf32> to vector<8x8xf32>
    "tpu.trace_start"() <{level = 10 : i32, message = "kd,nd->kn"}> : () -> ()
    %cst_32 = arith.constant dense<0.000000e+00> : vector<8x8xf32>
    %74 = tpu.matmul %72, %73, %cst_32 {dimension_numbers = #tpu.dot_dimension_numbers<[1], [1], [0], [0], [0, 0, 1, 0], [], []>} : vector<8x8xf32>, vector<8x8xf32>, vector<8x8xf32> -> vector<8x8xf32>
    "tpu.trace_stop"() : () -> ()
    %cst_33 = arith.constant 0.353553385 : f32
    %75 = vector.broadcast %cst_33 : f32 to vector<8x8xf32>
    %76 = arith.mulf %74, %75 : vector<8x8xf32>
    %cst_34 = arith.constant dense<0xFF800000> : vector<8xf32>
    %77 = vector.multi_reduction <maximumf>, %76, %cst_34 [1] : vector<8x8xf32> to vector<8xf32>
    %78 = vector.shape_cast %77 : vector<8xf32> to vector<8x1xf32>
    %79 = vector.broadcast %78 : vector<8x1xf32> to vector<8x8xf32>
    %80 = arith.subf %76, %79 : vector<8x8xf32>
    %81 = math.exp %80 : vector<8x8xf32>
    %cst_35 = arith.constant dense<0.000000e+00> : vector<8xf32>
    %82 = vector.multi_reduction <add>, %81, %cst_35 [1] : vector<8x8xf32> to vector<8xf32>
    %83 = vector.shape_cast %82 : vector<8xf32> to vector<8x1xf32>
    %84 = tpu.reciprocal %83 {approx = true} : vector<8x1xf32> -> vector<8x1xf32>
    %85 = vector.broadcast %84 : vector<8x1xf32> to vector<8x8xf32>
    %86 = arith.mulf %81, %85 : vector<8x8xf32>
    %87 = vector.extract_strided_slice %20 {offsets = [0, 24], sizes = [8, 8], strides = [1, 1]} : vector<8x32xf32> to vector<8x8xf32>
    "tpu.trace_start"() <{level = 10 : i32, message = "kn,nd->kd"}> : () -> ()
    %cst_36 = arith.constant dense<0.000000e+00> : vector<8x8xf32>
    %88 = tpu.matmul %86, %87, %cst_36 {dimension_numbers = #tpu.dot_dimension_numbers<[1], [0], [0], [1], [0, 0, 1, 1], [], []>} : vector<8x8xf32>, vector<8x8xf32>, vector<8x8xf32> -> vector<8x8xf32>
    "tpu.trace_stop"() : () -> ()
    %89 = tpu.concatenate %37, %54, %71, %88 in 1 : vector<8x8xf32>, vector<8x8xf32>, vector<8x8xf32>, vector<8x8xf32> -> vector<8x32xf32>
    %c0_37 = arith.constant 0 : index
    %c0_38 = arith.constant 0 : index
    %c0_39 = arith.constant 0 : index
    %90 = vector.load %arg10[%c0_37, %c0_38, %c0_39] : memref<4x32x32xf32, #tpu.memory_space<vmem>>, vector<1x32x32xf32>
    %91 = vector.shape_cast %90 : vector<1x32x32xf32> to vector<32x32xf32>
    %cst_40 = arith.constant dense<0.000000e+00> : vector<8x32xf32>
    %92 = tpu.matmul %89, %91, %cst_40 {dimension_numbers = #tpu.dot_dimension_numbers<[1], [0], [0], [1], [0, 0, 1, 1], [], []>} : vector<8x32xf32>, vector<32x32xf32>, vector<8x32xf32> -> vector<8x32xf32>
    %c0_41 = arith.constant 0 : index
    %c0_42 = arith.constant 0 : index
    %c0_43 = arith.constant 0 : index
    %93 = vector.load %arg11[%c0_41, %c0_42, %c0_43] : memref<4x1x32xf32, #tpu.memory_space<vmem>>, vector<1x1x32xf32>
    %94 = vector.shape_cast %93 : vector<1x1x32xf32> to vector<1x32xf32>
    %95 = vector.broadcast %94 : vector<1x32xf32> to vector<8x32xf32>
    %96 = arith.addf %92, %95 : vector<8x32xf32>
    %97 = arith.addf %96, %1 : vector<8x32xf32>
    %c0_44 = arith.constant 0 : index
    %c0_45 = arith.constant 0 : index
    %c0_46 = arith.constant 0 : index
    %98 = vector.load %arg12[%c0_44, %c0_45, %c0_46] : memref<4x1x32xf32, #tpu.memory_space<vmem>>, vector<1x1x32xf32>
    %99 = vector.shape_cast %98 : vector<1x1x32xf32> to vector<1x32xf32>
    %c0_47 = arith.constant 0 : index
    %c0_48 = arith.constant 0 : index
    %c0_49 = arith.constant 0 : index
    %100 = vector.load %arg13[%c0_47, %c0_48, %c0_49] : memref<4x1x32xf32, #tpu.memory_space<vmem>>, vector<1x1x32xf32>
    %101 = vector.shape_cast %100 : vector<1x1x32xf32> to vector<1x32xf32>
    %cst_50 = arith.constant dense<0.000000e+00> : vector<8xf32>
    %102 = vector.multi_reduction <add>, %97, %cst_50 [1] : vector<8x32xf32> to vector<8xf32>
    %103 = vector.shape_cast %102 : vector<8xf32> to vector<8x1xf32>
    %cst_51 = arith.constant 3.200000e+01 : f32
    %104 = vector.broadcast %cst_51 : f32 to vector<8x1xf32>
    %105 = arith.divf %103, %104 : vector<8x1xf32>
    %106 = vector.broadcast %105 : vector<8x1xf32> to vector<8x32xf32>
    %107 = arith.subf %97, %106 : vector<8x32xf32>
    %108 = arith.mulf %107, %107 : vector<8x32xf32>
    %cst_52 = arith.constant dense<0.000000e+00> : vector<8xf32>
    %109 = vector.multi_reduction <add>, %108, %cst_52 [1] : vector<8x32xf32> to vector<8xf32>
    %110 = vector.shape_cast %109 : vector<8xf32> to vector<8x1xf32>
    %cst_53 = arith.constant 0.0322580636 : f32
    %111 = vector.broadcast %cst_53 : f32 to vector<8x1xf32>
    %112 = arith.mulf %110, %111 : vector<8x1xf32>
    %113 = math.sqrt %112 : vector<8x1xf32>
    %cst_54 = arith.constant 9.99999997E-7 : f32
    %114 = vector.broadcast %cst_54 : f32 to vector<8x1xf32>
    %115 = arith.addf %113, %114 : vector<8x1xf32>
    %116 = tpu.reciprocal %115 {approx = true} : vector<8x1xf32> -> vector<8x1xf32>
    %117 = vector.broadcast %105 : vector<8x1xf32> to vector<8x32xf32>
    %118 = arith.subf %97, %117 : vector<8x32xf32>
    %119 = vector.broadcast %99 : vector<1x32xf32> to vector<8x32xf32>
    %120 = arith.mulf %119, %118 : vector<8x32xf32>
    %121 = vector.broadcast %116 : vector<8x1xf32> to vector<8x32xf32>
    %122 = arith.mulf %120, %121 : vector<8x32xf32>
    %123 = vector.broadcast %101 : vector<1x32xf32> to vector<8x32xf32>
    %124 = arith.addf %122, %123 : vector<8x32xf32>
    %c0_55 = arith.constant 0 : index
    %c0_56 = arith.constant 0 : index
    %c0_57 = arith.constant 0 : index
    %125 = vector.load %arg16[%c0_55, %c0_56, %c0_57] : memref<4x32x64xf32, #tpu.memory_space<vmem>>, vector<1x32x64xf32>
    %126 = vector.shape_cast %125 : vector<1x32x64xf32> to vector<32x64xf32>
    %cst_58 = arith.constant dense<0.000000e+00> : vector<8x64xf32>
    %127 = tpu.matmul %124, %126, %cst_58 {dimension_numbers = #tpu.dot_dimension_numbers<[1], [0], [0], [1], [0, 0, 1, 1], [], []>} : vector<8x32xf32>, vector<32x64xf32>, vector<8x64xf32> -> vector<8x64xf32>
    %c0_59 = arith.constant 0 : index
    %c0_60 = arith.constant 0 : index
    %c0_61 = arith.constant 0 : index
    %128 = vector.load %arg17[%c0_59, %c0_60, %c0_61] : memref<4x1x64xf32, #tpu.memory_space<vmem>>, vector<1x1x64xf32>
    %129 = vector.shape_cast %128 : vector<1x1x64xf32> to vector<1x64xf32>
    %130 = vector.broadcast %129 : vector<1x64xf32> to vector<8x64xf32>
    %131 = arith.addf %127, %130 : vector<8x64xf32>
    %cst_62 = arith.constant 0.000000e+00 : f32
    %132 = vector.broadcast %cst_62 : f32 to vector<8x64xf32>
    %133 = arith.maximumf %131, %132 : vector<8x64xf32>
    %c0_63 = arith.constant 0 : index
    %c0_64 = arith.constant 0 : index
    %c0_65 = arith.constant 0 : index
    %134 = vector.load %arg18[%c0_63, %c0_64, %c0_65] : memref<4x64x32xf32, #tpu.memory_space<vmem>>, vector<1x64x32xf32>
    %135 = vector.shape_cast %134 : vector<1x64x32xf32> to vector<64x32xf32>
    %cst_66 = arith.constant dense<0.000000e+00> : vector<8x32xf32>
    %136 = tpu.matmul %133, %135, %cst_66 {dimension_numbers = #tpu.dot_dimension_numbers<[1], [0], [0], [1], [0, 0, 1, 1], [], []>} : vector<8x64xf32>, vector<64x32xf32>, vector<8x32xf32> -> vector<8x32xf32>
    %c0_67 = arith.constant 0 : index
    %c0_68 = arith.constant 0 : index
    %c0_69 = arith.constant 0 : index
    %137 = vector.load %arg19[%c0_67, %c0_68, %c0_69] : memref<4x1x32xf32, #tpu.memory_space<vmem>>, vector<1x1x32xf32>
    %138 = vector.shape_cast %137 : vector<1x1x32xf32> to vector<1x32xf32>
    %139 = vector.broadcast %138 : vector<1x32xf32> to vector<8x32xf32>
    %140 = arith.addf %136, %139 : vector<8x32xf32>
    %141 = arith.addf %140, %124 : vector<8x32xf32>
    %c0_70 = arith.constant 0 : index
    %c0_71 = arith.constant 0 : index
    %c0_72 = arith.constant 0 : index
    %142 = vector.load %arg14[%c0_70, %c0_71, %c0_72] : memref<4x1x32xf32, #tpu.memory_space<vmem>>, vector<1x1x32xf32>
    %143 = vector.shape_cast %142 : vector<1x1x32xf32> to vector<1x32xf32>
    %c0_73 = arith.constant 0 : index
    %c0_74 = arith.constant 0 : index
    %c0_75 = arith.constant 0 : index
    %144 = vector.load %arg15[%c0_73, %c0_74, %c0_75] : memref<4x1x32xf32, #tpu.memory_space<vmem>>, vector<1x1x32xf32>
    %145 = vector.shape_cast %144 : vector<1x1x32xf32> to vector<1x32xf32>
    %cst_76 = arith.constant dense<0.000000e+00> : vector<8xf32>
    %146 = vector.multi_reduction <add>, %141, %cst_76 [1] : vector<8x32xf32> to vector<8xf32>
    %147 = vector.shape_cast %146 : vector<8xf32> to vector<8x1xf32>
    %cst_77 = arith.constant 3.200000e+01 : f32
    %148 = vector.broadcast %cst_77 : f32 to vector<8x1xf32>
    %149 = arith.divf %147, %148 : vector<8x1xf32>
    %150 = vector.broadcast %149 : vector<8x1xf32> to vector<8x32xf32>
    %151 = arith.subf %141, %150 : vector<8x32xf32>
    %152 = arith.mulf %151, %151 : vector<8x32xf32>
    %cst_78 = arith.constant dense<0.000000e+00> : vector<8xf32>
    %153 = vector.multi_reduction <add>, %152, %cst_78 [1] : vector<8x32xf32> to vector<8xf32>
    %154 = vector.shape_cast %153 : vector<8xf32> to vector<8x1xf32>
    %cst_79 = arith.constant 0.0322580636 : f32
    %155 = vector.broadcast %cst_79 : f32 to vector<8x1xf32>
    %156 = arith.mulf %154, %155 : vector<8x1xf32>
    %157 = math.sqrt %156 : vector<8x1xf32>
    %cst_80 = arith.constant 9.99999997E-7 : f32
    %158 = vector.broadcast %cst_80 : f32 to vector<8x1xf32>
    %159 = arith.addf %157, %158 : vector<8x1xf32>
    %160 = tpu.reciprocal %159 {approx = true} : vector<8x1xf32> -> vector<8x1xf32>
    %161 = vector.broadcast %149 : vector<8x1xf32> to vector<8x32xf32>
    %162 = arith.subf %141, %161 : vector<8x32xf32>
    %163 = vector.broadcast %143 : vector<1x32xf32> to vector<8x32xf32>
    %164 = arith.mulf %163, %162 : vector<8x32xf32>
    %165 = vector.broadcast %160 : vector<8x1xf32> to vector<8x32xf32>
    %166 = arith.mulf %164, %165 : vector<8x32xf32>
    %167 = vector.broadcast %145 : vector<1x32xf32> to vector<8x32xf32>
    %168 = arith.addf %166, %167 : vector<8x32xf32>
    %c0_81 = arith.constant 0 : index
    %c0_82 = arith.constant 0 : index
    %c0_83 = arith.constant 0 : index
    %169 = vector.load %arg6[%c0_81, %c0_82, %c0_83] : memref<2x32x32xf32, #tpu.memory_space<vmem>>, vector<1x32x32xf32>
    %170 = vector.shape_cast %169 : vector<1x32x32xf32> to vector<32x32xf32>
    %cst_84 = arith.constant dense<0.000000e+00> : vector<8x32xf32>
    %171 = tpu.matmul %168, %170, %cst_84 {dimension_numbers = #tpu.dot_dimension_numbers<[1], [0], [0], [1], [0, 0, 1, 1], [], []>} : vector<8x32xf32>, vector<32x32xf32>, vector<8x32xf32> -> vector<8x32xf32>
    %c0_85 = arith.constant 0 : index
    %c0_86 = arith.constant 0 : index
    %c0_87 = arith.constant 0 : index
    %172 = vector.load %arg7[%c0_85, %c0_86, %c0_87] : memref<2x1x32xf32, #tpu.memory_space<vmem>>, vector<1x1x32xf32>
    %173 = vector.shape_cast %172 : vector<1x1x32xf32> to vector<1x32xf32>
    %174 = vector.broadcast %173 : vector<1x32xf32> to vector<8x32xf32>
    %175 = arith.addf %171, %174 : vector<8x32xf32>
    %c0_88 = arith.constant 0 : index
    %c0_89 = arith.constant 0 : index
    %c0_90 = arith.constant 0 : index
    %176 = vector.load %arg8[%c0_88, %c0_89, %c0_90] : memref<2x32x64xf32, #tpu.memory_space<vmem>>, vector<1x32x64xf32>
    %177 = vector.shape_cast %176 : vector<1x32x64xf32> to vector<32x64xf32>
    %cst_91 = arith.constant dense<0.000000e+00> : vector<8x64xf32>
    %178 = tpu.matmul %3, %177, %cst_91 {dimension_numbers = #tpu.dot_dimension_numbers<[1], [0], [0], [1], [0, 0, 1, 1], [], []>} : vector<8x32xf32>, vector<32x64xf32>, vector<8x64xf32> -> vector<8x64xf32>
    %c0_92 = arith.constant 0 : index
    %c0_93 = arith.constant 0 : index
    %c0_94 = arith.constant 0 : index
    %179 = vector.load %arg9[%c0_92, %c0_93, %c0_94] : memref<2x1x64xf32, #tpu.memory_space<vmem>>, vector<1x1x64xf32>
    %180 = vector.shape_cast %179 : vector<1x1x64xf32> to vector<1x64xf32>
    %181 = vector.broadcast %180 : vector<1x64xf32> to vector<8x64xf32>
    %182 = arith.addf %178, %181 : vector<8x64xf32>
    %183 = vector.extract_strided_slice %182 {offsets = [0, 0], sizes = [8, 32], strides = [1, 1]} : vector<8x64xf32> to vector<8x32xf32>
    %184 = vector.extract_strided_slice %182 {offsets = [0, 32], sizes = [8, 32], strides = [1, 1]} : vector<8x64xf32> to vector<8x32xf32>
    %185 = vector.extract_strided_slice %175 {offsets = [0, 0], sizes = [8, 8], strides = [1, 1]} : vector<8x32xf32> to vector<8x8xf32>
    %186 = vector.extract_strided_slice %183 {offsets = [0, 0], sizes = [8, 8], strides = [1, 1]} : vector<8x32xf32> to vector<8x8xf32>
    "tpu.trace_start"() <{level = 10 : i32, message = "kd,nd->kn"}> : () -> ()
    %cst_95 = arith.constant dense<0.000000e+00> : vector<8x8xf32>
    %187 = tpu.matmul %185, %186, %cst_95 {dimension_numbers = #tpu.dot_dimension_numbers<[1], [1], [0], [0], [0, 0, 1, 0], [], []>} : vector<8x8xf32>, vector<8x8xf32>, vector<8x8xf32> -> vector<8x8xf32>
    "tpu.trace_stop"() : () -> ()
    %cst_96 = arith.constant 0.353553385 : f32
    %188 = vector.broadcast %cst_96 : f32 to vector<8x8xf32>
    %189 = arith.mulf %187, %188 : vector<8x8xf32>
    %190 = vector.broadcast %10 : vector<1x8xf32> to vector<8x8xf32>
    %191 = arith.addf %189, %190 : vector<8x8xf32>
    %cst_97 = arith.constant dense<0xFF800000> : vector<8xf32>
    %192 = vector.multi_reduction <maximumf>, %191, %cst_97 [1] : vector<8x8xf32> to vector<8xf32>
    %193 = vector.shape_cast %192 : vector<8xf32> to vector<8x1xf32>
    %194 = vector.broadcast %193 : vector<8x1xf32> to vector<8x8xf32>
    %195 = arith.subf %191, %194 : vector<8x8xf32>
    %196 = math.exp %195 : vector<8x8xf32>
    %cst_98 = arith.constant dense<0.000000e+00> : vector<8xf32>
    %197 = vector.multi_reduction <add>, %196, %cst_98 [1] : vector<8x8xf32> to vector<8xf32>
    %198 = vector.shape_cast %197 : vector<8xf32> to vector<8x1xf32>
    %199 = tpu.reciprocal %198 {approx = true} : vector<8x1xf32> -> vector<8x1xf32>
    %200 = vector.broadcast %199 : vector<8x1xf32> to vector<8x8xf32>
    %201 = arith.mulf %196, %200 : vector<8x8xf32>
    %202 = vector.extract_strided_slice %184 {offsets = [0, 0], sizes = [8, 8], strides = [1, 1]} : vector<8x32xf32> to vector<8x8xf32>
    "tpu.trace_start"() <{level = 10 : i32, message = "kn,nd->kd"}> : () -> ()
    %cst_99 = arith.constant dense<0.000000e+00> : vector<8x8xf32>
    %203 = tpu.matmul %201, %202, %cst_99 {dimension_numbers = #tpu.dot_dimension_numbers<[1], [0], [0], [1], [0, 0, 1, 1], [], []>} : vector<8x8xf32>, vector<8x8xf32>, vector<8x8xf32> -> vector<8x8xf32>
    "tpu.trace_stop"() : () -> ()
    %204 = vector.extract_strided_slice %175 {offsets = [0, 8], sizes = [8, 8], strides = [1, 1]} : vector<8x32xf32> to vector<8x8xf32>
    %205 = vector.extract_strided_slice %183 {offsets = [0, 8], sizes = [8, 8], strides = [1, 1]} : vector<8x32xf32> to vector<8x8xf32>
    "tpu.trace_start"() <{level = 10 : i32, message = "kd,nd->kn"}> : () -> ()
    %cst_100 = arith.constant dense<0.000000e+00> : vector<8x8xf32>
    %206 = tpu.matmul %204, %205, %cst_100 {dimension_numbers = #tpu.dot_dimension_numbers<[1], [1], [0], [0], [0, 0, 1, 0], [], []>} : vector<8x8xf32>, vector<8x8xf32>, vector<8x8xf32> -> vector<8x8xf32>
    "tpu.trace_stop"() : () -> ()
    %cst_101 = arith.constant 0.353553385 : f32
    %207 = vector.broadcast %cst_101 : f32 to vector<8x8xf32>
    %208 = arith.mulf %206, %207 : vector<8x8xf32>
    %209 = vector.broadcast %10 : vector<1x8xf32> to vector<8x8xf32>
    %210 = arith.addf %208, %209 : vector<8x8xf32>
    %cst_102 = arith.constant dense<0xFF800000> : vector<8xf32>
    %211 = vector.multi_reduction <maximumf>, %210, %cst_102 [1] : vector<8x8xf32> to vector<8xf32>
    %212 = vector.shape_cast %211 : vector<8xf32> to vector<8x1xf32>
    %213 = vector.broadcast %212 : vector<8x1xf32> to vector<8x8xf32>
    %214 = arith.subf %210, %213 : vector<8x8xf32>
    %215 = math.exp %214 : vector<8x8xf32>
    %cst_103 = arith.constant dense<0.000000e+00> : vector<8xf32>
    %216 = vector.multi_reduction <add>, %215, %cst_103 [1] : vector<8x8xf32> to vector<8xf32>
    %217 = vector.shape_cast %216 : vector<8xf32> to vector<8x1xf32>
    %218 = tpu.reciprocal %217 {approx = true} : vector<8x1xf32> -> vector<8x1xf32>
    %219 = vector.broadcast %218 : vector<8x1xf32> to vector<8x8xf32>
    %220 = arith.mulf %215, %219 : vector<8x8xf32>
    %221 = vector.extract_strided_slice %184 {offsets = [0, 8], sizes = [8, 8], strides = [1, 1]} : vector<8x32xf32> to vector<8x8xf32>
    "tpu.trace_start"() <{level = 10 : i32, message = "kn,nd->kd"}> : () -> ()
    %cst_104 = arith.constant dense<0.000000e+00> : vector<8x8xf32>
    %222 = tpu.matmul %220, %221, %cst_104 {dimension_numbers = #tpu.dot_dimension_numbers<[1], [0], [0], [1], [0, 0, 1, 1], [], []>} : vector<8x8xf32>, vector<8x8xf32>, vector<8x8xf32> -> vector<8x8xf32>
    "tpu.trace_stop"() : () -> ()
    %223 = vector.extract_strided_slice %175 {offsets = [0, 16], sizes = [8, 8], strides = [1, 1]} : vector<8x32xf32> to vector<8x8xf32>
    %224 = vector.extract_strided_slice %183 {offsets = [0, 16], sizes = [8, 8], strides = [1, 1]} : vector<8x32xf32> to vector<8x8xf32>
    "tpu.trace_start"() <{level = 10 : i32, message = "kd,nd->kn"}> : () -> ()
    %cst_105 = arith.constant dense<0.000000e+00> : vector<8x8xf32>
    %225 = tpu.matmul %223, %224, %cst_105 {dimension_numbers = #tpu.dot_dimension_numbers<[1], [1], [0], [0], [0, 0, 1, 0], [], []>} : vector<8x8xf32>, vector<8x8xf32>, vector<8x8xf32> -> vector<8x8xf32>
    "tpu.trace_stop"() : () -> ()
    %cst_106 = arith.constant 0.353553385 : f32
    %226 = vector.broadcast %cst_106 : f32 to vector<8x8xf32>
    %227 = arith.mulf %225, %226 : vector<8x8xf32>
    %228 = vector.broadcast %10 : vector<1x8xf32> to vector<8x8xf32>
    %229 = arith.addf %227, %228 : vector<8x8xf32>
    %cst_107 = arith.constant dense<0xFF800000> : vector<8xf32>
    %230 = vector.multi_reduction <maximumf>, %229, %cst_107 [1] : vector<8x8xf32> to vector<8xf32>
    %231 = vector.shape_cast %230 : vector<8xf32> to vector<8x1xf32>
    %232 = vector.broadcast %231 : vector<8x1xf32> to vector<8x8xf32>
    %233 = arith.subf %229, %232 : vector<8x8xf32>
    %234 = math.exp %233 : vector<8x8xf32>
    %cst_108 = arith.constant dense<0.000000e+00> : vector<8xf32>
    %235 = vector.multi_reduction <add>, %234, %cst_108 [1] : vector<8x8xf32> to vector<8xf32>
    %236 = vector.shape_cast %235 : vector<8xf32> to vector<8x1xf32>
    %237 = tpu.reciprocal %236 {approx = true} : vector<8x1xf32> -> vector<8x1xf32>
    %238 = vector.broadcast %237 : vector<8x1xf32> to vector<8x8xf32>
    %239 = arith.mulf %234, %238 : vector<8x8xf32>
    %240 = vector.extract_strided_slice %184 {offsets = [0, 16], sizes = [8, 8], strides = [1, 1]} : vector<8x32xf32> to vector<8x8xf32>
    "tpu.trace_start"() <{level = 10 : i32, message = "kn,nd->kd"}> : () -> ()
    %cst_109 = arith.constant dense<0.000000e+00> : vector<8x8xf32>
    %241 = tpu.matmul %239, %240, %cst_109 {dimension_numbers = #tpu.dot_dimension_numbers<[1], [0], [0], [1], [0, 0, 1, 1], [], []>} : vector<8x8xf32>, vector<8x8xf32>, vector<8x8xf32> -> vector<8x8xf32>
    "tpu.trace_stop"() : () -> ()
    %242 = vector.extract_strided_slice %175 {offsets = [0, 24], sizes = [8, 8], strides = [1, 1]} : vector<8x32xf32> to vector<8x8xf32>
    %243 = vector.extract_strided_slice %183 {offsets = [0, 24], sizes = [8, 8], strides = [1, 1]} : vector<8x32xf32> to vector<8x8xf32>
    "tpu.trace_start"() <{level = 10 : i32, message = "kd,nd->kn"}> : () -> ()
    %cst_110 = arith.constant dense<0.000000e+00> : vector<8x8xf32>
    %244 = tpu.matmul %242, %243, %cst_110 {dimension_numbers = #tpu.dot_dimension_numbers<[1], [1], [0], [0], [0, 0, 1, 0], [], []>} : vector<8x8xf32>, vector<8x8xf32>, vector<8x8xf32> -> vector<8x8xf32>
    "tpu.trace_stop"() : () -> ()
    %cst_111 = arith.constant 0.353553385 : f32
    %245 = vector.broadcast %cst_111 : f32 to vector<8x8xf32>
    %246 = arith.mulf %244, %245 : vector<8x8xf32>
    %247 = vector.broadcast %10 : vector<1x8xf32> to vector<8x8xf32>
    %248 = arith.addf %246, %247 : vector<8x8xf32>
    %cst_112 = arith.constant dense<0xFF800000> : vector<8xf32>
    %249 = vector.multi_reduction <maximumf>, %248, %cst_112 [1] : vector<8x8xf32> to vector<8xf32>
    %250 = vector.shape_cast %249 : vector<8xf32> to vector<8x1xf32>
    %251 = vector.broadcast %250 : vector<8x1xf32> to vector<8x8xf32>
    %252 = arith.subf %248, %251 : vector<8x8xf32>
    %253 = math.exp %252 : vector<8x8xf32>
    %cst_113 = arith.constant dense<0.000000e+00> : vector<8xf32>
    %254 = vector.multi_reduction <add>, %253, %cst_113 [1] : vector<8x8xf32> to vector<8xf32>
    %255 = vector.shape_cast %254 : vector<8xf32> to vector<8x1xf32>
    %256 = tpu.reciprocal %255 {approx = true} : vector<8x1xf32> -> vector<8x1xf32>
    %257 = vector.broadcast %256 : vector<8x1xf32> to vector<8x8xf32>
    %258 = arith.mulf %253, %257 : vector<8x8xf32>
    %259 = vector.extract_strided_slice %184 {offsets = [0, 24], sizes = [8, 8], strides = [1, 1]} : vector<8x32xf32> to vector<8x8xf32>
    "tpu.trace_start"() <{level = 10 : i32, message = "kn,nd->kd"}> : () -> ()
    %cst_114 = arith.constant dense<0.000000e+00> : vector<8x8xf32>
    %260 = tpu.matmul %258, %259, %cst_114 {dimension_numbers = #tpu.dot_dimension_numbers<[1], [0], [0], [1], [0, 0, 1, 1], [], []>} : vector<8x8xf32>, vector<8x8xf32>, vector<8x8xf32> -> vector<8x8xf32>
    "tpu.trace_stop"() : () -> ()
    %261 = tpu.concatenate %203, %222, %241, %260 in 1 : vector<8x8xf32>, vector<8x8xf32>, vector<8x8xf32>, vector<8x8xf32> -> vector<8x32xf32>
    %c1 = arith.constant 1 : index
    %c0_115 = arith.constant 0 : index
    %c0_116 = arith.constant 0 : index
    %262 = vector.load %arg10[%c1, %c0_115, %c0_116] : memref<4x32x32xf32, #tpu.memory_space<vmem>>, vector<1x32x32xf32>
    %263 = vector.shape_cast %262 : vector<1x32x32xf32> to vector<32x32xf32>
    %cst_117 = arith.constant dense<0.000000e+00> : vector<8x32xf32>
    %264 = tpu.matmul %261, %263, %cst_117 {dimension_numbers = #tpu.dot_dimension_numbers<[1], [0], [0], [1], [0, 0, 1, 1], [], []>} : vector<8x32xf32>, vector<32x32xf32>, vector<8x32xf32> -> vector<8x32xf32>
    %c1_118 = arith.constant 1 : index
    %c0_119 = arith.constant 0 : index
    %c0_120 = arith.constant 0 : index
    %265 = vector.load %arg11[%c1_118, %c0_119, %c0_120] : memref<4x1x32xf32, #tpu.memory_space<vmem>>, vector<1x1x32xf32>
    %266 = vector.shape_cast %265 : vector<1x1x32xf32> to vector<1x32xf32>
    %267 = vector.broadcast %266 : vector<1x32xf32> to vector<8x32xf32>
    %268 = arith.addf %264, %267 : vector<8x32xf32>
    %269 = arith.addf %268, %168 : vector<8x32xf32>
    %c1_121 = arith.constant 1 : index
    %c0_122 = arith.constant 0 : index
    %c0_123 = arith.constant 0 : index
    %270 = vector.load %arg12[%c1_121, %c0_122, %c0_123] : memref<4x1x32xf32, #tpu.memory_space<vmem>>, vector<1x1x32xf32>
    %271 = vector.shape_cast %270 : vector<1x1x32xf32> to vector<1x32xf32>
    %c1_124 = arith.constant 1 : index
    %c0_125 = arith.constant 0 : index
    %c0_126 = arith.constant 0 : index
    %272 = vector.load %arg13[%c1_124, %c0_125, %c0_126] : memref<4x1x32xf32, #tpu.memory_space<vmem>>, vector<1x1x32xf32>
    %273 = vector.shape_cast %272 : vector<1x1x32xf32> to vector<1x32xf32>
    %cst_127 = arith.constant dense<0.000000e+00> : vector<8xf32>
    %274 = vector.multi_reduction <add>, %269, %cst_127 [1] : vector<8x32xf32> to vector<8xf32>
    %275 = vector.shape_cast %274 : vector<8xf32> to vector<8x1xf32>
    %cst_128 = arith.constant 3.200000e+01 : f32
    %276 = vector.broadcast %cst_128 : f32 to vector<8x1xf32>
    %277 = arith.divf %275, %276 : vector<8x1xf32>
    %278 = vector.broadcast %277 : vector<8x1xf32> to vector<8x32xf32>
    %279 = arith.subf %269, %278 : vector<8x32xf32>
    %280 = arith.mulf %279, %279 : vector<8x32xf32>
    %cst_129 = arith.constant dense<0.000000e+00> : vector<8xf32>
    %281 = vector.multi_reduction <add>, %280, %cst_129 [1] : vector<8x32xf32> to vector<8xf32>
    %282 = vector.shape_cast %281 : vector<8xf32> to vector<8x1xf32>
    %cst_130 = arith.constant 0.0322580636 : f32
    %283 = vector.broadcast %cst_130 : f32 to vector<8x1xf32>
    %284 = arith.mulf %282, %283 : vector<8x1xf32>
    %285 = math.sqrt %284 : vector<8x1xf32>
    %cst_131 = arith.constant 9.99999997E-7 : f32
    %286 = vector.broadcast %cst_131 : f32 to vector<8x1xf32>
    %287 = arith.addf %285, %286 : vector<8x1xf32>
    %288 = tpu.reciprocal %287 {approx = true} : vector<8x1xf32> -> vector<8x1xf32>
    %289 = vector.broadcast %277 : vector<8x1xf32> to vector<8x32xf32>
    %290 = arith.subf %269, %289 : vector<8x32xf32>
    %291 = vector.broadcast %271 : vector<1x32xf32> to vector<8x32xf32>
    %292 = arith.mulf %291, %290 : vector<8x32xf32>
    %293 = vector.broadcast %288 : vector<8x1xf32> to vector<8x32xf32>
    %294 = arith.mulf %292, %293 : vector<8x32xf32>
    %295 = vector.broadcast %273 : vector<1x32xf32> to vector<8x32xf32>
    %296 = arith.addf %294, %295 : vector<8x32xf32>
    %c1_132 = arith.constant 1 : index
    %c0_133 = arith.constant 0 : index
    %c0_134 = arith.constant 0 : index
    %297 = vector.load %arg16[%c1_132, %c0_133, %c0_134] : memref<4x32x64xf32, #tpu.memory_space<vmem>>, vector<1x32x64xf32>
    %298 = vector.shape_cast %297 : vector<1x32x64xf32> to vector<32x64xf32>
    %cst_135 = arith.constant dense<0.000000e+00> : vector<8x64xf32>
    %299 = tpu.matmul %296, %298, %cst_135 {dimension_numbers = #tpu.dot_dimension_numbers<[1], [0], [0], [1], [0, 0, 1, 1], [], []>} : vector<8x32xf32>, vector<32x64xf32>, vector<8x64xf32> -> vector<8x64xf32>
    %c1_136 = arith.constant 1 : index
    %c0_137 = arith.constant 0 : index
    %c0_138 = arith.constant 0 : index
    %300 = vector.load %arg17[%c1_136, %c0_137, %c0_138] : memref<4x1x64xf32, #tpu.memory_space<vmem>>, vector<1x1x64xf32>
    %301 = vector.shape_cast %300 : vector<1x1x64xf32> to vector<1x64xf32>
    %302 = vector.broadcast %301 : vector<1x64xf32> to vector<8x64xf32>
    %303 = arith.addf %299, %302 : vector<8x64xf32>
    %cst_139 = arith.constant 0.000000e+00 : f32
    %304 = vector.broadcast %cst_139 : f32 to vector<8x64xf32>
    %305 = arith.maximumf %303, %304 : vector<8x64xf32>
    %c1_140 = arith.constant 1 : index
    %c0_141 = arith.constant 0 : index
    %c0_142 = arith.constant 0 : index
    %306 = vector.load %arg18[%c1_140, %c0_141, %c0_142] : memref<4x64x32xf32, #tpu.memory_space<vmem>>, vector<1x64x32xf32>
    %307 = vector.shape_cast %306 : vector<1x64x32xf32> to vector<64x32xf32>
    %cst_143 = arith.constant dense<0.000000e+00> : vector<8x32xf32>
    %308 = tpu.matmul %305, %307, %cst_143 {dimension_numbers = #tpu.dot_dimension_numbers<[1], [0], [0], [1], [0, 0, 1, 1], [], []>} : vector<8x64xf32>, vector<64x32xf32>, vector<8x32xf32> -> vector<8x32xf32>
    %c1_144 = arith.constant 1 : index
    %c0_145 = arith.constant 0 : index
    %c0_146 = arith.constant 0 : index
    %309 = vector.load %arg19[%c1_144, %c0_145, %c0_146] : memref<4x1x32xf32, #tpu.memory_space<vmem>>, vector<1x1x32xf32>
    %310 = vector.shape_cast %309 : vector<1x1x32xf32> to vector<1x32xf32>
    %311 = vector.broadcast %310 : vector<1x32xf32> to vector<8x32xf32>
    %312 = arith.addf %308, %311 : vector<8x32xf32>
    %313 = arith.addf %312, %296 : vector<8x32xf32>
    %c1_147 = arith.constant 1 : index
    %c0_148 = arith.constant 0 : index
    %c0_149 = arith.constant 0 : index
    %314 = vector.load %arg14[%c1_147, %c0_148, %c0_149] : memref<4x1x32xf32, #tpu.memory_space<vmem>>, vector<1x1x32xf32>
    %315 = vector.shape_cast %314 : vector<1x1x32xf32> to vector<1x32xf32>
    %c1_150 = arith.constant 1 : index
    %c0_151 = arith.constant 0 : index
    %c0_152 = arith.constant 0 : index
    %316 = vector.load %arg15[%c1_150, %c0_151, %c0_152] : memref<4x1x32xf32, #tpu.memory_space<vmem>>, vector<1x1x32xf32>
    %317 = vector.shape_cast %316 : vector<1x1x32xf32> to vector<1x32xf32>
    %cst_153 = arith.constant dense<0.000000e+00> : vector<8xf32>
    %318 = vector.multi_reduction <add>, %313, %cst_153 [1] : vector<8x32xf32> to vector<8xf32>
    %319 = vector.shape_cast %318 : vector<8xf32> to vector<8x1xf32>
    %cst_154 = arith.constant 3.200000e+01 : f32
    %320 = vector.broadcast %cst_154 : f32 to vector<8x1xf32>
    %321 = arith.divf %319, %320 : vector<8x1xf32>
    %322 = vector.broadcast %321 : vector<8x1xf32> to vector<8x32xf32>
    %323 = arith.subf %313, %322 : vector<8x32xf32>
    %324 = arith.mulf %323, %323 : vector<8x32xf32>
    %cst_155 = arith.constant dense<0.000000e+00> : vector<8xf32>
    %325 = vector.multi_reduction <add>, %324, %cst_155 [1] : vector<8x32xf32> to vector<8xf32>
    %326 = vector.shape_cast %325 : vector<8xf32> to vector<8x1xf32>
    %cst_156 = arith.constant 0.0322580636 : f32
    %327 = vector.broadcast %cst_156 : f32 to vector<8x1xf32>
    %328 = arith.mulf %326, %327 : vector<8x1xf32>
    %329 = math.sqrt %328 : vector<8x1xf32>
    %cst_157 = arith.constant 9.99999997E-7 : f32
    %330 = vector.broadcast %cst_157 : f32 to vector<8x1xf32>
    %331 = arith.addf %329, %330 : vector<8x1xf32>
    %332 = tpu.reciprocal %331 {approx = true} : vector<8x1xf32> -> vector<8x1xf32>
    %333 = vector.broadcast %321 : vector<8x1xf32> to vector<8x32xf32>
    %334 = arith.subf %313, %333 : vector<8x32xf32>
    %335 = vector.broadcast %315 : vector<1x32xf32> to vector<8x32xf32>
    %336 = arith.mulf %335, %334 : vector<8x32xf32>
    %337 = vector.broadcast %332 : vector<8x1xf32> to vector<8x32xf32>
    %338 = arith.mulf %336, %337 : vector<8x32xf32>
    %339 = vector.broadcast %317 : vector<1x32xf32> to vector<8x32xf32>
    %340 = arith.addf %338, %339 : vector<8x32xf32>
    %c1_158 = arith.constant 1 : index
    %c0_159 = arith.constant 0 : index
    %c0_160 = arith.constant 0 : index
    %341 = vector.load %arg4[%c1_158, %c0_159, %c0_160] : memref<2x32x96xf32, #tpu.memory_space<vmem>>, vector<1x32x96xf32>
    %342 = vector.shape_cast %341 : vector<1x32x96xf32> to vector<32x96xf32>
    %cst_161 = arith.constant dense<0.000000e+00> : vector<8x96xf32>
    %343 = tpu.matmul %340, %342, %cst_161 {dimension_numbers = #tpu.dot_dimension_numbers<[1], [0], [0], [1], [0, 0, 1, 1], [], []>} : vector<8x32xf32>, vector<32x96xf32>, vector<8x96xf32> -> vector<8x96xf32>
    %c1_162 = arith.constant 1 : index
    %c0_163 = arith.constant 0 : index
    %c0_164 = arith.constant 0 : index
    %344 = vector.load %arg5[%c1_162, %c0_163, %c0_164] : memref<2x1x96xf32, #tpu.memory_space<vmem>>, vector<1x1x96xf32>
    %345 = vector.shape_cast %344 : vector<1x1x96xf32> to vector<1x96xf32>
    %346 = vector.broadcast %345 : vector<1x96xf32> to vector<8x96xf32>
    %347 = arith.addf %343, %346 : vector<8x96xf32>
    %348 = vector.extract_strided_slice %347 {offsets = [0, 0], sizes = [8, 32], strides = [1, 1]} : vector<8x96xf32> to vector<8x32xf32>
    %349 = vector.extract_strided_slice %347 {offsets = [0, 32], sizes = [8, 32], strides = [1, 1]} : vector<8x96xf32> to vector<8x32xf32>
    %350 = vector.extract_strided_slice %347 {offsets = [0, 64], sizes = [8, 32], strides = [1, 1]} : vector<8x96xf32> to vector<8x32xf32>
    %351 = vector.extract_strided_slice %348 {offsets = [0, 0], sizes = [8, 8], strides = [1, 1]} : vector<8x32xf32> to vector<8x8xf32>
    %352 = vector.extract_strided_slice %349 {offsets = [0, 0], sizes = [8, 8], strides = [1, 1]} : vector<8x32xf32> to vector<8x8xf32>
    "tpu.trace_start"() <{level = 10 : i32, message = "kd,nd->kn"}> : () -> ()
    %cst_165 = arith.constant dense<0.000000e+00> : vector<8x8xf32>
    %353 = tpu.matmul %351, %352, %cst_165 {dimension_numbers = #tpu.dot_dimension_numbers<[1], [1], [0], [0], [0, 0, 1, 0], [], []>} : vector<8x8xf32>, vector<8x8xf32>, vector<8x8xf32> -> vector<8x8xf32>
    "tpu.trace_stop"() : () -> ()
    %cst_166 = arith.constant 0.353553385 : f32
    %354 = vector.broadcast %cst_166 : f32 to vector<8x8xf32>
    %355 = arith.mulf %353, %354 : vector<8x8xf32>
    %cst_167 = arith.constant dense<0xFF800000> : vector<8xf32>
    %356 = vector.multi_reduction <maximumf>, %355, %cst_167 [1] : vector<8x8xf32> to vector<8xf32>
    %357 = vector.shape_cast %356 : vector<8xf32> to vector<8x1xf32>
    %358 = vector.broadcast %357 : vector<8x1xf32> to vector<8x8xf32>
    %359 = arith.subf %355, %358 : vector<8x8xf32>
    %360 = math.exp %359 : vector<8x8xf32>
    %cst_168 = arith.constant dense<0.000000e+00> : vector<8xf32>
    %361 = vector.multi_reduction <add>, %360, %cst_168 [1] : vector<8x8xf32> to vector<8xf32>
    %362 = vector.shape_cast %361 : vector<8xf32> to vector<8x1xf32>
    %363 = tpu.reciprocal %362 {approx = true} : vector<8x1xf32> -> vector<8x1xf32>
    %364 = vector.broadcast %363 : vector<8x1xf32> to vector<8x8xf32>
    %365 = arith.mulf %360, %364 : vector<8x8xf32>
    %366 = vector.extract_strided_slice %350 {offsets = [0, 0], sizes = [8, 8], strides = [1, 1]} : vector<8x32xf32> to vector<8x8xf32>
    "tpu.trace_start"() <{level = 10 : i32, message = "kn,nd->kd"}> : () -> ()
    %cst_169 = arith.constant dense<0.000000e+00> : vector<8x8xf32>
    %367 = tpu.matmul %365, %366, %cst_169 {dimension_numbers = #tpu.dot_dimension_numbers<[1], [0], [0], [1], [0, 0, 1, 1], [], []>} : vector<8x8xf32>, vector<8x8xf32>, vector<8x8xf32> -> vector<8x8xf32>
    "tpu.trace_stop"() : () -> ()
    %368 = vector.extract_strided_slice %348 {offsets = [0, 8], sizes = [8, 8], strides = [1, 1]} : vector<8x32xf32> to vector<8x8xf32>
    %369 = vector.extract_strided_slice %349 {offsets = [0, 8], sizes = [8, 8], strides = [1, 1]} : vector<8x32xf32> to vector<8x8xf32>
    "tpu.trace_start"() <{level = 10 : i32, message = "kd,nd->kn"}> : () -> ()
    %cst_170 = arith.constant dense<0.000000e+00> : vector<8x8xf32>
    %370 = tpu.matmul %368, %369, %cst_170 {dimension_numbers = #tpu.dot_dimension_numbers<[1], [1], [0], [0], [0, 0, 1, 0], [], []>} : vector<8x8xf32>, vector<8x8xf32>, vector<8x8xf32> -> vector<8x8xf32>
    "tpu.trace_stop"() : () -> ()
    %cst_171 = arith.constant 0.353553385 : f32
    %371 = vector.broadcast %cst_171 : f32 to vector<8x8xf32>
    %372 = arith.mulf %370, %371 : vector<8x8xf32>
    %cst_172 = arith.constant dense<0xFF800000> : vector<8xf32>
    %373 = vector.multi_reduction <maximumf>, %372, %cst_172 [1] : vector<8x8xf32> to vector<8xf32>
    %374 = vector.shape_cast %373 : vector<8xf32> to vector<8x1xf32>
    %375 = vector.broadcast %374 : vector<8x1xf32> to vector<8x8xf32>
    %376 = arith.subf %372, %375 : vector<8x8xf32>
    %377 = math.exp %376 : vector<8x8xf32>
    %cst_173 = arith.constant dense<0.000000e+00> : vector<8xf32>
    %378 = vector.multi_reduction <add>, %377, %cst_173 [1] : vector<8x8xf32> to vector<8xf32>
    %379 = vector.shape_cast %378 : vector<8xf32> to vector<8x1xf32>
    %380 = tpu.reciprocal %379 {approx = true} : vector<8x1xf32> -> vector<8x1xf32>
    %381 = vector.broadcast %380 : vector<8x1xf32> to vector<8x8xf32>
    %382 = arith.mulf %377, %381 : vector<8x8xf32>
    %383 = vector.extract_strided_slice %350 {offsets = [0, 8], sizes = [8, 8], strides = [1, 1]} : vector<8x32xf32> to vector<8x8xf32>
    "tpu.trace_start"() <{level = 10 : i32, message = "kn,nd->kd"}> : () -> ()
    %cst_174 = arith.constant dense<0.000000e+00> : vector<8x8xf32>
    %384 = tpu.matmul %382, %383, %cst_174 {dimension_numbers = #tpu.dot_dimension_numbers<[1], [0], [0], [1], [0, 0, 1, 1], [], []>} : vector<8x8xf32>, vector<8x8xf32>, vector<8x8xf32> -> vector<8x8xf32>
    "tpu.trace_stop"() : () -> ()
    %385 = vector.extract_strided_slice %348 {offsets = [0, 16], sizes = [8, 8], strides = [1, 1]} : vector<8x32xf32> to vector<8x8xf32>
    %386 = vector.extract_strided_slice %349 {offsets = [0, 16], sizes = [8, 8], strides = [1, 1]} : vector<8x32xf32> to vector<8x8xf32>
    "tpu.trace_start"() <{level = 10 : i32, message = "kd,nd->kn"}> : () -> ()
    %cst_175 = arith.constant dense<0.000000e+00> : vector<8x8xf32>
    %387 = tpu.matmul %385, %386, %cst_175 {dimension_numbers = #tpu.dot_dimension_numbers<[1], [1], [0], [0], [0, 0, 1, 0], [], []>} : vector<8x8xf32>, vector<8x8xf32>, vector<8x8xf32> -> vector<8x8xf32>
    "tpu.trace_stop"() : () -> ()
    %cst_176 = arith.constant 0.353553385 : f32
    %388 = vector.broadcast %cst_176 : f32 to vector<8x8xf32>
    %389 = arith.mulf %387, %388 : vector<8x8xf32>
    %cst_177 = arith.constant dense<0xFF800000> : vector<8xf32>
    %390 = vector.multi_reduction <maximumf>, %389, %cst_177 [1] : vector<8x8xf32> to vector<8xf32>
    %391 = vector.shape_cast %390 : vector<8xf32> to vector<8x1xf32>
    %392 = vector.broadcast %391 : vector<8x1xf32> to vector<8x8xf32>
    %393 = arith.subf %389, %392 : vector<8x8xf32>
    %394 = math.exp %393 : vector<8x8xf32>
    %cst_178 = arith.constant dense<0.000000e+00> : vector<8xf32>
    %395 = vector.multi_reduction <add>, %394, %cst_178 [1] : vector<8x8xf32> to vector<8xf32>
    %396 = vector.shape_cast %395 : vector<8xf32> to vector<8x1xf32>
    %397 = tpu.reciprocal %396 {approx = true} : vector<8x1xf32> -> vector<8x1xf32>
    %398 = vector.broadcast %397 : vector<8x1xf32> to vector<8x8xf32>
    %399 = arith.mulf %394, %398 : vector<8x8xf32>
    %400 = vector.extract_strided_slice %350 {offsets = [0, 16], sizes = [8, 8], strides = [1, 1]} : vector<8x32xf32> to vector<8x8xf32>
    "tpu.trace_start"() <{level = 10 : i32, message = "kn,nd->kd"}> : () -> ()
    %cst_179 = arith.constant dense<0.000000e+00> : vector<8x8xf32>
    %401 = tpu.matmul %399, %400, %cst_179 {dimension_numbers = #tpu.dot_dimension_numbers<[1], [0], [0], [1], [0, 0, 1, 1], [], []>} : vector<8x8xf32>, vector<8x8xf32>, vector<8x8xf32> -> vector<8x8xf32>
    "tpu.trace_stop"() : () -> ()
    %402 = vector.extract_strided_slice %348 {offsets = [0, 24], sizes = [8, 8], strides = [1, 1]} : vector<8x32xf32> to vector<8x8xf32>
    %403 = vector.extract_strided_slice %349 {offsets = [0, 24], sizes = [8, 8], strides = [1, 1]} : vector<8x32xf32> to vector<8x8xf32>
    "tpu.trace_start"() <{level = 10 : i32, message = "kd,nd->kn"}> : () -> ()
    %cst_180 = arith.constant dense<0.000000e+00> : vector<8x8xf32>
    %404 = tpu.matmul %402, %403, %cst_180 {dimension_numbers = #tpu.dot_dimension_numbers<[1], [1], [0], [0], [0, 0, 1, 0], [], []>} : vector<8x8xf32>, vector<8x8xf32>, vector<8x8xf32> -> vector<8x8xf32>
    "tpu.trace_stop"() : () -> ()
    %cst_181 = arith.constant 0.353553385 : f32
    %405 = vector.broadcast %cst_181 : f32 to vector<8x8xf32>
    %406 = arith.mulf %404, %405 : vector<8x8xf32>
    %cst_182 = arith.constant dense<0xFF800000> : vector<8xf32>
    %407 = vector.multi_reduction <maximumf>, %406, %cst_182 [1] : vector<8x8xf32> to vector<8xf32>
    %408 = vector.shape_cast %407 : vector<8xf32> to vector<8x1xf32>
    %409 = vector.broadcast %408 : vector<8x1xf32> to vector<8x8xf32>
    %410 = arith.subf %406, %409 : vector<8x8xf32>
    %411 = math.exp %410 : vector<8x8xf32>
    %cst_183 = arith.constant dense<0.000000e+00> : vector<8xf32>
    %412 = vector.multi_reduction <add>, %411, %cst_183 [1] : vector<8x8xf32> to vector<8xf32>
    %413 = vector.shape_cast %412 : vector<8xf32> to vector<8x1xf32>
    %414 = tpu.reciprocal %413 {approx = true} : vector<8x1xf32> -> vector<8x1xf32>
    %415 = vector.broadcast %414 : vector<8x1xf32> to vector<8x8xf32>
    %416 = arith.mulf %411, %415 : vector<8x8xf32>
    %417 = vector.extract_strided_slice %350 {offsets = [0, 24], sizes = [8, 8], strides = [1, 1]} : vector<8x32xf32> to vector<8x8xf32>
    "tpu.trace_start"() <{level = 10 : i32, message = "kn,nd->kd"}> : () -> ()
    %cst_184 = arith.constant dense<0.000000e+00> : vector<8x8xf32>
    %418 = tpu.matmul %416, %417, %cst_184 {dimension_numbers = #tpu.dot_dimension_numbers<[1], [0], [0], [1], [0, 0, 1, 1], [], []>} : vector<8x8xf32>, vector<8x8xf32>, vector<8x8xf32> -> vector<8x8xf32>
    "tpu.trace_stop"() : () -> ()
    %419 = tpu.concatenate %367, %384, %401, %418 in 1 : vector<8x8xf32>, vector<8x8xf32>, vector<8x8xf32>, vector<8x8xf32> -> vector<8x32xf32>
    %c2 = arith.constant 2 : index
    %c0_185 = arith.constant 0 : index
    %c0_186 = arith.constant 0 : index
    %420 = vector.load %arg10[%c2, %c0_185, %c0_186] : memref<4x32x32xf32, #tpu.memory_space<vmem>>, vector<1x32x32xf32>
    %421 = vector.shape_cast %420 : vector<1x32x32xf32> to vector<32x32xf32>
    %cst_187 = arith.constant dense<0.000000e+00> : vector<8x32xf32>
    %422 = tpu.matmul %419, %421, %cst_187 {dimension_numbers = #tpu.dot_dimension_numbers<[1], [0], [0], [1], [0, 0, 1, 1], [], []>} : vector<8x32xf32>, vector<32x32xf32>, vector<8x32xf32> -> vector<8x32xf32>
    %c2_188 = arith.constant 2 : index
    %c0_189 = arith.constant 0 : index
    %c0_190 = arith.constant 0 : index
    %423 = vector.load %arg11[%c2_188, %c0_189, %c0_190] : memref<4x1x32xf32, #tpu.memory_space<vmem>>, vector<1x1x32xf32>
    %424 = vector.shape_cast %423 : vector<1x1x32xf32> to vector<1x32xf32>
    %425 = vector.broadcast %424 : vector<1x32xf32> to vector<8x32xf32>
    %426 = arith.addf %422, %425 : vector<8x32xf32>
    %427 = arith.addf %426, %340 : vector<8x32xf32>
    %c2_191 = arith.constant 2 : index
    %c0_192 = arith.constant 0 : index
    %c0_193 = arith.constant 0 : index
    %428 = vector.load %arg12[%c2_191, %c0_192, %c0_193] : memref<4x1x32xf32, #tpu.memory_space<vmem>>, vector<1x1x32xf32>
    %429 = vector.shape_cast %428 : vector<1x1x32xf32> to vector<1x32xf32>
    %c2_194 = arith.constant 2 : index
    %c0_195 = arith.constant 0 : index
    %c0_196 = arith.constant 0 : index
    %430 = vector.load %arg13[%c2_194, %c0_195, %c0_196] : memref<4x1x32xf32, #tpu.memory_space<vmem>>, vector<1x1x32xf32>
    %431 = vector.shape_cast %430 : vector<1x1x32xf32> to vector<1x32xf32>
    %cst_197 = arith.constant dense<0.000000e+00> : vector<8xf32>
    %432 = vector.multi_reduction <add>, %427, %cst_197 [1] : vector<8x32xf32> to vector<8xf32>
    %433 = vector.shape_cast %432 : vector<8xf32> to vector<8x1xf32>
    %cst_198 = arith.constant 3.200000e+01 : f32
    %434 = vector.broadcast %cst_198 : f32 to vector<8x1xf32>
    %435 = arith.divf %433, %434 : vector<8x1xf32>
    %436 = vector.broadcast %435 : vector<8x1xf32> to vector<8x32xf32>
    %437 = arith.subf %427, %436 : vector<8x32xf32>
    %438 = arith.mulf %437, %437 : vector<8x32xf32>
    %cst_199 = arith.constant dense<0.000000e+00> : vector<8xf32>
    %439 = vector.multi_reduction <add>, %438, %cst_199 [1] : vector<8x32xf32> to vector<8xf32>
    %440 = vector.shape_cast %439 : vector<8xf32> to vector<8x1xf32>
    %cst_200 = arith.constant 0.0322580636 : f32
    %441 = vector.broadcast %cst_200 : f32 to vector<8x1xf32>
    %442 = arith.mulf %440, %441 : vector<8x1xf32>
    %443 = math.sqrt %442 : vector<8x1xf32>
    %cst_201 = arith.constant 9.99999997E-7 : f32
    %444 = vector.broadcast %cst_201 : f32 to vector<8x1xf32>
    %445 = arith.addf %443, %444 : vector<8x1xf32>
    %446 = tpu.reciprocal %445 {approx = true} : vector<8x1xf32> -> vector<8x1xf32>
    %447 = vector.broadcast %435 : vector<8x1xf32> to vector<8x32xf32>
    %448 = arith.subf %427, %447 : vector<8x32xf32>
    %449 = vector.broadcast %429 : vector<1x32xf32> to vector<8x32xf32>
    %450 = arith.mulf %449, %448 : vector<8x32xf32>
    %451 = vector.broadcast %446 : vector<8x1xf32> to vector<8x32xf32>
    %452 = arith.mulf %450, %451 : vector<8x32xf32>
    %453 = vector.broadcast %431 : vector<1x32xf32> to vector<8x32xf32>
    %454 = arith.addf %452, %453 : vector<8x32xf32>
    %c2_202 = arith.constant 2 : index
    %c0_203 = arith.constant 0 : index
    %c0_204 = arith.constant 0 : index
    %455 = vector.load %arg16[%c2_202, %c0_203, %c0_204] : memref<4x32x64xf32, #tpu.memory_space<vmem>>, vector<1x32x64xf32>
    %456 = vector.shape_cast %455 : vector<1x32x64xf32> to vector<32x64xf32>
    %cst_205 = arith.constant dense<0.000000e+00> : vector<8x64xf32>
    %457 = tpu.matmul %454, %456, %cst_205 {dimension_numbers = #tpu.dot_dimension_numbers<[1], [0], [0], [1], [0, 0, 1, 1], [], []>} : vector<8x32xf32>, vector<32x64xf32>, vector<8x64xf32> -> vector<8x64xf32>
    %c2_206 = arith.constant 2 : index
    %c0_207 = arith.constant 0 : index
    %c0_208 = arith.constant 0 : index
    %458 = vector.load %arg17[%c2_206, %c0_207, %c0_208] : memref<4x1x64xf32, #tpu.memory_space<vmem>>, vector<1x1x64xf32>
    %459 = vector.shape_cast %458 : vector<1x1x64xf32> to vector<1x64xf32>
    %460 = vector.broadcast %459 : vector<1x64xf32> to vector<8x64xf32>
    %461 = arith.addf %457, %460 : vector<8x64xf32>
    %cst_209 = arith.constant 0.000000e+00 : f32
    %462 = vector.broadcast %cst_209 : f32 to vector<8x64xf32>
    %463 = arith.maximumf %461, %462 : vector<8x64xf32>
    %c2_210 = arith.constant 2 : index
    %c0_211 = arith.constant 0 : index
    %c0_212 = arith.constant 0 : index
    %464 = vector.load %arg18[%c2_210, %c0_211, %c0_212] : memref<4x64x32xf32, #tpu.memory_space<vmem>>, vector<1x64x32xf32>
    %465 = vector.shape_cast %464 : vector<1x64x32xf32> to vector<64x32xf32>
    %cst_213 = arith.constant dense<0.000000e+00> : vector<8x32xf32>
    %466 = tpu.matmul %463, %465, %cst_213 {dimension_numbers = #tpu.dot_dimension_numbers<[1], [0], [0], [1], [0, 0, 1, 1], [], []>} : vector<8x64xf32>, vector<64x32xf32>, vector<8x32xf32> -> vector<8x32xf32>
    %c2_214 = arith.constant 2 : index
    %c0_215 = arith.constant 0 : index
    %c0_216 = arith.constant 0 : index
    %467 = vector.load %arg19[%c2_214, %c0_215, %c0_216] : memref<4x1x32xf32, #tpu.memory_space<vmem>>, vector<1x1x32xf32>
    %468 = vector.shape_cast %467 : vector<1x1x32xf32> to vector<1x32xf32>
    %469 = vector.broadcast %468 : vector<1x32xf32> to vector<8x32xf32>
    %470 = arith.addf %466, %469 : vector<8x32xf32>
    %471 = arith.addf %470, %454 : vector<8x32xf32>
    %c2_217 = arith.constant 2 : index
    %c0_218 = arith.constant 0 : index
    %c0_219 = arith.constant 0 : index
    %472 = vector.load %arg14[%c2_217, %c0_218, %c0_219] : memref<4x1x32xf32, #tpu.memory_space<vmem>>, vector<1x1x32xf32>
    %473 = vector.shape_cast %472 : vector<1x1x32xf32> to vector<1x32xf32>
    %c2_220 = arith.constant 2 : index
    %c0_221 = arith.constant 0 : index
    %c0_222 = arith.constant 0 : index
    %474 = vector.load %arg15[%c2_220, %c0_221, %c0_222] : memref<4x1x32xf32, #tpu.memory_space<vmem>>, vector<1x1x32xf32>
    %475 = vector.shape_cast %474 : vector<1x1x32xf32> to vector<1x32xf32>
    %cst_223 = arith.constant dense<0.000000e+00> : vector<8xf32>
    %476 = vector.multi_reduction <add>, %471, %cst_223 [1] : vector<8x32xf32> to vector<8xf32>
    %477 = vector.shape_cast %476 : vector<8xf32> to vector<8x1xf32>
    %cst_224 = arith.constant 3.200000e+01 : f32
    %478 = vector.broadcast %cst_224 : f32 to vector<8x1xf32>
    %479 = arith.divf %477, %478 : vector<8x1xf32>
    %480 = vector.broadcast %479 : vector<8x1xf32> to vector<8x32xf32>
    %481 = arith.subf %471, %480 : vector<8x32xf32>
    %482 = arith.mulf %481, %481 : vector<8x32xf32>
    %cst_225 = arith.constant dense<0.000000e+00> : vector<8xf32>
    %483 = vector.multi_reduction <add>, %482, %cst_225 [1] : vector<8x32xf32> to vector<8xf32>
    %484 = vector.shape_cast %483 : vector<8xf32> to vector<8x1xf32>
    %cst_226 = arith.constant 0.0322580636 : f32
    %485 = vector.broadcast %cst_226 : f32 to vector<8x1xf32>
    %486 = arith.mulf %484, %485 : vector<8x1xf32>
    %487 = math.sqrt %486 : vector<8x1xf32>
    %cst_227 = arith.constant 9.99999997E-7 : f32
    %488 = vector.broadcast %cst_227 : f32 to vector<8x1xf32>
    %489 = arith.addf %487, %488 : vector<8x1xf32>
    %490 = tpu.reciprocal %489 {approx = true} : vector<8x1xf32> -> vector<8x1xf32>
    %491 = vector.broadcast %479 : vector<8x1xf32> to vector<8x32xf32>
    %492 = arith.subf %471, %491 : vector<8x32xf32>
    %493 = vector.broadcast %473 : vector<1x32xf32> to vector<8x32xf32>
    %494 = arith.mulf %493, %492 : vector<8x32xf32>
    %495 = vector.broadcast %490 : vector<8x1xf32> to vector<8x32xf32>
    %496 = arith.mulf %494, %495 : vector<8x32xf32>
    %497 = vector.broadcast %475 : vector<1x32xf32> to vector<8x32xf32>
    %498 = arith.addf %496, %497 : vector<8x32xf32>
    %c1_228 = arith.constant 1 : index
    %c0_229 = arith.constant 0 : index
    %c0_230 = arith.constant 0 : index
    %499 = vector.load %arg6[%c1_228, %c0_229, %c0_230] : memref<2x32x32xf32, #tpu.memory_space<vmem>>, vector<1x32x32xf32>
    %500 = vector.shape_cast %499 : vector<1x32x32xf32> to vector<32x32xf32>
    %cst_231 = arith.constant dense<0.000000e+00> : vector<8x32xf32>
    %501 = tpu.matmul %498, %500, %cst_231 {dimension_numbers = #tpu.dot_dimension_numbers<[1], [0], [0], [1], [0, 0, 1, 1], [], []>} : vector<8x32xf32>, vector<32x32xf32>, vector<8x32xf32> -> vector<8x32xf32>
    %c1_232 = arith.constant 1 : index
    %c0_233 = arith.constant 0 : index
    %c0_234 = arith.constant 0 : index
    %502 = vector.load %arg7[%c1_232, %c0_233, %c0_234] : memref<2x1x32xf32, #tpu.memory_space<vmem>>, vector<1x1x32xf32>
    %503 = vector.shape_cast %502 : vector<1x1x32xf32> to vector<1x32xf32>
    %504 = vector.broadcast %503 : vector<1x32xf32> to vector<8x32xf32>
    %505 = arith.addf %501, %504 : vector<8x32xf32>
    %c1_235 = arith.constant 1 : index
    %c0_236 = arith.constant 0 : index
    %c0_237 = arith.constant 0 : index
    %506 = vector.load %arg8[%c1_235, %c0_236, %c0_237] : memref<2x32x64xf32, #tpu.memory_space<vmem>>, vector<1x32x64xf32>
    %507 = vector.shape_cast %506 : vector<1x32x64xf32> to vector<32x64xf32>
    %cst_238 = arith.constant dense<0.000000e+00> : vector<8x64xf32>
    %508 = tpu.matmul %3, %507, %cst_238 {dimension_numbers = #tpu.dot_dimension_numbers<[1], [0], [0], [1], [0, 0, 1, 1], [], []>} : vector<8x32xf32>, vector<32x64xf32>, vector<8x64xf32> -> vector<8x64xf32>
    %c1_239 = arith.constant 1 : index
    %c0_240 = arith.constant 0 : index
    %c0_241 = arith.constant 0 : index
    %509 = vector.load %arg9[%c1_239, %c0_240, %c0_241] : memref<2x1x64xf32, #tpu.memory_space<vmem>>, vector<1x1x64xf32>
    %510 = vector.shape_cast %509 : vector<1x1x64xf32> to vector<1x64xf32>
    %511 = vector.broadcast %510 : vector<1x64xf32> to vector<8x64xf32>
    %512 = arith.addf %508, %511 : vector<8x64xf32>
    %513 = vector.extract_strided_slice %512 {offsets = [0, 0], sizes = [8, 32], strides = [1, 1]} : vector<8x64xf32> to vector<8x32xf32>
    %514 = vector.extract_strided_slice %512 {offsets = [0, 32], sizes = [8, 32], strides = [1, 1]} : vector<8x64xf32> to vector<8x32xf32>
    %515 = vector.extract_strided_slice %505 {offsets = [0, 0], sizes = [8, 8], strides = [1, 1]} : vector<8x32xf32> to vector<8x8xf32>
    %516 = vector.extract_strided_slice %513 {offsets = [0, 0], sizes = [8, 8], strides = [1, 1]} : vector<8x32xf32> to vector<8x8xf32>
    "tpu.trace_start"() <{level = 10 : i32, message = "kd,nd->kn"}> : () -> ()
    %cst_242 = arith.constant dense<0.000000e+00> : vector<8x8xf32>
    %517 = tpu.matmul %515, %516, %cst_242 {dimension_numbers = #tpu.dot_dimension_numbers<[1], [1], [0], [0], [0, 0, 1, 0], [], []>} : vector<8x8xf32>, vector<8x8xf32>, vector<8x8xf32> -> vector<8x8xf32>
    "tpu.trace_stop"() : () -> ()
    %cst_243 = arith.constant 0.353553385 : f32
    %518 = vector.broadcast %cst_243 : f32 to vector<8x8xf32>
    %519 = arith.mulf %517, %518 : vector<8x8xf32>
    %520 = vector.broadcast %10 : vector<1x8xf32> to vector<8x8xf32>
    %521 = arith.addf %519, %520 : vector<8x8xf32>
    %cst_244 = arith.constant dense<0xFF800000> : vector<8xf32>
    %522 = vector.multi_reduction <maximumf>, %521, %cst_244 [1] : vector<8x8xf32> to vector<8xf32>
    %523 = vector.shape_cast %522 : vector<8xf32> to vector<8x1xf32>
    %524 = vector.broadcast %523 : vector<8x1xf32> to vector<8x8xf32>
    %525 = arith.subf %521, %524 : vector<8x8xf32>
    %526 = math.exp %525 : vector<8x8xf32>
    %cst_245 = arith.constant dense<0.000000e+00> : vector<8xf32>
    %527 = vector.multi_reduction <add>, %526, %cst_245 [1] : vector<8x8xf32> to vector<8xf32>
    %528 = vector.shape_cast %527 : vector<8xf32> to vector<8x1xf32>
    %529 = tpu.reciprocal %528 {approx = true} : vector<8x1xf32> -> vector<8x1xf32>
    %530 = vector.broadcast %529 : vector<8x1xf32> to vector<8x8xf32>
    %531 = arith.mulf %526, %530 : vector<8x8xf32>
    %532 = vector.extract_strided_slice %514 {offsets = [0, 0], sizes = [8, 8], strides = [1, 1]} : vector<8x32xf32> to vector<8x8xf32>
    "tpu.trace_start"() <{level = 10 : i32, message = "kn,nd->kd"}> : () -> ()
    %cst_246 = arith.constant dense<0.000000e+00> : vector<8x8xf32>
    %533 = tpu.matmul %531, %532, %cst_246 {dimension_numbers = #tpu.dot_dimension_numbers<[1], [0], [0], [1], [0, 0, 1, 1], [], []>} : vector<8x8xf32>, vector<8x8xf32>, vector<8x8xf32> -> vector<8x8xf32>
    "tpu.trace_stop"() : () -> ()
    %534 = vector.extract_strided_slice %505 {offsets = [0, 8], sizes = [8, 8], strides = [1, 1]} : vector<8x32xf32> to vector<8x8xf32>
    %535 = vector.extract_strided_slice %513 {offsets = [0, 8], sizes = [8, 8], strides = [1, 1]} : vector<8x32xf32> to vector<8x8xf32>
    "tpu.trace_start"() <{level = 10 : i32, message = "kd,nd->kn"}> : () -> ()
    %cst_247 = arith.constant dense<0.000000e+00> : vector<8x8xf32>
    %536 = tpu.matmul %534, %535, %cst_247 {dimension_numbers = #tpu.dot_dimension_numbers<[1], [1], [0], [0], [0, 0, 1, 0], [], []>} : vector<8x8xf32>, vector<8x8xf32>, vector<8x8xf32> -> vector<8x8xf32>
    "tpu.trace_stop"() : () -> ()
    %cst_248 = arith.constant 0.353553385 : f32
    %537 = vector.broadcast %cst_248 : f32 to vector<8x8xf32>
    %538 = arith.mulf %536, %537 : vector<8x8xf32>
    %539 = vector.broadcast %10 : vector<1x8xf32> to vector<8x8xf32>
    %540 = arith.addf %538, %539 : vector<8x8xf32>
    %cst_249 = arith.constant dense<0xFF800000> : vector<8xf32>
    %541 = vector.multi_reduction <maximumf>, %540, %cst_249 [1] : vector<8x8xf32> to vector<8xf32>
    %542 = vector.shape_cast %541 : vector<8xf32> to vector<8x1xf32>
    %543 = vector.broadcast %542 : vector<8x1xf32> to vector<8x8xf32>
    %544 = arith.subf %540, %543 : vector<8x8xf32>
    %545 = math.exp %544 : vector<8x8xf32>
    %cst_250 = arith.constant dense<0.000000e+00> : vector<8xf32>
    %546 = vector.multi_reduction <add>, %545, %cst_250 [1] : vector<8x8xf32> to vector<8xf32>
    %547 = vector.shape_cast %546 : vector<8xf32> to vector<8x1xf32>
    %548 = tpu.reciprocal %547 {approx = true} : vector<8x1xf32> -> vector<8x1xf32>
    %549 = vector.broadcast %548 : vector<8x1xf32> to vector<8x8xf32>
    %550 = arith.mulf %545, %549 : vector<8x8xf32>
    %551 = vector.extract_strided_slice %514 {offsets = [0, 8], sizes = [8, 8], strides = [1, 1]} : vector<8x32xf32> to vector<8x8xf32>
    "tpu.trace_start"() <{level = 10 : i32, message = "kn,nd->kd"}> : () -> ()
    %cst_251 = arith.constant dense<0.000000e+00> : vector<8x8xf32>
    %552 = tpu.matmul %550, %551, %cst_251 {dimension_numbers = #tpu.dot_dimension_numbers<[1], [0], [0], [1], [0, 0, 1, 1], [], []>} : vector<8x8xf32>, vector<8x8xf32>, vector<8x8xf32> -> vector<8x8xf32>
    "tpu.trace_stop"() : () -> ()
    %553 = vector.extract_strided_slice %505 {offsets = [0, 16], sizes = [8, 8], strides = [1, 1]} : vector<8x32xf32> to vector<8x8xf32>
    %554 = vector.extract_strided_slice %513 {offsets = [0, 16], sizes = [8, 8], strides = [1, 1]} : vector<8x32xf32> to vector<8x8xf32>
    "tpu.trace_start"() <{level = 10 : i32, message = "kd,nd->kn"}> : () -> ()
    %cst_252 = arith.constant dense<0.000000e+00> : vector<8x8xf32>
    %555 = tpu.matmul %553, %554, %cst_252 {dimension_numbers = #tpu.dot_dimension_numbers<[1], [1], [0], [0], [0, 0, 1, 0], [], []>} : vector<8x8xf32>, vector<8x8xf32>, vector<8x8xf32> -> vector<8x8xf32>
    "tpu.trace_stop"() : () -> ()
    %cst_253 = arith.constant 0.353553385 : f32
    %556 = vector.broadcast %cst_253 : f32 to vector<8x8xf32>
    %557 = arith.mulf %555, %556 : vector<8x8xf32>
    %558 = vector.broadcast %10 : vector<1x8xf32> to vector<8x8xf32>
    %559 = arith.addf %557, %558 : vector<8x8xf32>
    %cst_254 = arith.constant dense<0xFF800000> : vector<8xf32>
    %560 = vector.multi_reduction <maximumf>, %559, %cst_254 [1] : vector<8x8xf32> to vector<8xf32>
    %561 = vector.shape_cast %560 : vector<8xf32> to vector<8x1xf32>
    %562 = vector.broadcast %561 : vector<8x1xf32> to vector<8x8xf32>
    %563 = arith.subf %559, %562 : vector<8x8xf32>
    %564 = math.exp %563 : vector<8x8xf32>
    %cst_255 = arith.constant dense<0.000000e+00> : vector<8xf32>
    %565 = vector.multi_reduction <add>, %564, %cst_255 [1] : vector<8x8xf32> to vector<8xf32>
    %566 = vector.shape_cast %565 : vector<8xf32> to vector<8x1xf32>
    %567 = tpu.reciprocal %566 {approx = true} : vector<8x1xf32> -> vector<8x1xf32>
    %568 = vector.broadcast %567 : vector<8x1xf32> to vector<8x8xf32>
    %569 = arith.mulf %564, %568 : vector<8x8xf32>
    %570 = vector.extract_strided_slice %514 {offsets = [0, 16], sizes = [8, 8], strides = [1, 1]} : vector<8x32xf32> to vector<8x8xf32>
    "tpu.trace_start"() <{level = 10 : i32, message = "kn,nd->kd"}> : () -> ()
    %cst_256 = arith.constant dense<0.000000e+00> : vector<8x8xf32>
    %571 = tpu.matmul %569, %570, %cst_256 {dimension_numbers = #tpu.dot_dimension_numbers<[1], [0], [0], [1], [0, 0, 1, 1], [], []>} : vector<8x8xf32>, vector<8x8xf32>, vector<8x8xf32> -> vector<8x8xf32>
    "tpu.trace_stop"() : () -> ()
    %572 = vector.extract_strided_slice %505 {offsets = [0, 24], sizes = [8, 8], strides = [1, 1]} : vector<8x32xf32> to vector<8x8xf32>
    %573 = vector.extract_strided_slice %513 {offsets = [0, 24], sizes = [8, 8], strides = [1, 1]} : vector<8x32xf32> to vector<8x8xf32>
    "tpu.trace_start"() <{level = 10 : i32, message = "kd,nd->kn"}> : () -> ()
    %cst_257 = arith.constant dense<0.000000e+00> : vector<8x8xf32>
    %574 = tpu.matmul %572, %573, %cst_257 {dimension_numbers = #tpu.dot_dimension_numbers<[1], [1], [0], [0], [0, 0, 1, 0], [], []>} : vector<8x8xf32>, vector<8x8xf32>, vector<8x8xf32> -> vector<8x8xf32>
    "tpu.trace_stop"() : () -> ()
    %cst_258 = arith.constant 0.353553385 : f32
    %575 = vector.broadcast %cst_258 : f32 to vector<8x8xf32>
    %576 = arith.mulf %574, %575 : vector<8x8xf32>
    %577 = vector.broadcast %10 : vector<1x8xf32> to vector<8x8xf32>
    %578 = arith.addf %576, %577 : vector<8x8xf32>
    %cst_259 = arith.constant dense<0xFF800000> : vector<8xf32>
    %579 = vector.multi_reduction <maximumf>, %578, %cst_259 [1] : vector<8x8xf32> to vector<8xf32>
    %580 = vector.shape_cast %579 : vector<8xf32> to vector<8x1xf32>
    %581 = vector.broadcast %580 : vector<8x1xf32> to vector<8x8xf32>
    %582 = arith.subf %578, %581 : vector<8x8xf32>
    %583 = math.exp %582 : vector<8x8xf32>
    %cst_260 = arith.constant dense<0.000000e+00> : vector<8xf32>
    %584 = vector.multi_reduction <add>, %583, %cst_260 [1] : vector<8x8xf32> to vector<8xf32>
    %585 = vector.shape_cast %584 : vector<8xf32> to vector<8x1xf32>
    %586 = tpu.reciprocal %585 {approx = true} : vector<8x1xf32> -> vector<8x1xf32>
    %587 = vector.broadcast %586 : vector<8x1xf32> to vector<8x8xf32>
    %588 = arith.mulf %583, %587 : vector<8x8xf32>
    %589 = vector.extract_strided_slice %514 {offsets = [0, 24], sizes = [8, 8], strides = [1, 1]} : vector<8x32xf32> to vector<8x8xf32>
    "tpu.trace_start"() <{level = 10 : i32, message = "kn,nd->kd"}> : () -> ()
    %cst_261 = arith.constant dense<0.000000e+00> : vector<8x8xf32>
    %590 = tpu.matmul %588, %589, %cst_261 {dimension_numbers = #tpu.dot_dimension_numbers<[1], [0], [0], [1], [0, 0, 1, 1], [], []>} : vector<8x8xf32>, vector<8x8xf32>, vector<8x8xf32> -> vector<8x8xf32>
    "tpu.trace_stop"() : () -> ()
    %591 = tpu.concatenate %533, %552, %571, %590 in 1 : vector<8x8xf32>, vector<8x8xf32>, vector<8x8xf32>, vector<8x8xf32> -> vector<8x32xf32>
    %c3 = arith.constant 3 : index
    %c0_262 = arith.constant 0 : index
    %c0_263 = arith.constant 0 : index
    %592 = vector.load %arg10[%c3, %c0_262, %c0_263] : memref<4x32x32xf32, #tpu.memory_space<vmem>>, vector<1x32x32xf32>
    %593 = vector.shape_cast %592 : vector<1x32x32xf32> to vector<32x32xf32>
    %cst_264 = arith.constant dense<0.000000e+00> : vector<8x32xf32>
    %594 = tpu.matmul %591, %593, %cst_264 {dimension_numbers = #tpu.dot_dimension_numbers<[1], [0], [0], [1], [0, 0, 1, 1], [], []>} : vector<8x32xf32>, vector<32x32xf32>, vector<8x32xf32> -> vector<8x32xf32>
    %c3_265 = arith.constant 3 : index
    %c0_266 = arith.constant 0 : index
    %c0_267 = arith.constant 0 : index
    %595 = vector.load %arg11[%c3_265, %c0_266, %c0_267] : memref<4x1x32xf32, #tpu.memory_space<vmem>>, vector<1x1x32xf32>
    %596 = vector.shape_cast %595 : vector<1x1x32xf32> to vector<1x32xf32>
    %597 = vector.broadcast %596 : vector<1x32xf32> to vector<8x32xf32>
    %598 = arith.addf %594, %597 : vector<8x32xf32>
    %599 = arith.addf %598, %498 : vector<8x32xf32>
    %c3_268 = arith.constant 3 : index
    %c0_269 = arith.constant 0 : index
    %c0_270 = arith.constant 0 : index
    %600 = vector.load %arg12[%c3_268, %c0_269, %c0_270] : memref<4x1x32xf32, #tpu.memory_space<vmem>>, vector<1x1x32xf32>
    %601 = vector.shape_cast %600 : vector<1x1x32xf32> to vector<1x32xf32>
    %c3_271 = arith.constant 3 : index
    %c0_272 = arith.constant 0 : index
    %c0_273 = arith.constant 0 : index
    %602 = vector.load %arg13[%c3_271, %c0_272, %c0_273] : memref<4x1x32xf32, #tpu.memory_space<vmem>>, vector<1x1x32xf32>
    %603 = vector.shape_cast %602 : vector<1x1x32xf32> to vector<1x32xf32>
    %cst_274 = arith.constant dense<0.000000e+00> : vector<8xf32>
    %604 = vector.multi_reduction <add>, %599, %cst_274 [1] : vector<8x32xf32> to vector<8xf32>
    %605 = vector.shape_cast %604 : vector<8xf32> to vector<8x1xf32>
    %cst_275 = arith.constant 3.200000e+01 : f32
    %606 = vector.broadcast %cst_275 : f32 to vector<8x1xf32>
    %607 = arith.divf %605, %606 : vector<8x1xf32>
    %608 = vector.broadcast %607 : vector<8x1xf32> to vector<8x32xf32>
    %609 = arith.subf %599, %608 : vector<8x32xf32>
    %610 = arith.mulf %609, %609 : vector<8x32xf32>
    %cst_276 = arith.constant dense<0.000000e+00> : vector<8xf32>
    %611 = vector.multi_reduction <add>, %610, %cst_276 [1] : vector<8x32xf32> to vector<8xf32>
    %612 = vector.shape_cast %611 : vector<8xf32> to vector<8x1xf32>
    %cst_277 = arith.constant 0.0322580636 : f32
    %613 = vector.broadcast %cst_277 : f32 to vector<8x1xf32>
    %614 = arith.mulf %612, %613 : vector<8x1xf32>
    %615 = math.sqrt %614 : vector<8x1xf32>
    %cst_278 = arith.constant 9.99999997E-7 : f32
    %616 = vector.broadcast %cst_278 : f32 to vector<8x1xf32>
    %617 = arith.addf %615, %616 : vector<8x1xf32>
    %618 = tpu.reciprocal %617 {approx = true} : vector<8x1xf32> -> vector<8x1xf32>
    %619 = vector.broadcast %607 : vector<8x1xf32> to vector<8x32xf32>
    %620 = arith.subf %599, %619 : vector<8x32xf32>
    %621 = vector.broadcast %601 : vector<1x32xf32> to vector<8x32xf32>
    %622 = arith.mulf %621, %620 : vector<8x32xf32>
    %623 = vector.broadcast %618 : vector<8x1xf32> to vector<8x32xf32>
    %624 = arith.mulf %622, %623 : vector<8x32xf32>
    %625 = vector.broadcast %603 : vector<1x32xf32> to vector<8x32xf32>
    %626 = arith.addf %624, %625 : vector<8x32xf32>
    %c3_279 = arith.constant 3 : index
    %c0_280 = arith.constant 0 : index
    %c0_281 = arith.constant 0 : index
    %627 = vector.load %arg16[%c3_279, %c0_280, %c0_281] : memref<4x32x64xf32, #tpu.memory_space<vmem>>, vector<1x32x64xf32>
    %628 = vector.shape_cast %627 : vector<1x32x64xf32> to vector<32x64xf32>
    %cst_282 = arith.constant dense<0.000000e+00> : vector<8x64xf32>
    %629 = tpu.matmul %626, %628, %cst_282 {dimension_numbers = #tpu.dot_dimension_numbers<[1], [0], [0], [1], [0, 0, 1, 1], [], []>} : vector<8x32xf32>, vector<32x64xf32>, vector<8x64xf32> -> vector<8x64xf32>
    %c3_283 = arith.constant 3 : index
    %c0_284 = arith.constant 0 : index
    %c0_285 = arith.constant 0 : index
    %630 = vector.load %arg17[%c3_283, %c0_284, %c0_285] : memref<4x1x64xf32, #tpu.memory_space<vmem>>, vector<1x1x64xf32>
    %631 = vector.shape_cast %630 : vector<1x1x64xf32> to vector<1x64xf32>
    %632 = vector.broadcast %631 : vector<1x64xf32> to vector<8x64xf32>
    %633 = arith.addf %629, %632 : vector<8x64xf32>
    %cst_286 = arith.constant 0.000000e+00 : f32
    %634 = vector.broadcast %cst_286 : f32 to vector<8x64xf32>
    %635 = arith.maximumf %633, %634 : vector<8x64xf32>
    %c3_287 = arith.constant 3 : index
    %c0_288 = arith.constant 0 : index
    %c0_289 = arith.constant 0 : index
    %636 = vector.load %arg18[%c3_287, %c0_288, %c0_289] : memref<4x64x32xf32, #tpu.memory_space<vmem>>, vector<1x64x32xf32>
    %637 = vector.shape_cast %636 : vector<1x64x32xf32> to vector<64x32xf32>
    %cst_290 = arith.constant dense<0.000000e+00> : vector<8x32xf32>
    %638 = tpu.matmul %635, %637, %cst_290 {dimension_numbers = #tpu.dot_dimension_numbers<[1], [0], [0], [1], [0, 0, 1, 1], [], []>} : vector<8x64xf32>, vector<64x32xf32>, vector<8x32xf32> -> vector<8x32xf32>
    %c3_291 = arith.constant 3 : index
    %c0_292 = arith.constant 0 : index
    %c0_293 = arith.constant 0 : index
    %639 = vector.load %arg19[%c3_291, %c0_292, %c0_293] : memref<4x1x32xf32, #tpu.memory_space<vmem>>, vector<1x1x32xf32>
    %640 = vector.shape_cast %639 : vector<1x1x32xf32> to vector<1x32xf32>
    %641 = vector.broadcast %640 : vector<1x32xf32> to vector<8x32xf32>
    %642 = arith.addf %638, %641 : vector<8x32xf32>
    %643 = arith.addf %642, %626 : vector<8x32xf32>
    %c3_294 = arith.constant 3 : index
    %c0_295 = arith.constant 0 : index
    %c0_296 = arith.constant 0 : index
    %644 = vector.load %arg14[%c3_294, %c0_295, %c0_296] : memref<4x1x32xf32, #tpu.memory_space<vmem>>, vector<1x1x32xf32>
    %645 = vector.shape_cast %644 : vector<1x1x32xf32> to vector<1x32xf32>
    %c3_297 = arith.constant 3 : index
    %c0_298 = arith.constant 0 : index
    %c0_299 = arith.constant 0 : index
    %646 = vector.load %arg15[%c3_297, %c0_298, %c0_299] : memref<4x1x32xf32, #tpu.memory_space<vmem>>, vector<1x1x32xf32>
    %647 = vector.shape_cast %646 : vector<1x1x32xf32> to vector<1x32xf32>
    %cst_300 = arith.constant dense<0.000000e+00> : vector<8xf32>
    %648 = vector.multi_reduction <add>, %643, %cst_300 [1] : vector<8x32xf32> to vector<8xf32>
    %649 = vector.shape_cast %648 : vector<8xf32> to vector<8x1xf32>
    %cst_301 = arith.constant 3.200000e+01 : f32
    %650 = vector.broadcast %cst_301 : f32 to vector<8x1xf32>
    %651 = arith.divf %649, %650 : vector<8x1xf32>
    %652 = vector.broadcast %651 : vector<8x1xf32> to vector<8x32xf32>
    %653 = arith.subf %643, %652 : vector<8x32xf32>
    %654 = arith.mulf %653, %653 : vector<8x32xf32>
    %cst_302 = arith.constant dense<0.000000e+00> : vector<8xf32>
    %655 = vector.multi_reduction <add>, %654, %cst_302 [1] : vector<8x32xf32> to vector<8xf32>
    %656 = vector.shape_cast %655 : vector<8xf32> to vector<8x1xf32>
    %cst_303 = arith.constant 0.0322580636 : f32
    %657 = vector.broadcast %cst_303 : f32 to vector<8x1xf32>
    %658 = arith.mulf %656, %657 : vector<8x1xf32>
    %659 = math.sqrt %658 : vector<8x1xf32>
    %cst_304 = arith.constant 9.99999997E-7 : f32
    %660 = vector.broadcast %cst_304 : f32 to vector<8x1xf32>
    %661 = arith.addf %659, %660 : vector<8x1xf32>
    %662 = tpu.reciprocal %661 {approx = true} : vector<8x1xf32> -> vector<8x1xf32>
    %663 = vector.broadcast %651 : vector<8x1xf32> to vector<8x32xf32>
    %664 = arith.subf %643, %663 : vector<8x32xf32>
    %665 = vector.broadcast %645 : vector<1x32xf32> to vector<8x32xf32>
    %666 = arith.mulf %665, %664 : vector<8x32xf32>
    %667 = vector.broadcast %662 : vector<8x1xf32> to vector<8x32xf32>
    %668 = arith.mulf %666, %667 : vector<8x32xf32>
    %669 = vector.broadcast %647 : vector<1x32xf32> to vector<8x32xf32>
    %670 = arith.addf %668, %669 : vector<8x32xf32>
    %c0_305 = arith.constant 0 : index
    %c0_306 = arith.constant 0 : index
    %671 = vector.load %arg20[%c0_305, %c0_306] : memref<32x25xf32, #tpu.memory_space<vmem>>, vector<32x25xf32>
    %cst_307 = arith.constant dense<0.000000e+00> : vector<8x25xf32>
    %672 = tpu.matmul %670, %671, %cst_307 {dimension_numbers = #tpu.dot_dimension_numbers<[1], [0], [0], [1], [0, 0, 1, 1], [], []>} : vector<8x32xf32>, vector<32x25xf32>, vector<8x25xf32> -> vector<8x25xf32>
    %c0_308 = arith.constant 0 : index
    %c0_309 = arith.constant 0 : index
    %673 = vector.load %arg21[%c0_308, %c0_309] : memref<1x25xf32, #tpu.memory_space<vmem>>, vector<1x25xf32>
    %674 = vector.broadcast %673 : vector<1x25xf32> to vector<8x25xf32>
    %675 = arith.addf %672, %674 : vector<8x25xf32>
    %c0_310 = arith.constant 0 : index
    %c0_311 = arith.constant 0 : index
    %c0_312 = arith.constant 0 : index
    %676 = vector.load %arg22[%c0_310, %c0_311, %c0_312] : memref<1x8x25xf32, #tpu.memory_space<vmem>>, vector<1x8x25xf32>
    %677 = vector.shape_cast %676 : vector<1x8x25xf32> to vector<8x25xf32>
    %678 = vector.shape_cast %675 : vector<8x25xf32> to vector<1x8x25xf32>
    tpu.vector_store %arg22[%c0_310, %c0_311, %c0_312], %678 {strides = array<i32>} : memref<1x8x25xf32, #tpu.memory_space<vmem>>, vector<1x8x25xf32>,
    return
  }
  func.func @transform_0(%arg0: i32) -> (i32, i32, i32) {
    %c0_i32 = arith.constant 0 : i32
    %c0_i32_0 = arith.constant 0 : i32
    %c0_i32_1 = arith.constant 0 : i32
    return %arg0, %c0_i32, %c0_i32_0 : i32, i32, i32
  }
  func.func @transform_1(%arg0: i32) -> (i32, i32, i32) {
    %c0_i32 = arith.constant 0 : i32
    %c0_i32_0 = arith.constant 0 : i32
    %c0_i32_1 = arith.constant 0 : i32
    return %arg0, %c0_i32, %c0_i32_0 : i32, i32, i32
  }
  func.func @transform_2(%arg0: i32) -> (i32, i32, i32) {
    %c0_i32 = arith.constant 0 : i32
    %c0_i32_0 = arith.constant 0 : i32
    %c0_i32_1 = arith.constant 0 : i32
    return %arg0, %c0_i32, %c0_i32_0 : i32, i32, i32
  }
  func.func @transform_3(%arg0: i32) -> (i32, i32, i32) {
    %c0_i32 = arith.constant 0 : i32
    %c0_i32_0 = arith.constant 0 : i32
    %c0_i32_1 = arith.constant 0 : i32
    %c0_i32_2 = arith.constant 0 : i32
    return %c0_i32, %c0_i32_0, %c0_i32_1 : i32, i32, i32
  }
  func.func @transform_4(%arg0: i32) -> (i32, i32, i32) {
    %c0_i32 = arith.constant 0 : i32
    %c0_i32_0 = arith.constant 0 : i32
    %c0_i32_1 = arith.constant 0 : i32
    %c0_i32_2 = arith.constant 0 : i32
    return %c0_i32, %c0_i32_0, %c0_i32_1 : i32, i32, i32
  }
  func.func @transform_5(%arg0: i32) -> (i32, i32, i32) {
    %c0_i32 = arith.constant 0 : i32
    %c0_i32_0 = arith.constant 0 : i32
    %c0_i32_1 = arith.constant 0 : i32
    %c0_i32_2 = arith.constant 0 : i32
    return %c0_i32, %c0_i32_0, %c0_i32_1 : i32, i32, i32
  }
  func.func @transform_6(%arg0: i32) -> (i32, i32, i32) {
    %c0_i32 = arith.constant 0 : i32
    %c0_i32_0 = arith.constant 0 : i32
    %c0_i32_1 = arith.constant 0 : i32
    %c0_i32_2 = arith.constant 0 : i32
    return %c0_i32, %c0_i32_0, %c0_i32_1 : i32, i32, i32
  }
  func.func @transform_7(%arg0: i32) -> (i32, i32, i32) {
    %c0_i32 = arith.constant 0 : i32
    %c0_i32_0 = arith.constant 0 : i32
    %c0_i32_1 = arith.constant 0 : i32
    %c0_i32_2 = arith.constant 0 : i32
    return %c0_i32, %c0_i32_0, %c0_i32_1 : i32, i32, i32
  }
  func.func @transform_8(%arg0: i32) -> (i32, i32, i32) {
    %c0_i32 = arith.constant 0 : i32
    %c0_i32_0 = arith.constant 0 : i32
    %c0_i32_1 = arith.constant 0 : i32
    %c0_i32_2 = arith.constant 0 : i32
    return %c0_i32, %c0_i32_0, %c0_i32_1 : i32, i32, i32
  }
  func.func @transform_9(%arg0: i32) -> (i32, i32, i32) {
    %c0_i32 = arith.constant 0 : i32
    %c0_i32_0 = arith.constant 0 : i32
    %c0_i32_1 = arith.constant 0 : i32
    %c0_i32_2 = arith.constant 0 : i32
    return %c0_i32, %c0_i32_0, %c0_i32_1 : i32, i32, i32
  }
  func.func @transform_10(%arg0: i32) -> (i32, i32, i32) {
    %c0_i32 = arith.constant 0 : i32
    %c0_i32_0 = arith.constant 0 : i32
    %c0_i32_1 = arith.constant 0 : i32
    %c0_i32_2 = arith.constant 0 : i32
    return %c0_i32, %c0_i32_0, %c0_i32_1 : i32, i32, i32
  }
  func.func @transform_11(%arg0: i32) -> (i32, i32, i32) {
    %c0_i32 = arith.constant 0 : i32
    %c0_i32_0 = arith.constant 0 : i32
    %c0_i32_1 = arith.constant 0 : i32
    %c0_i32_2 = arith.constant 0 : i32
    return %c0_i32, %c0_i32_0, %c0_i32_1 : i32, i32, i32
  }
  func.func @transform_12(%arg0: i32) -> (i32, i32, i32) {
    %c0_i32 = arith.constant 0 : i32
    %c0_i32_0 = arith.constant 0 : i32
    %c0_i32_1 = arith.constant 0 : i32
    %c0_i32_2 = arith.constant 0 : i32
    return %c0_i32, %c0_i32_0, %c0_i32_1 : i32, i32, i32
  }
  func.func @transform_13(%arg0: i32) -> (i32, i32, i32) {
    %c0_i32 = arith.constant 0 : i32
    %c0_i32_0 = arith.constant 0 : i32
    %c0_i32_1 = arith.constant 0 : i32
    %c0_i32_2 = arith.constant 0 : i32
    return %c0_i32, %c0_i32_0, %c0_i32_1 : i32, i32, i32
  }
  func.func @transform_14(%arg0: i32) -> (i32, i32, i32) {
    %c0_i32 = arith.constant 0 : i32
    %c0_i32_0 = arith.constant 0 : i32
    %c0_i32_1 = arith.constant 0 : i32
    %c0_i32_2 = arith.constant 0 : i32
    return %c0_i32, %c0_i32_0, %c0_i32_1 : i32, i32, i32
  }
  func.func @transform_15(%arg0: i32) -> (i32, i32, i32) {
    %c0_i32 = arith.constant 0 : i32
    %c0_i32_0 = arith.constant 0 : i32
    %c0_i32_1 = arith.constant 0 : i32
    %c0_i32_2 = arith.constant 0 : i32
    return %c0_i32, %c0_i32_0, %c0_i32_1 : i32, i32, i32
  }
  func.func @transform_16(%arg0: i32) -> (i32, i32, i32) {
    %c0_i32 = arith.constant 0 : i32
    %c0_i32_0 = arith.constant 0 : i32
    %c0_i32_1 = arith.constant 0 : i32
    %c0_i32_2 = arith.constant 0 : i32
    return %c0_i32, %c0_i32_0, %c0_i32_1 : i32, i32, i32
  }
  func.func @transform_17(%arg0: i32) -> (i32, i32, i32) {
    %c0_i32 = arith.constant 0 : i32
    %c0_i32_0 = arith.constant 0 : i32
    %c0_i32_1 = arith.constant 0 : i32
    %c0_i32_2 = arith.constant 0 : i32
    return %c0_i32, %c0_i32_0, %c0_i32_1 : i32, i32, i32
  }
  func.func @transform_18(%arg0: i32) -> (i32, i32, i32) {
    %c0_i32 = arith.constant 0 : i32
    %c0_i32_0 = arith.constant 0 : i32
    %c0_i32_1 = arith.constant 0 : i32
    %c0_i32_2 = arith.constant 0 : i32
    return %c0_i32, %c0_i32_0, %c0_i32_1 : i32, i32, i32
  }
  func.func @transform_19(%arg0: i32) -> (i32, i32) {
    %c0_i32 = arith.constant 0 : i32
    %c0_i32_0 = arith.constant 0 : i32
    %c0_i32_1 = arith.constant 0 : i32
    return %c0_i32, %c0_i32_0 : i32, i32
  }
  func.func @transform_20(%arg0: i32) -> (i32, i32) {
    %c0_i32 = arith.constant 0 : i32
    %c0_i32_0 = arith.constant 0 : i32
    %c0_i32_1 = arith.constant 0 : i32
    return %c0_i32, %c0_i32_0 : i32, i32
  }
  func.func @transform_21(%arg0: i32) -> (i32, i32, i32) {
    %c0_i32 = arith.constant 0 : i32
    %c0_i32_0 = arith.constant 0 : i32
    %c0_i32_1 = arith.constant 0 : i32
    return %arg0, %c0_i32, %c0_i32_0 : i32, i32, i32
  }
}

</mosaic_0001>

<bundles_post_ra>
// kernel: tpu_custom_call.1
= control target key start
LH: loop header
LB: loop body
LE: loop exit
PB: predicated region body
PF: predicated region fallthrough
CT: control target
= control target key end

     0   :  { %s5075_s0 = inlined_call_operand.hbm [shape: f32[2,8,32], index: 0, kind: input, shape index: {}]   ;;  %s5076_s1 = inlined_call_operand.hbm [shape: f32[2,8,32], index: 1, kind: input, shape index: {}]   ;;  %s5077_s2 = inlined_call_operand.hbm [shape: f32[2,1,8], index: 2, kind: input, shape index: {}]   ;;  %s5078_s3 = inlined_call_operand.vmem [shape: f32[2,32,96], index: 3, kind: input, shape index: {}]   ;;  %s5079_s4 = inlined_call_operand.hbm [shape: f32[2,1,96], index: 4, kind: input, shape index: {}]   ;;  %s5080_s5 = inlined_call_operand.vmem [shape: f32[2,32,32], index: 5, kind: input, shape index: {}]   ;;  %s5081_s6 = inlined_call_operand.hbm [shape: f32[2,1,32], index: 6, kind: input, shape index: {}]   ;;  %s5082_s7 = inlined_call_operand.hbm [shape: f32[2,32,64], index: 7, kind: input, shape index: {}]   ;;  %s5083_s8 = inlined_call_operand.hbm [shape: f32[2,1,64], index: 8, kind: input, shape index: {}]   ;;  %s5084_s9 = inlined_call_operand.vmem [shape: f32[4,32,32], index: 9, kind: input, shape index: {}]   ;;  %s5085_s10 = inlined_call_operand.vmem [shape: f32[4,1,32], index: 10, kind: input, shape index: {}]   ;;  %s5086_s11 = inlined_call_operand.vmem [shape: f32[4,1,32], index: 11, kind: input, shape index: {}]   ;;  %s5087_s12 = inlined_call_operand.hbm [shape: f32[4,1,32], index: 12, kind: input, shape index: {}]   ;;  %s5088_s13 = inlined_call_operand.hbm [shape: f32[4,1,32], index: 13, kind: input, shape index: {}]   ;;  %s5089_s14 = inlined_call_operand.hbm [shape: f32[4,1,32], index: 14, kind: input, shape index: {}]   ;;  %s5090_s15 = inlined_call_operand.vmem [shape: f32[4,32,64], index: 15, kind: input, shape index: {}]   ;;  %s5091_s16 = inlined_call_operand.vmem [shape: f32[4,1,64], index: 16, kind: input, shape index: {}]   ;;  %s5092_s17 = inlined_call_operand.vmem [shape: f32[4,64,32], index: 17, kind: input, shape index: {}]   ;;  %s5093_s18 = inlined_call_operand.hbm [shape: f32[4,1,32], index: 18, kind: input, shape index: {}]   ;;  %s5094_s19 = inlined_call_operand.hbm [shape: f32[32,25], index: 19, kind: input, shape index: {}]   ;;  %s5095_s20 = inlined_call_operand.vmem [shape: f32[1,25], index: 20, kind: input, shape index: {}]   ;;  %s5096_s21 = inlined_call_operand.hbm [shape: f32[2,8,25], index: 21, kind: output, shape index: {}]  }
   0x1   :  { %5151 = sst [smem:[#allocation37_spill]] %s5075_s0 }
   0x2   :  { %5152 = sst [smem:[#allocation38_spill]] %s5076_s1 }
   0x3   :  { %5153 = sst [smem:[#allocation39_spill]] %s5077_s2 }
   0x4   :  { %5154 = sst [smem:[#allocation40_spill]] %s5078_s3 }
   0x5   :  { %5155 = sst [smem:[#allocation41_spill]] %s5079_s4 }
   0x6   :  { %5156 = sst [smem:[#allocation42_spill]] %s5080_s5 }
   0x7   :  { %5157 = sst [smem:[#allocation43_spill]] %s5081_s6 }
   0x8   :  { %5158 = sst [smem:[#allocation44_spill]] %s5082_s7 }
   0x9   :  { %5159 = sst [smem:[#allocation45_spill]] %s5083_s8 }
   0xa   :  { %5160 = sst [smem:[#allocation46_spill]] %s5086_s11 }
   0xb   :  { %5161 = sst [smem:[#allocation47_spill]] %s5087_s12 }
   0xc   :  { %5162 = sst [smem:[#allocation48_spill]] %s5088_s13 }
   0xd   :  { %5163 = sst [smem:[#allocation49_spill]] %s5089_s14 }
   0xe   :  { %5164 = sst [smem:[#allocation50_spill]] %s5090_s15 }
   0xf   :  { %5165 = sst [smem:[#allocation51_spill]] %s5091_s16 }
  0x10   :  { %5166 = sst [smem:[#allocation52_spill]] %s5092_s17 }
  0x11   :  { %5167 = sst [smem:[#allocation53_spill]] %s5093_s18 }
  0x12   :  { %5168 = sst [smem:[#allocation54_spill]] %s5094_s19 }
  0x13   :  { %5169 = sst [smem:[#allocation55_spill]] %s5095_s20 }
  0x14   :  { %5170 = sst [smem:[#allocation56_spill]] %s5096_s21 }
  0x15   :  { %26 = vsyncpa [#allocation3], 0 }
  0x16   :  { %28 = vsyncpa [#allocation3 + $0x1], 0 }
  0x17   :  { %29 = vsyncpa [#allocation6], 0 }
  0x18   :  { %31 = vsyncpa [#allocation6 + $0x1], 0 }
  0x19   :  { %32 = vsyncpa [#allocation9], 0 }
  0x1a   :  { %33 = vsyncpa [#allocation12], 0 }
  0x1b   :  { %34 = vsyncpa [#allocation15], 0 }
  0x1c   :  { %35 = vsyncpa [#allocation18], 0 }
  0x1d   :  { %36 = vsyncpa [#allocation21], 0 }
  0x1e   :  { %37 = vsyncpa [#allocation4], 0 }
  0x1f   :  { %39 = vsyncpa [#allocation4 + $0x1], 0  ;;  %s4231_s2 = smov 0   ;;  %s4233_s25 = smov 0  }
  0x20   :  { %s4235_s26 = smov 0   ;;  %s4237_s27 = smov 0  }
  0x21 LB: > { %5171 = sst [smem:[#allocation31_spill]] %s4078_s2  ;;  %s4255_s4 = sadd.s32 4294967295, %s4090_s27   ;;  %s4090_s27 = sphi %s4237_s27, %s5240_s27   ;;  %s4086_s26 = sphi %s4235_s26, %s5242_s26   ;;  %s4082_s25 = sphi %s4233_s25, %s5244_s25   ;;  %s4078_s2 = sphi %s4231_s2, %s5243_s2  }
  0x22   : > { %5172 = sst [smem:[#allocation32_spill]] %s4086_s26  ;;  %p3176_p0 = scmp.ge.s32.totalorder %s4090_s27, 1 }
  0x23   : > { %s5173_s29 = sld [smem:[#allocation41_spill]]  ;;  %p5120_p1 = scmp.eq.s32.totalorder %s4255_s4, 0 }
  0x24   : > { %p532_p2 = scmp.lt.s32.totalorder %s4090_s27, 3  ;;  %s4092_s5 = smov [#allocation8]  }
  0x25   : > { %s548_s22 = sshll.u32 %s4092_s5, 4  ;;  %s5175_s7 = sld [smem:[#allocation44_spill]]  ;;  %s549_s22 = int_to_ptr.vmem [resolvable:$true] %s548_s22 }
  0x26   : > { %p4260_p3 = pnand %p3176_p0, %p532_p2  ;;  %s4093_s28 = smov [#allocation11]  }
  0x27   : > { %s5103_s5 = smov 16   ;;  %s5105_s20 = smov 1  }
  0x28   : > { %p3384_p4 = pneg %p4260_p3  ;;  %s5108_s23 = smov 128  }
  0x29   : > { %s546_s0 = sshll.u32 %s5173_s29, 4  ;;  %s579_s29 = sshll.u32 %s4093_s28, 4  ;;  %s547_s0 = int_to_ptr.hbm [resolvable:$true] %s546_s0  ;;  %s580_s29 = int_to_ptr.vmem [resolvable:$true] %s579_s29 }
  0x2a   : > { %p4272_p6 = pnand %p3384_p4, %p5120_p1  ;;  %s5109_s1 = smov 8  }
  0x2b   : > { %s577_s24 = sshll.u32 %s5175_s7, 4  ;;  %s5177_s12 = sld [smem:[#allocation47_spill]]  ;;  %s578_s24 = int_to_ptr.hbm [resolvable:$true] %s577_s24 }
  0x2c   : > { %3387 = dma.hbm_to_vmem [thread:$0]  (!%p4272_p6), %s547_s0, 32, %s549_s22, [#allocation9], %s5103_s5, %s5103_s5, %s5105_s20  }
  0x2d   : > { %3393 = dma.hbm_to_vmem [thread:$0]  (!%p4272_p6), %s578_s24, 1024, %s580_s29, [#allocation12], %s5108_s23, %s5108_s23, %s5109_s1  }
  0x2e   : > { %s4098_s0 = smov [#allocation14]   ;;  %s5178_s14 = sld [smem:[#allocation49_spill]] }
  0x2f   : > { %s616_s22 = sshll.u32 %s4098_s0, 4  ;;  %s5179_s24 = smov 1   ;;  %s617_s22 = int_to_ptr.vmem [resolvable:$true] %s616_s22 }
  0x30   : > { %s5180_s29 = smov 16   ;;  %s4099_s7 = smov [#allocation17]  }
  0x31   : > { %s614_s21 = sshll.u32 %s5177_s12, 4  ;;  %s644_s28 = sshll.u32 %s4099_s7, 4  ;;  %s615_s21 = int_to_ptr.hbm [resolvable:$true] %s614_s21  ;;  %s645_s28 = int_to_ptr.vmem [resolvable:$true] %s644_s28 }
  0x32   : > { %3399 = dma.hbm_to_vmem [thread:$0]  (!%p4272_p6), %s615_s21, 64, %s617_s22, [#allocation15], %s5180_s29, %s5180_s29, %s5179_s24  }
  0x33   : > { %s3175_s20 = sadd.s32 4294967294, %s4090_s27   ;;  %s4304_s5 = sadd.s32 1, %s4090_s27  }
  0x34   : > { %s642_s16 = sshll.u32 %s5178_s14, 4  ;;  %5181 = sst [smem:[#allocation33_spill]] %s4304_s5  ;;  %s643_s16 = int_to_ptr.hbm [resolvable:$true] %s642_s16 }
  0x35   : > { %3405 = dma.hbm_to_vmem [thread:$0]  (!%p4272_p6), %s643_s16, 64, %s645_s28, [#allocation18], %s5180_s29, %s5180_s29, %s5179_s24  }
  0x36   : > { %s49_s0 = ssub.s32 %s4090_s27, %s4304_s5  ;;  %s52_s21 = sadd.s32 1, %s4086_s26 }
  0x37   : > { %p50_p7 = scmp.eq.s32.totalorder %s49_s0, 0  ;;  %p59_p8 = scmp.ne.s32.totalorder %s4086_s26, %s4082_s25 }
  0x38   : > { %p60_p9 = scmp.eq.s32.totalorder %s4090_s27, 0  ;;  %p65_p10 = scmp.ne.s32.totalorder %s4082_s25, %s4078_s2 }
  0x39   : > { %s4315_s22 = scalar_select %p50_p7, %s4086_s26, %s52_s21  }
  0x3a   : > { %p61_p11 = por %p60_p9, %p59_p8  ;;  %p4319_p12 = por %p5120_p1, %p65_p10 }
  0x3b   : > { %5182 = sst [smem:[#allocation34_spill]] %s4315_s22  ;;  %p519_p13 = scmp.eq.s32.totalorder %s4255_s4, 1 }
  0x3c   : > { %p525_p0 = scmp.eq.s32.totalorder %s3175_s20, 1  ;;  %p3435_p2 = scmp.lt.s32.totalorder %s4090_s27, 2 }
  0x3d   : > { %s4326_s16 = sand.u32 1, %s4086_s26   ;;  %p4328_p4 = por %p519_p13, %p59_p8 }
  0x3e   : > { %p4332_p5 = por %p525_p0, %p65_p10  ;;  %s5119_s21 = sshll.u32 %s4326_s16, 3 }
  0x3f   : > { %s5184_s28 = scalar_select %p4328_p4, 1, 0 }
  0x40   : > { %s5186_s0 = scalar_select %p4332_p5, 1, 0 }
  0x41   : > { %5185 = sst [smem:[#allocation35_spill]] %s5184_s28  ;;  %s5121_s23 = sshll.u32 %s4090_s27, 3 }
  0x42   : > { %5187 = sst [smem:[#allocation36_spill]] %s5186_s0  ;;  %p4338_p7 = pnand %p3435_p2, %p61_p11 }
  0x43   : > { %s717_s20 = sand.u32 1, %s4090_s27   ;;  %s5189_s22 = sld [smem:[#allocation38_spill]] }
  0x44   : > { %s721_s2 = scalar_lea.vmem [#allocation5], %s5119_s21  ;;  %s4350_s0 = scalar_lea.sflag [#allocation6], %s717_s20 }
  0x45   : > { %s729_s28 = sshll.u32 %s721_s2, 4  ;;  %p3764_p9 = pneg %p4338_p7  ;;  %s730_s28 = int_to_ptr.vmem [resolvable:$true] %s729_s28 }
  0x49   : > { %s725_s26 = scalar_lea.hbm %s5189_s22, %s5121_s23 }
  0x4a   : > { %s727_s5 = sshll.u32 %s725_s26, 4  ;;  %s3767_s26 = scalar_lea.hbm %s5189_s22, 16  ;;  %s728_s5 = int_to_ptr.hbm [resolvable:$true] %s727_s5 }
  0x4b   : > { %s3760_s11 = sshra.s32 %s728_s5, 4  ;;  %s3761_s11 = int_to_ptr.hbm [resolvable:$true] %s3760_s11 }
  0x4c   : > { %s3762_s17 = scalar_lea.hbm %s3761_s11, 8  ;;  %p3768_p13 = scmp.lt.s32.totalorder %s3761_s11, %s5189_s22 }
  0x4d   : > { %p3763_p8 = scmp.ne.s32.totalorder %s3761_s11, %s3762_s17  ;;  %p3769_p0 = scmp.lt.s32.totalorder %s3767_s26, %s3762_s17 }
  0x4f   : > { %p3765_p10 = pnand %p3764_p9, %p3763_p8  ;;  %p3770_p2 = por %p3769_p0, %p3768_p13 }
  0x51   : > { %p3766_p11 = pneg %p3765_p10 }
  0x53   : > { %p3771_p1 = pnand %p3770_p2, %p3766_p11 }
  0x55   : > { %3774 = shalt.err (!%p3771_p1)
}
  0x56   : > { %3418 = dma.hbm_to_vmem [thread:$0]  (!%p4338_p7), %s728_s5, 128, %s730_s28, %s4350_s0  }
  0x57   : > { %s5190_s6 = sld [smem:[#allocation43_spill]]  ;;  %s4100_s12 = smov [#allocation10]  }
  0x58   : > { %s565_s14 = sshll.u32 %s4100_s12, 4  ;;  %s5191_s8 = sld [smem:[#allocation45_spill]]  ;;  %s566_s14 = int_to_ptr.vmem [resolvable:$true] %s565_s14 }
  0x59   : > { %s4101_s5 = smov [#allocation13]   ;;  %s5192_s13 = sld [smem:[#allocation48_spill]] }
  0x5a   : > { %s593_s28 = sshll.u32 %s4101_s5, 4  ;;  %s5193_s18 = sld [smem:[#allocation53_spill]]  ;;  %s594_s28 = int_to_ptr.vmem [resolvable:$true] %s593_s28 }
  0x5b   : > { %s4103_s17 = smov [#allocation19]   ;;  %s5194_s19 = sld [smem:[#allocation54_spill]] }
  0x5c   : > { %s667_s5 = sshll.u32 %s4103_s17, 4  ;;  %s4104_s23 = smov [#allocation20]   ;;  %s668_s5 = int_to_ptr.vmem [resolvable:$true] %s667_s5 }
  0x5d   : > { %s563_s15 = sshll.u32 %s5190_s6, 4  ;;  %s681_s20 = sshll.u32 %s4104_s23, 4  ;;  %s564_s15 = int_to_ptr.hbm [resolvable:$true] %s563_s15  ;;  %s682_s20 = int_to_ptr.vmem [resolvable:$true] %s681_s20 }
  0x5e   : > { %s591_s21 = sshll.u32 %s5191_s8, 4  ;;  %s5195_s12 = sshll.u32 %s4090_s27, 3  ;;  %s592_s21 = int_to_ptr.hbm [resolvable:$true] %s591_s21 }
  0x5f   : > { %3390 = dma.hbm_to_vmem [thread:$0]  (!%p4272_p6), %s564_s15, 32, %s566_s14, [#allocation9], %s5180_s29, %s5180_s29, %s5179_s24  }
  0x60   : > { %s628_s2 = sshll.u32 %s5192_s13, 4  ;;  %s665_s15 = sshll.u32 %s5193_s18, 4  ;;  %s629_s2 = int_to_ptr.hbm [resolvable:$true] %s628_s2  ;;  %s666_s15 = int_to_ptr.hbm [resolvable:$true] %s665_s15 }
  0x61   : > { %3396 = dma.hbm_to_vmem [thread:$0]  (!%p4272_p6), %s592_s21, 32, %s594_s28, [#allocation12], %s5180_s29, %s5180_s29, %s5179_s24  }
  0x62   : > { %s4102_s14 = smov [#allocation16]   ;;  %s679_s26 = sshll.u32 %s5194_s19, 4  ;;  %s680_s26 = int_to_ptr.hbm [resolvable:$true] %s679_s26 }
  0x63   : > { %s630_s11 = sshll.u32 %s4102_s14, 4  ;;  %s5197_s6 = smov 8   ;;  %s631_s11 = int_to_ptr.vmem [resolvable:$true] %s630_s11 }
  0x64   : > { %3402 = dma.hbm_to_vmem [thread:$0]  (!%p4272_p6), %s629_s2, 64, %s631_s11, [#allocation15], %s5180_s29, %s5180_s29, %s5179_s24  }
  0x65   : > { %3408 = dma.hbm_to_vmem [thread:$0]  (!%p4272_p6), %s666_s15, 64, %s668_s5, [#allocation18], %s5180_s29, %s5180_s29, %s5179_s24  }
  0x66   : > { %s5196_s11 = sld [smem:[#allocation37_spill]]  ;;  %s5198_s21 = smov 128  }
  0x67   : > { %3411 = dma.hbm_to_vmem [thread:$0]  (!%p4272_p6), %s680_s26, 512, %s682_s20, [#allocation21], %s5198_s21, %s5198_s21, %s5197_s6  }
  0x68   : > { %s5199_s8 = sshll.u32 %s4326_s16, 3  ;;  %s699_s24 = scalar_lea.sflag [#allocation3], %s4326_s16 }
  0x69   : > { %s702_s13 = scalar_lea.vmem [#allocation2], %s5199_s8 }
  0x6a   : > { %s710_s18 = sshll.u32 %s702_s13, 4  ;;  %s711_s18 = int_to_ptr.vmem [resolvable:$true] %s710_s18 }
  0x6c   : > { %s706_s17 = scalar_lea.hbm %s5196_s11, %s5195_s12  ;;  %s3947_s23 = scalar_lea.hbm %s5196_s11, 16 }
  0x6d   : > { %s708_s28 = sshll.u32 %s706_s17, 4  ;;  %s709_s28 = int_to_ptr.hbm [resolvable:$true] %s708_s28 }
  0x6e   : > { %s3940_s29 = sshra.s32 %s709_s28, 4  ;;  %s3941_s29 = int_to_ptr.hbm [resolvable:$true] %s3940_s29 }
  0x6f   : > { %s3942_s15 = scalar_lea.hbm %s3941_s29, 8  ;;  %p3948_p6 = scmp.lt.s32.totalorder %s3941_s29, %s5196_s11 }
  0x70   : > { %p3943_p1 = scmp.ne.s32.totalorder %s3941_s29, %s3942_s15  ;;  %p3949_p11 = scmp.lt.s32.totalorder %s3947_s23, %s3942_s15 }
  0x72   : > { %p3945_p8 = pnand %p3943_p1, %p3764_p9  ;;  %p3950_p13 = por %p3949_p11, %p3948_p6 }
  0x74   : > { %p3946_p10 = pneg %p3945_p8 }
  0x76   : > { %p3951_p0 = pnand %p3950_p13, %p3946_p10 }
  0x78   : > { %3954 = shalt.err (!%p3951_p0)
}
  0x79   : > { %3415 = dma.hbm_to_vmem [thread:$0]  (!%p4338_p7), %s709_s28, 128, %s711_s18, %s699_s24  }
  0x7a   : > { %s5200_s20 = sld [smem:[#allocation39_spill]]  ;;  %s739_s14 = scalar_lea.vmem [#allocation7], %s4326_s16 }
  0x7b   : > { %s746_s17 = sshll.u32 %s739_s14, 4  ;;  %s747_s17 = int_to_ptr.vmem [resolvable:$true] %s746_s17 }
  0x80   : > { %s742_s12 = scalar_lea.hbm %s5200_s20, %s4090_s27  ;;  %s3977_s18 = scalar_lea.hbm %s5200_s20, 2 }
  0x81   : > { %s744_s2 = sshll.u32 %s742_s12, 4  ;;  %s745_s2 = int_to_ptr.hbm [resolvable:$true] %s744_s2 }
  0x82   : > { %s3970_s21 = sshra.s32 %s745_s2, 4  ;;  %s3971_s21 = int_to_ptr.hbm [resolvable:$true] %s3970_s21 }
  0x83   : > { %s3972_s29 = scalar_lea.hbm %s3971_s21, 1  ;;  %p3978_p10 = scmp.lt.s32.totalorder %s3971_s21, %s5200_s20 }
  0x84   : > { %p3973_p2 = scmp.ne.s32.totalorder %s3971_s21, %s3972_s29  ;;  %p3979_p6 = scmp.lt.s32.totalorder %s3977_s18, %s3972_s29 }
  0x86   : > { %p3975_p1 = pnand %p3973_p2, %p3764_p9  ;;  %p3980_p11 = por %p3979_p6, %p3978_p10 }
  0x88   : > { %p3976_p8 = pneg %p3975_p1 }
  0x8a   : > { %p3981_p13 = pnand %p3980_p11, %p3976_p8 }
  0x8c   : > { %3984 = shalt.err (!%p3981_p13)
}
  0x8d   : > { %3421 = dma.hbm_to_vmem [thread:$0]  (!%p4338_p7), %s745_s2, 16, %s747_s17, %s4350_s0  }
  0x8e   : > { %755 = sbr.rel (%p4260_p3) target bundleno = 8455 (0x2107), region = 104  ;;  %s4445_s16 = sand.u32 (!%p4260_p3), 1, %s4082_s25  }
  0x8f   : > { %s4448_s5 = sshll.u32 (!%p4260_p3), %s4445_s16, 3  ;;  %s758_s23 = scalar_lea.sflag (!%p4260_p3), [#allocation3], %s4445_s16 }
  0x90   : > { %s761_s6 = scalar_lea.vmem (!%p4260_p3), [#allocation2], %s4448_s5 }
  0x93   : > { %4045 = dma.done.wait (%p4319_p12), %s758_s23, 128  }
  0x94   : > { %4047 = vsyncadd (%p4319_p12), %s758_s23, 4294967168  ;;  %s767_s30 = sand.u32 1, %s4255_s4   ;;  %s771_s0 = scalar_lea.vmem [#allocation5], %s4448_s5 }
  0x95   : > { %s768_s1 = scalar_lea.sflag [#allocation6], %s767_s30 }
  0x96   : > { %4049 = dma.done.wait (%p4319_p12), %s768_s1, 144  }
  0x97   : > { %4051 = vsyncadd (%p4319_p12), %s768_s1, 4294967152  ;;  %s780_s26 = scalar_lea.vmem [#allocation7], %s4445_s16  ;;  %p5201_p3 = scmp.eq.s32.totalorder %s4255_s4, 0 }
  0x99   : > { %4053 = dma.done.wait (%p5201_p3), [#allocation9], 64   ;;  %p5202_p7 = pmov %p5201_p3 }
  0x9a   : > { %p5203_p9 = pmov %p5201_p3 }
  0x9b   : > { %4055 = vsyncadd (%p5202_p7), [#allocation9], 4294967232 }
  0x9c   : > { %4057 = dma.done.wait (%p5203_p9), [#allocation12], 1056   ;;  %p5204_p0 = pmov %p5201_p3 }
  0x9e   : > { %4059 = vsyncadd (%p5204_p0), [#allocation12], 4294966240  ;;  %p5205_p2 = pmov %p5204_p0 }
  0x9f   : > { %p5206_p1 = pmov %p5204_p0 }
  0xa0   : > { %4061 = dma.done.wait (%p5205_p2), [#allocation15], 128  }
  0xa1   : > { %4063 = vsyncadd (%p5206_p1), [#allocation15], 4294967168  ;;  %p5207_p12 = pmov %p5204_p0 }
  0xa2   : > { %p5208_p8 = pmov %p5204_p0 }
  0xa3   : > { %4065 = dma.done.wait (%p5207_p12), [#allocation18], 128  }
  0xa4   : > { %4067 = vsyncadd (%p5208_p8), [#allocation18], 4294967168  ;;  %p5209_p10 = pmov %p5204_p0 }
  0xa5   : > { %p5210_p6 = pmov %p5204_p0 }
  0xa6   : > { %4069 = dma.done.wait (%p5209_p10), [#allocation21], 512  }
  0xa7   : > { %4071 = vsyncadd (%p5210_p6), [#allocation21], 4294966784  ;;  %s5211_s13 = sld [smem:[#allocation40_spill]]  ;;  %vm907_vm0 = vcmask 261120   ;;  %v4495_v4 = vld [vmem:[%s761_s6] sm:$0xff]  ;;  %s5135_s15 = smov 88  }
  0xa8   : > { %v3507_v5 = vld [vmem:[#allocation8] ss:$0 sm:$0xff]  ;;  %s5126_s3 = smov 64   ;;  %s5145_s18 = smov 96   ;;  %vm934_vm1 = vcmask 64512   ;;  %vm1208_vm2 = vcmask 130048  }
  0xa9   : > { %s5143_s28 = smov 120   ;;  %s5133_s24 = smov 80   ;;  %vm1210_vm3 = vcmask 195584   ;;  %vm1330_vm7 = vcmask 523264  }
  0xaa   : > { %s5137_s23 = smov 72   ;;  %s5141_s6 = smov 112  }
  0xab   : > { %s5139_s30 = smov 104   ;;  %s5123_s1 = smov 40  }
  0xac   : > { %s5125_s7 = smov 56   ;;  %s5124_s8 = smov 48  }
  0xad   : > { %v902_v0 = vld [vmem:[%s5211_s13 + $0x18] sm:$0xff]  ;;  %v901_v1 = vld [vmem:[%s5211_s13 + $0x10] sm:$0xff]  ;;  %v900_v2 = vld [vmem:[%s5211_s13 + $0x8] sm:$0xff]  ;;  %s5131_s12 = smov 8   ;;  %s5127_s2 = smov 24  }
  0xae   : > { %923 = vmatpush.msra.mxu0 %v902_v0  ;;  %v899_v3 = vld [vmem:[%s5211_s13] sm:$0xff]  ;;  %s5129_s14 = smov 16   ;;  %s5216_s21 = sld [smem:[#allocation46_spill]] }
  0xaf   : > { %s5223_s29 = smov 8   ;;  %s5228_s11 = smov 120  }
  0xb0   : > { %924 = vmatpush.msra.mxu0 %v901_v1  ;;  %s2965_s22 = scalar_lea.sflag [#allocation4], %s4445_s16 }
  0xb2   : > { %925 = vmatpush.msra.mxu0 %v900_v2 }
  0xb4   : > { %926 = vmatpush.msra.mxu0 %v899_v3  ;;  %v1215_v3 = vld [vmem:[%s5084_s9 + $0x18] sm:$0xff] }
  0xb5   : > { %3204 = vmatmul.msk.f32.vlgmr.msra.gmra.mxu0 %vm907_vm0, %v4495_v4 }
 0x132   : > { %v928_v6 = vpop.f32.mrf.mxu0 }
 0x133   : > { %v4499_v7 = vadd.f32 %v3507_v5, %v928_v6  ;;  %v1214_v5 = vld [vmem:[%s5084_s9 + $0x10] sm:$0xff]  ;;  %v1213_v6 = vld [vmem:[%s5084_s9 + $0x8] sm:$0xff] }
 0x135   : > { %999 = vrot.lane.b32.xlu2 %v4499_v7, %s5135_s15  ;;  %971 = vrot.lane.b32.xlu1 %v4499_v7, %s5126_s3  ;;  %s5222_s15 = smov 80   ;;  %s5229_s3 = smov 112  }
 0x136   : > { %932 = vrot.lane.b32.xlu0 %v4499_v7, %s5145_s18 }
 0x13d   : > { %997 = vrot.lane.b32.xlu2 %v4499_v7, %s5143_s28 }
 0x145   : > { %1065 = vrot.lane.b32.xlu2 %v4499_v7, %s5133_s24 }
 0x14d   : > { %1131 = vrot.lane.b32.xlu2 %v4499_v7, %s5137_s23 }
 0x155   : > { %1063 = vrot.lane.b32.xlu2 %v4499_v7, %s5141_s6 }
 0x18f   : > { %v1000_v8 = vpop.permute.xlu2 %999 }
 0x197   : > { %v998_v9 = vpop.permute.xlu2 %997 }
 0x19f   : > { %v1066_v10 = vpop.permute.xlu2 %1065 }
 0x1a7   : > { %v1132_v11 = vpop.permute.xlu2 %1131  ;;  %v972_v12 = vpop.permute.xlu1 %971 }
 0x1a8   : > { %v933_v13 = vpop.permute.xlu0 %932  ;;  %992 = vmatpush.msra.mxu3 %v972_v12  ;;  %3214 = vmatpush.xpose.msk.msrb.mxu0 %vm934_vm1, %v1132_v11 }
 0x1a9   : > { %3205 = vmatpush.xpose.msk.msra.mxu1 %vm934_vm1, %v933_v13 }
 0x1aa   : > { %3208 = vmatpush.xpose.msk.msrb.mxu3 %vm934_vm1, %v1000_v8 }
 0x1ac   : > { %3206 = vmatmul.msk.f32.vlgmr.msra.gmra.mxu1 %vm934_vm1, %v4499_v7 }
 0x1ad   : > { %3211 = vmatpush.xpose.msk.msrb.mxu1 %vm934_vm1, %v1066_v10 }
 0x1af   : > { %v1064_v14 = vpop.permute.xlu2 %1063 }
 0x1b1   : > { %1235 = vmatpush.msra.mxu1 %v1215_v3 }
 0x1b3   : > { %1236 = vmatpush.msra.mxu1 %v1214_v5 }
 0x1b4   : > { %3212 = vmatmul.msk.f32.vlgmr.msrb.gmra.mxu1 %vm934_vm1, %v1064_v14  ;;  %v3508_v14 = vld [vmem:[%s5085_s10] ss:$0 sm:$0xff] }
 0x1b5   : > { %1237 = vmatpush.msra.mxu1 %v1213_v6 }
 0x229   : > { %v956_v15 = vpop.f32.mrf.mxu1 }
 0x22a   : > { %v959_v16 = vmul.f32 0.35355338, %v956_v15 }
 0x22c   : > { %v960_v17 = vsel %vm934_vm1, %v959_v16, -inf }
 0x22d   : > { %961 = vmax.xlane.f32.xlu0 %v960_v17 }
 0x231   : > { %v1088_v23 = vpop.f32.mrf.mxu1 }
 0x232   : > { %v1091_v24 = vmul.f32 0.35355338, %v1088_v23 }
 0x234   : > { %v1092_v25 = vsel %vm934_vm1, %v1091_v24, -inf }
 0x2a0   : > { %v962_v18 = vpop.xlane.xlu0 %961 }
 0x2a1   : > { %v963_v19 = vsub.f32 %v959_v16, %v962_v18 }
 0x2a3   : > { %v964_v20 = vmul.f32 1.442695, %v963_v19  ;;  %v4119_v19 = vmov 32.0  }
 0x2a5   : > { %3542 = vpow2.f32 %v964_v20 }
 0x2ab   : > { %v3543_v21 = vpop.eup %3542 }
 0x2ac   : > { %v966_v22 = vsel %vm934_vm1, %v3543_v21, 0.0 }
 0x2ad   : > { %967 = vadd.xlane.f32.xlu1 %v966_v22 }
 0x2c6   : > { %1129 = vrot.lane.b32.xlu1 %v4499_v7, %s5139_s30 }
 0x2f0   : > { %1093 = vmax.xlane.f32.xlu1 %v1092_v25 }
 0x309   : > { %1169 = vrot.lane.b32.xlu1 %v4499_v7, %s5123_s1  ;;  %s5219_s1 = sld [smem:[#allocation42_spill]] }
 0x320   : > { %v968_v26 = vpop.xlane.xlu1 %967 }
 0x321   : > { %3544 = vrcp.f32 %v968_v26 }
 0x327   : > { %v3545_v27 = vpop.eup %3544 }
 0x328   : > { %v970_v28 = vmul.f32 %v3545_v27, %v3543_v21 }
 0x32a   : > { %3207 = vmatmul.msk.f32.vlgmr.msra.gmra.mxu3 %vm934_vm1, %v970_v28 }
 0x332   : > { %3209 = vmatmul.msk.f32.vlgmr.msrb.gmra.mxu3 %vm934_vm1, %v998_v9 }
 0x338   : > { %v1130_v29 = vpop.permute.xlu1 %1129 }
 0x339   : > { %3215 = vmatmul.msk.f32.vlgmr.msrb.gmra.mxu0 %vm934_vm1, %v1130_v29 }
 0x363   : > { %v1094_v30 = vpop.xlane.xlu1 %1093 }
 0x364   : > { %v1095_v32 = vsub.f32 %v1091_v24, %v1094_v30 }
 0x366   : > { %v1096_v33 = vmul.f32 1.442695, %v1095_v32 }
 0x368   : > { %3546 = vpow2.f32 %v1096_v33 }
 0x36e   : > { %v3547_v40 = vpop.eup %3546 }
 0x36f   : > { %v1098_v41 = vsel %vm934_vm1, %v3547_v40, 0.0 }
 0x37b   : > { %v1170_v49 = vpop.permute.xlu1 %1169 }
 0x3ad   : > { %v4532_v31 = vpop.f32.mrf.mxu3 }
 0x3b5   : > { %v1022_v34 = vpop.f32.mrf.mxu3 }
 0x3b6   : > { %v1025_v35 = vmul.f32 0.35355338, %v1022_v34  ;;  %v1154_v36 = vpop.f32.mrf.mxu0 }
 0x3b7   : > { %v1157_v37 = vmul.f32 0.35355338, %v1154_v36 }
 0x3b8   : > { %v1026_v38 = vsel %vm934_vm1, %v1025_v35, -inf }
 0x3b9   : > { %1027 = vmax.xlane.f32.xlu2 %v1026_v38  ;;  %v1158_v39 = vsel %vm934_vm1, %v1157_v37, -inf }
 0x3ba   : > { %1159 = vmax.xlane.f32.xlu0 %v1158_v39 }
 0x3c2   : > { %1099 = vadd.xlane.f32.xlu0 %v1098_v41 }
 0x3d1   : > { %1037 = vrot.lane.b32.xlu2 %v4499_v7, %s5125_s7  ;;  %s5224_s7 = smov 24  }
 0x42c   : > { %v1028_v42 = vpop.xlane.xlu2 %1027 }
 0x42d   : > { %v1160_v43 = vpop.xlane.xlu0 %1159  ;;  %v1029_v45 = vsub.f32 %v1025_v35, %v1028_v42 }
 0x42e   : > { %v1161_v44 = vsub.f32 %v1157_v37, %v1160_v43 }
 0x42f   : > { %v1030_v47 = vmul.f32 1.442695, %v1029_v45 }
 0x430   : > { %v1162_v46 = vmul.f32 1.442695, %v1161_v44 }
 0x432   : > { %3548 = vpow2.f32 %v1162_v46 }
 0x433   : > { %3550 = vpow2.f32 %v1030_v47 }
 0x434   : > { %v1038_v48 = vpop.permute.xlu2 %1037 }
 0x435   : > { %1058 = vmatpush.msra.mxu2 %v1038_v48  ;;  %v1100_v54 = vpop.xlane.xlu0 %1099 }
 0x437   : > { %1190 = vmatpush.msrb.mxu2 %v1170_v49 }
 0x438   : > { %v3549_v50 = vpop.eup %3548 }
 0x439   : > { %v1164_v51 = vsel %vm934_vm1, %v3549_v50, 0.0  ;;  %v3551_v52 = vpop.eup %3550 }
 0x43a   : > { %1165 = vadd.xlane.f32.xlu0 %v1164_v51  ;;  %v1032_v53 = vsel %vm934_vm1, %v3551_v52, 0.0 }
 0x442   : > { %1033 = vadd.xlane.f32.xlu0 %v1032_v53 }
 0x456   : > { %1103 = vrot.lane.b32.xlu0 %v4499_v7, %s5124_s8  ;;  %v1212_v7 = vld [vmem:[%s5084_s9] sm:$0xff]  ;;  %s5230_s8 = smov 104  }
 0x457   : > { %1238 = vmatpush.msra.mxu1 %v1212_v7 }
 0x4ad   : > { %v1166_v55 = vpop.xlane.xlu0 %1165 }
 0x4b5   : > { %v1034_v56 = vpop.xlane.xlu0 %1033 }
 0x4b6   : > { %3552 = vrcp.f32 %v1034_v56 }
 0x4b7   : > { %3554 = vrcp.f32 %v1166_v55 }
 0x4b8   : > { %3556 = vrcp.f32 %v1100_v54  ;;  %v3510_v54 = vld [vmem:[#allocation14] ss:$0 sm:$0xff] }
 0x4b9   : > { %3558 = vrcp.f32 %v4119_v19  ;;  %v4633_v19 = vld [vmem:[%s771_s0] sm:$0xff]  ;;  %s5220_s0 = smov 72  }
 0x4bc   : > { %v3553_v57 = vpop.eup %3552 }
 0x4bd   : > { %v1036_v58 = vmul.f32 %v3553_v57, %v3551_v52  ;;  %v3555_v59 = vpop.eup %3554  ;;  %v3509_v52 = vld [vmem:[%s5216_s21] ss:$0 sm:$0xff] }
 0x4be   : > { %v3557_v60 = vpop.eup %3556  ;;  %v1168_v61 = vmul.f32 %v3555_v59, %v3549_v50 }
 0x4bf   : > { %3210 = vmatmul.msk.f32.vlgmr.msra.gmra.mxu2 %vm934_vm1, %v1036_v58  ;;  %v1102_v62 = vmul.f32 %v3557_v60, %v3547_v40  ;;  %v3559_v20 = vpop.eup %3558 }
 0x4c0   : > { %v1250_v21 = vmul.f32 32.0, %v3559_v20  ;;  %vm1254_vm4 = vweird.f32 %v3559_v20 }
 0x4c2   : > { %v1251_v22 = vsub.f32 1.0, %v1250_v21 }
 0x4c4   : > { %v1252_v23 = vmul.f32 %v3559_v20, %v1251_v22 }
 0x4c6   : > { %v1253_v24 = vadd.f32 %v3559_v20, %v1252_v23 }
 0x4c7   : > { %3216 = vmatmul.msk.f32.vlgmr.msrb.gmra.mxu2 %vm934_vm1, %v1168_v61 }
 0x4c8   : > { %v1104_v63 = vpop.permute.xlu0 %1103  ;;  %v4571_v25 = vsel %vm1254_vm4, %v3559_v20, %v1253_v24  ;;  %v1390_v20 = vld [vmem:[%s5219_s1] sm:$0xff] }
 0x4c9   : > { %1124 = vmatpush.msra.mxu3 %v1104_v63 }
 0x4ca   : > { %3213 = vmatmul.msk.f32.vlgmr.msra.gmra.mxu3 %vm934_vm1, %v1102_v62 }
 0x542   : > { %v1060_v0 = vpop.f32.mrf.mxu2 }
 0x543   : > { %1196 = vrot.lane.b32.xlu0 %v1060_v0, %s5131_s12  ;;  %s5225_s12 = smov 16  }
 0x54a   : > { %v1192_v1 = vpop.f32.mrf.mxu2 }
 0x54b   : > { %1204 = vrot.lane.b32.xlu1 %v1192_v1, %s5127_s2  ;;  %s5212_s2 = sld [smem:[#allocation50_spill]]  ;;  %v3512_v1 = vld [vmem:[#allocation19] ss:$0 sm:$0xff] }
 0x54d   : > { %v1126_v2 = vpop.f32.mrf.mxu3 }
 0x54e   : > { %1200 = vrot.lane.b32.xlu2 %v1126_v2, %s5129_s14  ;;  %s5227_s14 = smov 96  }
 0x551   : > { %s5213_s17 = smov %s5212_s2  ;;  %v1289_v30 = vld [vmem:[%s5212_s2 + $0x18] sm:$0xff]  ;;  %s5214_s2 = sld [smem:[#allocation52_spill]] }
 0x552   : > { %1309 = vmatpush.msrb.mxu3 %v1289_v30  ;;  %v1287_v32 = vld [vmem:[%s5213_s17 + $0x8] sm:$0xff]  ;;  %v1286_v33 = vld [vmem:[%s5213_s17] sm:$0xff] }
 0x557   : > { %s5215_s24 = smov %s5214_s2  ;;  %v1325_v36 = vld [vmem:[%s5214_s2 + $0x38] sm:$0xff]  ;;  %s5217_s2 = sld [smem:[#allocation51_spill]] }
 0x558   : > { %v1324_v37 = vld [vmem:[%s5215_s24 + $0x30] sm:$0xff]  ;;  %1342 = vmatpush.msra.mxu0 %v1325_v36  ;;  %v1323_v38 = vld [vmem:[%s5215_s24 + $0x28] sm:$0xff]  ;;  %v1322_v40 = vld [vmem:[%s5215_s24 + $0x20] sm:$0xff] }
 0x559   : > { %v1321_v42 = vld [vmem:[%s5215_s24 + $0x18] sm:$0xff]  ;;  %v1320_v58 = vld [vmem:[%s5215_s24 + $0x10] sm:$0xff]  ;;  %v1319_v59 = vld [vmem:[%s5215_s24 + $0x8] sm:$0xff] }
 0x55a   : > { %1343 = vmatpush.msra.mxu0 %v1324_v37  ;;  %v1318_v60 = vld [vmem:[%s5215_s24] sm:$0xff]  ;;  %v3514_v36 = vld [vmem:[#allocation17] ss:$0 sm:$0xff] }
 0x55c   : > { %1344 = vmatpush.msra.mxu0 %v1323_v38 }
 0x55d   : > { %s5218_s23 = smov %s5217_s2  ;;  %v3511_v61 = vld [vmem:[%s5217_s2] ss:$0 sm:$0xff]  ;;  %s5231_s2 = smov 56  }
 0x55e   : > { %1345 = vmatpush.msra.mxu0 %v1322_v40  ;;  %v3515_v40 = vld [vmem:[#allocation13] ss:$0 sm:$0xff] }
 0x560   : > { %1346 = vmatpush.msra.mxu0 %v1321_v42 }
 0x562   : > { %1347 = vmatpush.msra.mxu0 %v1320_v58 }
 0x564   : > { %1348 = vmatpush.msra.mxu0 %v1319_v59 }
 0x566   : > { %1349 = vmatpush.msra.mxu0 %v1318_v60 }
 0x5a8   : > { %v1201_v10 = vpop.permute.xlu2 %1200 }
 0x5b5   : > { %v1197_v8 = vpop.permute.xlu0 %1196 }
 0x5b6   : > { %v1207_v9 = vsel %vm934_vm1, %v4532_v31, %v1197_v8  ;;  %v1288_v31 = vld [vmem:[%s5213_s17 + $0x10] sm:$0xff] }
 0x5b7   : > { %v1209_v11 = vsel %vm1208_vm2, %v1207_v9, %v1201_v10  ;;  %1310 = vmatpush.msrb.mxu3 %v1288_v31 }
 0x5b9   : > { %1311 = vmatpush.msrb.mxu3 %v1287_v32 }
 0x5bb   : > { %1312 = vmatpush.msrb.mxu3 %v1286_v33 }
 0x5bd   : > { %v1205_v12 = vpop.permute.xlu1 %1204 }
 0x5be   : > { %v1211_v13 = vsel %vm1210_vm3, %v1209_v11, %v1205_v12  ;;  %v1424_v12 = vld [vmem:[#allocation11 + $0x18] sm:$0xff] }
 0x5bf   : > { %3217 = vmatmul.msk.f32.vlgmr.msra.gmra.mxu1 %vm907_vm0, %v1211_v13  ;;  %v1423_v13 = vld [vmem:[#allocation11 + $0x10] sm:$0xff] }
 0x5c0   : > { %1444 = vmatpush.msrb.mxu1 %v1424_v12 }
 0x5c2   : > { %1445 = vmatpush.msrb.mxu1 %v1423_v13 }
 0x63c   : > { %v1240_v15 = vpop.f32.mrf.mxu1 }
 0x63d   : > { %v1241_v16 = vadd.f32 %v3508_v14, %v1240_v15  ;;  %v1422_v14 = vld [vmem:[#allocation11 + $0x8] sm:$0xff]  ;;  %v1393_v15 = vld [vmem:[%s5219_s1 + $0x18] sm:$0xff] }
 0x63e   : > { %1413 = vmatpush.msra.mxu2 %v1393_v15  ;;  %1446 = vmatpush.msrb.mxu1 %v1422_v14 }
 0x63f   : > { %v1243_v17 = vadd.f32 %v1241_v16, %v4495_v4  ;;  %v1392_v16 = vld [vmem:[%s5219_s1 + $0x10] sm:$0xff] }
 0x640   : > { %1414 = vmatpush.msra.mxu2 %v1392_v16 }
 0x641   : > { %v1246_v18 = vsel %vm907_vm0, %v1243_v17, 0.0 }
 0x642   : > { %1247 = vadd.xlane.f32.xlu0 %v1246_v18  ;;  %v1391_v18 = vld [vmem:[%s5219_s1 + $0x8] sm:$0xff] }
 0x643   : > { %1415 = vmatpush.msra.mxu2 %v1391_v18 }
 0x645   : > { %1416 = vmatpush.msra.mxu2 %v1390_v20 }
 0x6b5   : > { %v1248_v26 = vpop.xlane.xlu0 %1247 }
 0x6b6   : > { %v1256_v27 = vmul.f32 %v4571_v25, %v1248_v26 }
 0x6b8   : > { %v1257_v28 = vsub.f32 %v1243_v17, %v1256_v27  ;;  %v1421_v17 = vld [vmem:[#allocation11] sm:$0xff] }
 0x6b9   : > { %1447 = vmatpush.msrb.mxu1 %v1421_v17 }
 0x6ba   : > { %v1258_v29 = vmul.f32 %v1257_v28, %v1257_v28  ;;  %v1280_v53 = vmul.f32 %v3509_v52, %v1257_v28  ;;  %3221 = vmatmul.msk.f32.vlgmr.msrb.gmra.mxu1 %vm907_vm0, %v4633_v19  ;;  %v896_v52 = vld [vmem:[%s780_s26] sm:$0x1]  ;;  %s5221_s26 = smov 88  }
 0x6bb   : > { %vm897_vm10 = vcmp.eq.f32.partialorder %v896_v52, 0.0  ;;  %v3236_v52 = vld [vmem:[%s5084_s9 + $0x30] sm:$0xff] }
 0x6bc   : > { %v1259_v4 = vsel %vm907_vm0, %v1258_v29, 0.0 }
 0x6bd   : > { %1260 = vadd.xlane.f32.xlu2 %v1259_v4 }
 0x730   : > { %v1261_v34 = vpop.xlane.xlu2 %1260 }
 0x731   : > { %v1262_v35 = vmul.f32 0.032258064, %v1261_v34  ;;  %v3513_v34 = vld [vmem:[#allocation16] ss:$0 sm:$0xff] }
 0x733   : > { %3560 = vrsqrt.f32 %v1262_v35  ;;  %vm1270_vm5 = vcmp.eq.f32.partialorder %v1262_v35, inf  ;;  %v1273_v48 = vand.u32 2147483648, %v1262_v35  ;;  %vm1272_vm6 = vcmp.eq.f32.partialorder %v1262_v35, 0.0 }
 0x739   : > { %v3561_v39 = vpop.eup %3560 }
 0x73a   : > { %v1264_v41 = vmul.f32 %v3561_v39, %v1262_v35 }
 0x73c   : > { %v1265_v43 = vmul.f32 %v3561_v39, %v1264_v41  ;;  %v1449_v41 = vpop.f32.mrf.mxu1 }
 0x73d   : > { %v4644_v42 = vadd.f32 %v3515_v40, %v1449_v41 }
 0x73e   : > { %v1266_v44 = vmul.f32 0.5, %v1265_v43  ;;  %v3516_v43 = vld [vmem:[#allocation10] ss:$0 sm:$0xff] }
 0x73f   : > { %1522 = vrot.lane.b32.xlu2 %v4644_v42, %s5143_s28  ;;  %3222 = vmatpush.xpose.msk.msra.mxu3 %vm934_vm1, %v4644_v42 }
 0x740   : > { %v1267_v45 = vsub.f32 1.5, %v1266_v44 }
 0x742   : > { %v1268_v46 = vmul.f32 %v3561_v39, %v1267_v45 }
 0x744   : > { %v1269_v47 = vmul.f32 %v1268_v46, %v1262_v35 }
 0x746   : > { %v1271_v49 = vsel %vm1270_vm5, %v1262_v35, %v1269_v47 }
 0x747   : > { %v1274_v50 = vsel %vm1272_vm6, %v1273_v48, %v1271_v49  ;;  %1656 = vrot.lane.b32.xlu2 %v4644_v42, %s5139_s30 }
 0x748   : > { %v1275_v51 = vadd.f32 1e-06, %v1274_v50 }
 0x74a   : > { %3562 = vrcp.f32 %v1275_v51 }
 0x750   : > { %v3563_v55 = vpop.eup %3562 }
 0x751   : > { %v1281_v56 = vmul.f32 %v3563_v55, %v1280_v53  ;;  %v4120_v53 = vmov 0.0  }
 0x753   : > { %v1285_v57 = vadd.f32 %v3510_v54, %v1281_v56  ;;  %v898_v54 = vsel %vm897_vm10, -1e+09, %v4120_v53  ;;  %v3235_v53 = vld [vmem:[%s5084_s9 + $0x28] sm:$0xff] }
 0x754   : > { %v4666_v55 = vperm.slane %v898_v54, 0  ;;  %v3234_v54 = vld [vmem:[%s5084_s9 + $0x20] sm:$0xff] }
 0x755   : > { %3218 = vmatmul.msk.f32.vlgmr.msrb.gmra.mxu3 %vm907_vm0, %v1285_v57 }
 0x799   : > { %v1523_v46 = vpop.permute.xlu2 %1522 }
 0x79a   : > { %3225 = vmatpush.xpose.msk.msra.mxu1 %vm934_vm1, %v1523_v46 }
 0x7a1   : > { %v1657_v47 = vpop.permute.xlu2 %1656 }
 0x7a2   : > { %3231 = vmatpush.xpose.msk.msrb.mxu1 %vm934_vm1, %v1657_v47 }
 0x7d8   : > { %v1314_v62 = vpop.f32.mrf.mxu3 }
 0x7d9   : > { %v1315_v63 = vadd.f32 %v3511_v61, %v1314_v62 }
 0x7db   : > { %v1317_v0 = vmax.f32 %v1315_v63, 0.0 }
 0x7dd   : > { %3219 = vmatmul.msk.f32.vlgmr.msra.gmra.mxu0 %vm1330_vm7, %v1317_v0 }
 0x85a   : > { %v1351_v2 = vpop.f32.mrf.mxu0 }
 0x85b   : > { %v1352_v3 = vadd.f32 %v3512_v1, %v1351_v2 }
 0x85d   : > { %v1354_v5 = vadd.f32 %v1352_v3, %v1285_v57 }
 0x85f   : > { %v1357_v6 = vsel %vm907_vm0, %v1354_v5, 0.0 }
 0x860   : > { %1358 = vadd.xlane.f32.xlu1 %v1357_v6 }
 0x8d3   : > { %v1359_v7 = vpop.xlane.xlu1 %1358 }
 0x8d4   : > { %v1360_v8 = vmul.f32 %v1359_v7, %v4571_v25 }
 0x8d6   : > { %v1361_v9 = vsub.f32 %v1354_v5, %v1360_v8 }
 0x8d8   : > { %v1362_v10 = vmul.f32 %v1361_v9, %v1361_v9  ;;  %v1384_v35 = vmul.f32 %v3513_v34, %v1361_v9 }
 0x8da   : > { %v1363_v11 = vsel %vm907_vm0, %v1362_v10, 0.0 }
 0x8db   : > { %1364 = vadd.xlane.f32.xlu0 %v1363_v11 }
 0x8ef   : > { %1589 = vrot.lane.b32.xlu0 %v4644_v42, %s5141_s6 }
 0x94e   : > { %v1365_v21 = vpop.xlane.xlu0 %1364 }
 0x94f   : > { %v1366_v22 = vmul.f32 0.032258064, %v1365_v21 }
 0x951   : > { %3564 = vrsqrt.f32 %v1366_v22  ;;  %vm1374_vm8 = vcmp.eq.f32.partialorder %v1366_v22, inf  ;;  %v1377_v30 = vand.u32 2147483648, %v1366_v22  ;;  %vm1376_vm9 = vcmp.eq.f32.partialorder %v1366_v22, 0.0 }
 0x957   : > { %v3565_v23 = vpop.eup %3564 }
 0x958   : > { %v1368_v24 = vmul.f32 %v3565_v23, %v1366_v22 }
 0x95a   : > { %v1369_v26 = vmul.f32 %v3565_v23, %v1368_v24 }
 0x95c   : > { %v1370_v27 = vmul.f32 0.5, %v1369_v26 }
 0x95e   : > { %v1371_v28 = vsub.f32 1.5, %v1370_v27 }
 0x960   : > { %v1372_v29 = vmul.f32 %v3565_v23, %v1371_v28 }
 0x961   : > { %v1590_v48 = vpop.permute.xlu0 %1589 }
 0x962   : > { %v1373_v4 = vmul.f32 %v1372_v29, %v1366_v22  ;;  %3228 = vmatpush.xpose.msk.msrb.mxu0 %vm934_vm1, %v1590_v48 }
 0x964   : > { %v1375_v31 = vsel %vm1374_vm8, %v1366_v22, %v1373_v4  ;;  %vm2962_vm8 = vcmask 203776  }
 0x965   : > { %v1378_v32 = vsel %vm1376_vm9, %v1377_v30, %v1375_v31 }
 0x966   : > { %v1379_v33 = vadd.f32 1e-06, %v1378_v32 }
 0x968   : > { %3566 = vrcp.f32 %v1379_v33 }
 0x96e   : > { %v3567_v37 = vpop.eup %3566 }
 0x96f   : > { %v1385_v38 = vmul.f32 %v3567_v37, %v1384_v35 }
 0x971   : > { %v4640_v39 = vadd.f32 %v3514_v36, %v1385_v38 }
 0x973   : > { %3220 = vmatmul.msk.f32.vlgmr.msra.gmra.mxu2 %vm907_vm0, %v4640_v39 }
 0x9f6   : > { %v1418_v44 = vpop.f32.mrf.mxu2 }
 0x9f7   : > { %v1419_v45 = vadd.f32 %v3516_v43, %v1418_v44 }
 0x9f9   : > { %1587 = vrot.lane.b32.xlu0 %v1419_v45, %s5141_s6  ;;  %1520 = vrot.lane.b32.xlu1 %v1419_v45, %s5143_s28  ;;  %s5226_s28 = smov 64   ;;  %s5232_s6 = smov 48  }
 0x9fa   : > { %3223 = vmatmul.msk.f32.vlgmr.msra.gmra.mxu3 %vm934_vm1, %v1419_v45 }
 0xa01   : > { %1654 = vrot.lane.b32.xlu1 %v1419_v45, %s5139_s30  ;;  %s5233_s30 = smov 40  }
 0xa6b   : > { %v1521_v49 = vpop.permute.xlu1 %1520  ;;  %v1588_v50 = vpop.permute.xlu0 %1587 }
 0xa6c   : > { %3226 = vmatmul.msk.f32.vlgmr.msra.gmra.mxu1 %vm934_vm1, %v1521_v49  ;;  %3229 = vmatmul.msk.f32.vlgmr.msrb.gmra.mxu0 %vm934_vm1, %v1588_v50 }
 0xa73   : > { %v1655_v51 = vpop.permute.xlu1 %1654 }
 0xa74   : > { %3232 = vmatmul.msk.f32.vlgmr.msrb.gmra.mxu1 %vm934_vm1, %v1655_v51  ;;  %v3237_v51 = vld [vmem:[%s5084_s9 + $0x38] sm:$0xff] }
 0xa75   : > { %1761 = vmatpush.msra.mxu0 %v3237_v51 }
 0xa77   : > { %1762 = vmatpush.msra.mxu0 %v3236_v52 }
 0xa79   : > { %1763 = vmatpush.msra.mxu0 %v3235_v53 }
 0xa7b   : > { %1764 = vmatpush.msra.mxu0 %v3234_v54 }
 0xa7d   : > { %v1475_v56 = vpop.f32.mrf.mxu3 }
 0xa7e   : > { %v1478_v57 = vmul.f32 0.35355338, %v1475_v56 }
 0xa80   : > { %v1482_v58 = vadd.f32 %v4666_v55, %v1478_v57 }
 0xa82   : > { %v1483_v59 = vsel %vm934_vm1, %v1482_v58, -inf }
 0xa83   : > { %1484 = vmax.xlane.f32.xlu2 %v1483_v59 }
 0xae9   : > { %v1545_v60 = vpop.f32.mrf.mxu1  ;;  %v1612_v61 = vpop.f32.mrf.mxu0 }
 0xaea   : > { %v1548_v62 = vmul.f32 0.35355338, %v1545_v60  ;;  %v1615_v63 = vmul.f32 0.35355338, %v1612_v61 }
 0xaec   : > { %v1616_v0 = vadd.f32 %v1615_v63, %v4666_v55  ;;  %v1549_v1 = vadd.f32 %v1548_v62, %v4666_v55  ;;  %v3517_v62 = vld [vmem:[%s5085_s10 + $0x1] ss:$0 sm:$0xff] }
 0xaee   : > { %v1617_v2 = vsel %vm934_vm1, %v1616_v0, -inf  ;;  %v1550_v3 = vsel %vm934_vm1, %v1549_v1, -inf }
 0xaef   : > { %1618 = vmax.xlane.f32.xlu1 %v1617_v2  ;;  %1551 = vmax.xlane.f32.xlu0 %v1550_v3 }
 0xaf1   : > { %v1679_v5 = vpop.f32.mrf.mxu1 }
 0xaf2   : > { %v1682_v6 = vmul.f32 0.35355338, %v1679_v5 }
 0xaf4   : > { %v1683_v7 = vadd.f32 %v1682_v6, %v4666_v55 }
 0xaf6   : > { %v1684_v8 = vsel %vm934_vm1, %v1683_v7, -inf  ;;  %v1485_v9 = vpop.xlane.xlu2 %1484 }
 0xaf7   : > { %1685 = vmax.xlane.f32.xlu2 %v1684_v8  ;;  %v1486_v10 = vsub.f32 %v1482_v58, %v1485_v9  ;;  %v3244_v9 = vld [vmem:[%s5213_s17 + $0x38] sm:$0xff] }
 0xaf9   : > { %v1487_v11 = vmul.f32 1.442695, %v1486_v10  ;;  %v3243_v10 = vld [vmem:[%s5213_s17 + $0x30] sm:$0xff] }
 0xafb   : > { %3568 = vpow2.f32 %v1487_v11  ;;  %v3241_v11 = vld [vmem:[%s5213_s17 + $0x20] sm:$0xff] }
 0xb01   : > { %v3569_v12 = vpop.eup %3568 }
 0xb02   : > { %v1489_v13 = vsel %vm934_vm1, %v3569_v12, 0.0 }
 0xb03   : > { %1494 = vrot.lane.b32.xlu0 %v4644_v42, %s5145_s18 }
 0xb2d   : > { %1490 = vadd.xlane.f32.xlu0 %v1489_v13 }
 0xb41   : > { %1695 = vrot.lane.b32.xlu0 %v4644_v42, %s5220_s0 }
 0xb62   : > { %v1619_v14 = vpop.xlane.xlu1 %1618  ;;  %v1552_v15 = vpop.xlane.xlu0 %1551 }
 0xb63   : > { %v1620_v16 = vsub.f32 %v1616_v0, %v1619_v14  ;;  %v1553_v17 = vsub.f32 %v1549_v1, %v1552_v15  ;;  %v3254_v14 = vld [vmem:[%s5215_s24 + $0x78] sm:$0xff]  ;;  %v3253_v15 = vld [vmem:[%s5215_s24 + $0x70] sm:$0xff] }
 0xb64   : > { %1866 = vmatpush.msra.mxu1 %v3254_v14 }
 0xb65   : > { %v1621_v18 = vmul.f32 1.442695, %v1620_v16  ;;  %v1554_v20 = vmul.f32 1.442695, %v1553_v17  ;;  %v3252_v16 = vld [vmem:[%s5215_s24 + $0x68] sm:$0xff] }
 0xb66   : > { %1867 = vmatpush.msra.mxu1 %v3253_v15  ;;  %v3524_v15 = vld [vmem:[#allocation8 + $0x1] ss:$0 sm:$0xff] }
 0xb67   : > { %3570 = vpow2.f32 %v1621_v18  ;;  %v3251_v18 = vld [vmem:[%s5215_s24 + $0x60] sm:$0xff] }
 0xb68   : > { %3572 = vpow2.f32 %v1554_v20  ;;  %1868 = vmatpush.msra.mxu1 %v3252_v16 }
 0xb6a   : > { %v1686_v21 = vpop.xlane.xlu2 %1685  ;;  %1869 = vmatpush.msra.mxu1 %v3251_v18 }
 0xb6b   : > { %v1687_v22 = vsub.f32 %v1683_v7, %v1686_v21  ;;  %v3250_v21 = vld [vmem:[%s5215_s24 + $0x58] sm:$0xff] }
 0xb6c   : > { %1870 = vmatpush.msra.mxu1 %v3250_v21 }
 0xb6d   : > { %v3571_v23 = vpop.eup %3570  ;;  %v1688_v24 = vmul.f32 1.442695, %v1687_v22 }
 0xb6e   : > { %v3573_v26 = vpop.eup %3572  ;;  %v1623_v27 = vsel %vm934_vm1, %v3571_v23, 0.0 }
 0xb6f   : > { %3574 = vpow2.f32 %v1688_v24  ;;  %v1556_v28 = vsel %vm934_vm1, %v3573_v26, 0.0  ;;  %1624 = vadd.xlane.f32.xlu2 %v1623_v27 }
 0xb70   : > { %1557 = vadd.xlane.f32.xlu1 %v1556_v28 }
 0xb75   : > { %v3575_v29 = vpop.eup %3574  ;;  %v1495_v4 = vpop.permute.xlu0 %1494 }
 0xb76   : > { %1515 = vmatpush.msrb.mxu2 %v1495_v4  ;;  %v1690_v30 = vsel %vm934_vm1, %v3575_v29, 0.0 }
 0xb78   : > { %1691 = vadd.xlane.f32.xlu1 %v1690_v30 }
 0xb87   : > { %1561 = vrot.lane.b32.xlu2 %v4644_v42, %s5221_s26 }
 0xb91   : > { %1628 = vrot.lane.b32.xlu1 %v4644_v42, %s5222_s15 }
 0xba0   : > { %v1491_v31 = vpop.xlane.xlu0 %1490 }
 0xba1   : > { %3576 = vrcp.f32 %v1491_v31  ;;  %v3518_v31 = vld [vmem:[%s5216_s21 + $0x1] ss:$0 sm:$0xff] }
 0xba7   : > { %v3577_v32 = vpop.eup %3576 }
 0xba8   : > { %v1493_v33 = vmul.f32 %v3577_v32, %v3569_v12 }
 0xbaa   : > { %3224 = vmatmul.msk.f32.vlgmr.msrb.gmra.mxu2 %vm934_vm1, %v1493_v33  ;;  %v3519_v33 = vld [vmem:[#allocation14 + $0x1] ss:$0 sm:$0xff] }
 0xbb3   : > { %v1696_v38 = vpop.permute.xlu0 %1695 }
 0xbe2   : > { %v1625_v34 = vpop.xlane.xlu2 %1624 }
 0xbe3   : > { %v1558_v35 = vpop.xlane.xlu1 %1557 }
 0xbe4   : > { %3578 = vrcp.f32 %v1558_v35 }
 0xbea   : > { %v3579_v36 = vpop.eup %3578  ;;  %v1562_v37 = vpop.permute.xlu2 %1561 }
 0xbeb   : > { %v1560_v40 = vmul.f32 %v3579_v36, %v3573_v26  ;;  %v1692_v41 = vpop.xlane.xlu1 %1691  ;;  %1582 = vmatpush.msrb.mxu3 %v1562_v37  ;;  %v3249_v37 = vld [vmem:[%s5215_s24 + $0x50] sm:$0xff] }
 0xbec   : > { %3580 = vrcp.f32 %v1692_v41  ;;  %1871 = vmatpush.msra.mxu1 %v3249_v37  ;;  %v3520_v41 = vld [vmem:[%s5218_s23 + $0x1] ss:$0 sm:$0xff] }
 0xbed   : > { %1716 = vmatpush.msra.mxu3 %v1696_v38  ;;  %3582 = vrcp.f32 %v1625_v34  ;;  %v3248_v38 = vld [vmem:[%s5215_s24 + $0x48] sm:$0xff] }
 0xbee   : > { %3227 = vmatmul.msk.f32.vlgmr.msrb.gmra.mxu3 %vm934_vm1, %v1560_v40  ;;  %1872 = vmatpush.msra.mxu1 %v3248_v38  ;;  %v3247_v40 = vld [vmem:[%s5215_s24 + $0x40] sm:$0xff] }
 0xbf0   : > { %1873 = vmatpush.msra.mxu1 %v3247_v40 }
 0xbf2   : > { %v3581_v42 = vpop.eup %3580 }
 0xbf3   : > { %v1694_v43 = vmul.f32 %v3581_v42, %v3575_v29  ;;  %v3583_v44 = vpop.eup %3582 }
 0xbf4   : > { %v1627_v45 = vmul.f32 %v3583_v44, %v3571_v23 }
 0xbf6   : > { %3233 = vmatmul.msk.f32.vlgmr.msra.gmra.mxu3 %vm934_vm1, %v1694_v43 }
 0xc03   : > { %v1629_v46 = vpop.permute.xlu1 %1628 }
 0xc04   : > { %1649 = vmatpush.msra.mxu2 %v1629_v46 }
 0xc05   : > { %3230 = vmatmul.msk.f32.vlgmr.msra.gmra.mxu2 %vm934_vm1, %v1627_v45  ;;  %v3521_v45 = vld [vmem:[#allocation19 + $0x1] ss:$0 sm:$0xff] }
 0xc06   : > { %1832 = vmatpush.msrb.mxu2 %v3244_v9 }
 0xc08   : > { %1833 = vmatpush.msrb.mxu2 %v3243_v10  ;;  %v3522_v10 = vld [vmem:[#allocation16 + $0x1] ss:$0 sm:$0xff] }
 0xc2d   : > { %v1517_v49 = vpop.f32.mrf.mxu2 }
 0xc71   : > { %v1584_v47 = vpop.f32.mrf.mxu3 }
 0xc72   : > { %1722 = vrot.lane.b32.xlu0 %v1584_v47, %s5223_s29 }
 0xc79   : > { %v1718_v48 = vpop.f32.mrf.mxu3 }
 0xc7a   : > { %1730 = vrot.lane.b32.xlu0 %v1718_v48, %s5224_s7 }
 0xc88   : > { %v1651_v50 = vpop.f32.mrf.mxu2 }
 0xc89   : > { %1726 = vrot.lane.b32.xlu2 %v1651_v50, %s5225_s12 }
 0xce3   : > { %v1727_v58 = vpop.permute.xlu2 %1726 }
 0xce4   : > { %v1723_v56 = vpop.permute.xlu0 %1722 }
 0xce5   : > { %v1733_v57 = vsel %vm934_vm1, %v1517_v49, %v1723_v56  ;;  %v3259_v56 = vld [vmem:[%s5211_s13 + $0x38] sm:$0xff] }
 0xce6   : > { %v1734_v59 = vsel %vm1208_vm2, %v1733_v57, %v1727_v58  ;;  %v3258_v57 = vld [vmem:[%s5211_s13 + $0x30] sm:$0xff]  ;;  %1941 = vmatpush.msrb.mxu3 %v3259_v56  ;;  %v3257_v58 = vld [vmem:[%s5211_s13 + $0x28] sm:$0xff] }
 0xce8   : > { %1942 = vmatpush.msrb.mxu3 %v3258_v57 }
 0xcea   : > { %1943 = vmatpush.msrb.mxu3 %v3257_v58 }
 0xcec   : > { %v1731_v60 = vpop.permute.xlu0 %1730 }
 0xced   : > { %v1735_v61 = vsel %vm1210_vm3, %v1734_v59, %v1731_v60  ;;  %v3256_v59 = vld [vmem:[%s5211_s13 + $0x20] sm:$0xff] }
 0xcee   : > { %3239 = vmatmul.msk.f32.vlgmr.msra.gmra.mxu0 %vm907_vm0, %v1735_v61  ;;  %1944 = vmatpush.msrb.mxu3 %v3256_v59 }
 0xd6b   : > { %v1766_v63 = vpop.f32.mrf.mxu0 }
 0xd6c   : > { %v1767_v0 = vadd.f32 %v3517_v62, %v1766_v63 }
 0xd6e   : > { %v1769_v1 = vadd.f32 %v1767_v0, %v4640_v39  ;;  %v3242_v39 = vld [vmem:[%s5213_s17 + $0x28] sm:$0xff] }
 0xd6f   : > { %1834 = vmatpush.msrb.mxu2 %v3242_v39 }
 0xd70   : > { %v1774_v2 = vsel %vm907_vm0, %v1769_v1, 0.0 }
 0xd71   : > { %1775 = vadd.xlane.f32.xlu1 %v1774_v2  ;;  %1835 = vmatpush.msrb.mxu2 %v3241_v11  ;;  %v3523_v11 = vld [vmem:[#allocation17 + $0x1] ss:$0 sm:$0xff] }
 0xde4   : > { %v1776_v3 = vpop.xlane.xlu1 %1775 }
 0xde5   : > { %v1777_v5 = vmul.f32 %v1776_v3, %v4571_v25 }
 0xde7   : > { %v1778_v6 = vsub.f32 %v1769_v1, %v1777_v5 }
 0xde9   : > { %v1779_v7 = vmul.f32 %v1778_v6, %v1778_v6  ;;  %v1801_v32 = vmul.f32 %v3518_v31, %v1778_v6 }
 0xdeb   : > { %v1780_v8 = vsel %vm907_vm0, %v1779_v7, 0.0 }
 0xdec   : > { %1781 = vadd.xlane.f32.xlu2 %v1780_v8 }
 0xe5f   : > { %v1782_v12 = vpop.xlane.xlu2 %1781 }
 0xe60   : > { %v1783_v13 = vmul.f32 0.032258064, %v1782_v12 }
 0xe62   : > { %3584 = vrsqrt.f32 %v1783_v13  ;;  %vm1791_vm11 = vcmp.eq.f32.partialorder %v1783_v13, inf  ;;  %v1794_v28 = vand.u32 2147483648, %v1783_v13  ;;  %vm1793_vm12 = vcmp.eq.f32.partialorder %v1783_v13, 0.0 }
 0xe68   : > { %v3585_v17 = vpop.eup %3584 }
 0xe69   : > { %v1785_v20 = vmul.f32 %v3585_v17, %v1783_v13 }
 0xe6b   : > { %v1786_v22 = vmul.f32 %v3585_v17, %v1785_v20 }
 0xe6d   : > { %v1787_v23 = vmul.f32 0.5, %v1786_v22 }
 0xe6f   : > { %v1788_v24 = vsub.f32 1.5, %v1787_v23 }
 0xe71   : > { %v1789_v26 = vmul.f32 %v3585_v17, %v1788_v24 }
 0xe73   : > { %v1790_v27 = vmul.f32 %v1789_v26, %v1783_v13 }
 0xe75   : > { %v1792_v29 = vsel %vm1791_vm11, %v1783_v13, %v1790_v27 }
 0xe76   : > { %v1795_v4 = vsel %vm1793_vm12, %v1794_v28, %v1792_v29 }
 0xe77   : > { %v1796_v30 = vadd.f32 1e-06, %v1795_v4 }
 0xe79   : > { %3586 = vrcp.f32 %v1796_v30 }
 0xe7f   : > { %v3587_v34 = vpop.eup %3586 }
 0xe80   : > { %v1802_v35 = vmul.f32 %v3587_v34, %v1801_v32 }
 0xe82   : > { %v1806_v36 = vadd.f32 %v3519_v33, %v1802_v35 }
 0xe84   : > { %3246 = vmatmul.msk.f32.vlgmr.msrb.gmra.mxu2 %vm907_vm0, %v1806_v36 }
 0xf07   : > { %v1837_v42 = vpop.f32.mrf.mxu2 }
 0xf08   : > { %v1838_v43 = vadd.f32 %v3520_v41, %v1837_v42 }
 0xf0a   : > { %v1840_v44 = vmax.f32 %v1838_v43, 0.0 }
 0xf0c   : > { %3255 = vmatmul.msk.f32.vlgmr.msra.gmra.mxu1 %vm1330_vm7, %v1840_v44 }
 0xf89   : > { %v1875_v46 = vpop.f32.mrf.mxu1 }
 0xf8a   : > { %v1876_v47 = vadd.f32 %v3521_v45, %v1875_v46 }
 0xf8c   : > { %v1878_v48 = vadd.f32 %v1876_v47, %v1806_v36 }
 0xf8e   : > { %v1883_v49 = vsel %vm907_vm0, %v1878_v48, 0.0 }
 0xf8f   : > { %1884 = vadd.xlane.f32.xlu0 %v1883_v49 }
0x1002   : > { %v1885_v50 = vpop.xlane.xlu0 %1884 }
0x1003   : > { %v1886_v51 = vmul.f32 %v1885_v50, %v4571_v25 }
0x1005   : > { %v1887_v52 = vsub.f32 %v1878_v48, %v1886_v51 }
0x1007   : > { %v1888_v53 = vmul.f32 %v1887_v52, %v1887_v52  ;;  %v1910_v39 = vmul.f32 %v3522_v10, %v1887_v52 }
0x1009   : > { %v1889_v54 = vsel %vm907_vm0, %v1888_v53, 0.0 }
0x100a   : > { %1890 = vadd.xlane.f32.xlu1 %v1889_v54 }
0x107d   : > { %v1891_v60 = vpop.xlane.xlu1 %1890 }
0x107e   : > { %v1892_v61 = vmul.f32 0.032258064, %v1891_v60 }
0x1080   : > { %3588 = vrsqrt.f32 %v1892_v61  ;;  %vm1900_vm13 = vcmp.eq.f32.partialorder %v1892_v61, inf  ;;  %v1903_v6 = vand.u32 2147483648, %v1892_v61  ;;  %vm1902_vm14 = vcmp.eq.f32.partialorder %v1892_v61, 0.0 }
0x1086   : > { %v3589_v62 = vpop.eup %3588 }
0x1087   : > { %v1894_v63 = vmul.f32 %v3589_v62, %v1892_v61 }
0x1089   : > { %v1895_v0 = vmul.f32 %v3589_v62, %v1894_v63 }
0x108b   : > { %v1896_v1 = vmul.f32 0.5, %v1895_v0 }
0x108d   : > { %v1897_v2 = vsub.f32 1.5, %v1896_v1 }
0x108f   : > { %v1898_v3 = vmul.f32 %v3589_v62, %v1897_v2 }
0x1091   : > { %v1899_v5 = vmul.f32 %v1898_v3, %v1892_v61 }
0x1093   : > { %v1901_v7 = vsel %vm1900_vm13, %v1892_v61, %v1899_v5 }
0x1094   : > { %v1904_v8 = vsel %vm1902_vm14, %v1903_v6, %v1901_v7 }
0x1095   : > { %v1905_v9 = vadd.f32 1e-06, %v1904_v8 }
0x1097   : > { %3590 = vrcp.f32 %v1905_v9 }
0x109d   : > { %v3591_v12 = vpop.eup %3590 }
0x109e   : > { %v1911_v13 = vmul.f32 %v3591_v12, %v1910_v39 }
0x10a0   : > { %v4777_v14 = vadd.f32 %v3523_v11, %v1911_v13 }
0x10a2   : > { %3260 = vmatmul.msk.f32.vlgmr.msrb.gmra.mxu3 %vm907_vm0, %v4777_v14 }
0x1125   : > { %v1946_v16 = vpop.f32.mrf.mxu3 }
0x1126   : > { %v4781_v17 = vadd.f32 %v3524_v15, %v1946_v16 }
0x1128   : > { %1988 = vrot.lane.b32.xlu1 %v4781_v17, %s5226_s28  ;;  %1950 = vrot.lane.b32.xlu2 %v4781_v17, %s5227_s14 }
0x1130   : > { %2014 = vrot.lane.b32.xlu2 %v4781_v17, %s5228_s11 }
0x1138   : > { %2082 = vrot.lane.b32.xlu2 %v4781_v17, %s5222_s15 }
0x1140   : > { %2080 = vrot.lane.b32.xlu2 %v4781_v17, %s5229_s3 }
0x1182   : > { %v1951_v18 = vpop.permute.xlu2 %1950 }
0x1183   : > { %3261 = vmatpush.xpose.msk.msrb.mxu0 %vm934_vm1, %v1951_v18  ;;  %v3275_v18 = vld [vmem:[%s5084_s9 + $0x50] sm:$0xff] }
0x1186   : > { %3262 = vmatmul.msk.f32.vlgmr.msrb.gmra.mxu0 %vm934_vm1, %v4781_v17 }
0x118a   : > { %v2015_v20 = vpop.permute.xlu2 %2014 }
0x1192   : > { %v2083_v22 = vpop.permute.xlu2 %2082 }
0x119a   : > { %v1989_v21 = vpop.permute.xlu1 %1988  ;;  %v2081_v36 = vpop.permute.xlu2 %2080 }
0x119b   : > { %2009 = vmatpush.msra.mxu2 %v1989_v21  ;;  %v3273_v21 = vld [vmem:[%s5084_s9 + $0x40] sm:$0xff] }
0x119d   : > { %3267 = vmatpush.xpose.msk.msrb.mxu2 %vm934_vm1, %v2083_v22 }
0x1203   : > { %v1973_v23 = vpop.f32.mrf.mxu0 }
0x1204   : > { %v1976_v24 = vmul.f32 0.35355338, %v1973_v23 }
0x1206   : > { %v1977_v26 = vsel %vm934_vm1, %v1976_v24, -inf }
0x1207   : > { %1978 = vmax.xlane.f32.xlu0 %v1977_v26 }
0x121b   : > { %2016 = vrot.lane.b32.xlu0 %v4781_v17, %s5221_s26 }
0x1223   : > { %2148 = vrot.lane.b32.xlu0 %v4781_v17, %s5220_s0 }
0x127a   : > { %v1979_v27 = vpop.xlane.xlu0 %1978 }
0x127b   : > { %v1980_v28 = vsub.f32 %v1976_v24, %v1979_v27 }
0x127d   : > { %v1981_v29 = vmul.f32 1.442695, %v1980_v28 }
0x127f   : > { %3592 = vpow2.f32 %v1981_v29  ;;  %v3525_v29 = vld [vmem:[%s5085_s10 + $0x2] ss:$0 sm:$0xff] }
0x1285   : > { %v3593_v4 = vpop.eup %3592 }
0x1286   : > { %v1983_v30 = vsel %vm934_vm1, %v3593_v4, 0.0 }
0x1287   : > { %1984 = vadd.xlane.f32.xlu1 %v1983_v30 }
0x128d   : > { %v2017_v31 = vpop.permute.xlu0 %2016 }
0x128e   : > { %3264 = vmatpush.xpose.msk.msra.mxu3 %vm934_vm1, %v2017_v31 }
0x1291   : > { %3265 = vmatmul.msk.f32.vlgmr.msra.gmra.mxu3 %vm934_vm1, %v2015_v20  ;;  %v3274_v20 = vld [vmem:[%s5084_s9 + $0x48] sm:$0xff] }
0x1295   : > { %v2149_v32 = vpop.permute.xlu0 %2148 }
0x1296   : > { %3270 = vmatpush.xpose.msk.msrb.mxu3 %vm934_vm1, %v2149_v32 }
0x12a0   : > { %2146 = vrot.lane.b32.xlu1 %v4781_v17, %s5230_s8 }
0x12fa   : > { %v1985_v33 = vpop.xlane.xlu1 %1984 }
0x12fb   : > { %3594 = vrcp.f32 %v1985_v33 }
0x1301   : > { %v3595_v34 = vpop.eup %3594 }
0x1302   : > { %v1987_v35 = vmul.f32 %v3595_v34, %v3593_v4 }
0x1304   : > { %3263 = vmatmul.msk.f32.vlgmr.msra.gmra.mxu2 %vm934_vm1, %v1987_v35 }
0x130c   : > { %3268 = vmatmul.msk.f32.vlgmr.msrb.gmra.mxu2 %vm934_vm1, %v2081_v36 }
0x1312   : > { %v2147_v37 = vpop.permute.xlu1 %2146 }
0x1313   : > { %3271 = vmatmul.msk.f32.vlgmr.msrb.gmra.mxu3 %vm934_vm1, %v2147_v37 }
0x1314   : > { %v2039_v38 = vpop.f32.mrf.mxu3 }
0x1315   : > { %v2042_v40 = vmul.f32 0.35355338, %v2039_v38  ;;  %v3283_v38 = vld [vmem:[%s5213_s17 + $0x58] sm:$0xff] }
0x1317   : > { %v2043_v41 = vsel %vm934_vm1, %v2042_v40, -inf }
0x1318   : > { %2044 = vmax.xlane.f32.xlu0 %v2043_v41  ;;  %v3280_v41 = vld [vmem:[%s5213_s17 + $0x40] sm:$0xff] }
0x1387   : > { %v4812_v42 = vpop.f32.mrf.mxu2 }
0x138b   : > { %v2045_v43 = vpop.xlane.xlu0 %2044 }
0x138c   : > { %v2046_v44 = vsub.f32 %v2042_v40, %v2045_v43  ;;  %v3282_v40 = vld [vmem:[%s5213_s17 + $0x50] sm:$0xff] }
0x138e   : > { %v2047_v45 = vmul.f32 1.442695, %v2046_v44  ;;  %v3293_v44 = vld [vmem:[%s5215_s24 + $0xb8] sm:$0xff] }
0x138f   : > { %v2105_v46 = vpop.f32.mrf.mxu2  ;;  %2357 = vmatpush.msra.mxu3 %v3293_v44  ;;  %v3531_v44 = vld [vmem:[#allocation17 + $0x2] ss:$0 sm:$0xff] }
0x1390   : > { %3596 = vpow2.f32 %v2047_v45  ;;  %v2108_v47 = vmul.f32 0.35355338, %v2105_v46  ;;  %v3292_v45 = vld [vmem:[%s5215_s24 + $0xb0] sm:$0xff]  ;;  %v3291_v46 = vld [vmem:[%s5215_s24 + $0xa8] sm:$0xff] }
0x1391   : > { %2358 = vmatpush.msra.mxu3 %v3292_v45 }
0x1392   : > { %v2109_v48 = vsel %vm934_vm1, %v2108_v47, -inf }
0x1393   : > { %2110 = vmax.xlane.f32.xlu2 %v2109_v48  ;;  %v3290_v48 = vld [vmem:[%s5215_s24 + $0xa0] sm:$0xff]  ;;  %2359 = vmatpush.msra.mxu3 %v3291_v46 }
0x1395   : > { %2360 = vmatpush.msra.mxu3 %v3290_v48  ;;  %v3532_v48 = vld [vmem:[#allocation13 + $0x1] ss:$0 sm:$0xff] }
0x1396   : > { %v3597_v49 = vpop.eup %3596  ;;  %v2171_v50 = vpop.f32.mrf.mxu3 }
0x1397   : > { %v2174_v51 = vmul.f32 0.35355338, %v2171_v50  ;;  %v2049_v52 = vsel %vm934_vm1, %v3597_v49, 0.0  ;;  %v3289_v50 = vld [vmem:[%s5215_s24 + $0x98] sm:$0xff] }
0x1398   : > { %2050 = vadd.xlane.f32.xlu0 %v2049_v52  ;;  %2361 = vmatpush.msra.mxu3 %v3289_v50 }
0x1399   : > { %v2175_v53 = vsel %vm934_vm1, %v2174_v51, -inf }
0x139a   : > { %2176 = vmax.xlane.f32.xlu1 %v2175_v53 }
0x13ac   : > { %2054 = vrot.lane.b32.xlu0 %v4781_v17, %s5231_s2 }
0x1406   : > { %v2111_v54 = vpop.xlane.xlu2 %2110 }
0x1407   : > { %v2112_v56 = vsub.f32 %v2108_v47, %v2111_v54 }
0x1409   : > { %v2113_v57 = vmul.f32 1.442695, %v2112_v56 }
0x140b   : > { %3598 = vpow2.f32 %v2113_v57  ;;  %v2051_v62 = vpop.xlane.xlu0 %2050 }
0x140d   : > { %v2177_v58 = vpop.xlane.xlu1 %2176 }
0x140e   : > { %v2178_v59 = vsub.f32 %v2174_v51, %v2177_v58 }
0x1410   : > { %v2179_v60 = vmul.f32 1.442695, %v2178_v59 }
0x1411   : > { %v3599_v61 = vpop.eup %3598 }
0x1412   : > { %3600 = vpow2.f32 %v2179_v60  ;;  %v2115_v63 = vsel %vm934_vm1, %v3599_v61, 0.0 }
0x1413   : > { %2116 = vadd.xlane.f32.xlu2 %v2115_v63  ;;  %3602 = vrcp.f32 %v2051_v62  ;;  %v3527_v63 = vld [vmem:[#allocation14 + $0x2] ss:$0 sm:$0xff] }
0x1418   : > { %v3601_v0 = vpop.eup %3600 }
0x1419   : > { %v2181_v1 = vsel %vm934_vm1, %v3601_v0, 0.0  ;;  %v3603_v2 = vpop.eup %3602 }
0x141a   : > { %2182 = vadd.xlane.f32.xlu1 %v2181_v1  ;;  %v2053_v3 = vmul.f32 %v3603_v2, %v3597_v49 }
0x141e   : > { %v2055_v5 = vpop.permute.xlu0 %2054 }
0x141f   : > { %2075 = vmatpush.msra.mxu0 %v2055_v5  ;;  %v3287_v5 = vld [vmem:[%s5215_s24 + $0x88] sm:$0xff] }
0x1420   : > { %3266 = vmatmul.msk.f32.vlgmr.msra.gmra.mxu0 %vm934_vm1, %v2053_v3  ;;  %v3288_v3 = vld [vmem:[%s5215_s24 + $0x90] sm:$0xff] }
0x1421   : > { %2362 = vmatpush.msra.mxu3 %v3288_v3 }
0x1423   : > { %2363 = vmatpush.msra.mxu3 %v3287_v5 }
0x142b   : > { %2120 = vrot.lane.b32.xlu2 %v4781_v17, %s5232_s6 }
0x1433   : > { %2186 = vrot.lane.b32.xlu1 %v4781_v17, %s5233_s30  ;;  %v3276_v17 = vld [vmem:[%s5084_s9 + $0x58] sm:$0xff] }
0x1434   : > { %2252 = vmatpush.msra.mxu2 %v3276_v17  ;;  %v2443_v17 = vld [vmem:[#allocation11 + $0x30] sm:$0xff] }
0x1436   : > { %2253 = vmatpush.msra.mxu2 %v3275_v18 }
0x1438   : > { %2254 = vmatpush.msra.mxu2 %v3274_v20 }
0x143a   : > { %2255 = vmatpush.msra.mxu2 %v3273_v21 }
0x1486   : > { %v2117_v6 = vpop.xlane.xlu2 %2116 }
0x1487   : > { %3604 = vrcp.f32 %v2117_v6  ;;  %v3286_v6 = vld [vmem:[%s5215_s24 + $0x80] sm:$0xff] }
0x1488   : > { %2364 = vmatpush.msra.mxu3 %v3286_v6 }
0x148d   : > { %v3605_v7 = vpop.eup %3604  ;;  %v2183_v10 = vpop.xlane.xlu1 %2182 }
0x148e   : > { %v2119_v8 = vmul.f32 %v3605_v7, %v3599_v61  ;;  %v2121_v9 = vpop.permute.xlu2 %2120  ;;  %3606 = vrcp.f32 %v2183_v10  ;;  %v3526_v61 = vld [vmem:[%s5216_s21 + $0x2] ss:$0 sm:$0xff] }
0x148f   : > { %2141 = vmatpush.msrb.mxu1 %v2121_v9  ;;  %v3528_v7 = vld [vmem:[%s5218_s23 + $0x2] ss:$0 sm:$0xff] }
0x1490   : > { %3269 = vmatmul.msk.f32.vlgmr.msrb.gmra.mxu1 %vm934_vm1, %v2119_v8 }
0x1491   : > { %2323 = vmatpush.msra.mxu1 %v3283_v38 }
0x1493   : > { %2324 = vmatpush.msra.mxu1 %v3282_v40 }
0x1494   : > { %v3607_v11 = vpop.eup %3606 }
0x1495   : > { %v2185_v12 = vmul.f32 %v3607_v11, %v3601_v0 }
0x149d   : > { %v2077_v39 = vpop.f32.mrf.mxu0 }
0x149e   : > { %2213 = vrot.lane.b32.xlu0 %v2077_v39, %s5223_s29  ;;  %v3529_v39 = vld [vmem:[#allocation19 + $0x2] ss:$0 sm:$0xff] }
0x14a5   : > { %v2187_v13 = vpop.permute.xlu1 %2186 }
0x14a6   : > { %2207 = vmatpush.msrb.mxu0 %v2187_v13 }
0x14a7   : > { %3272 = vmatmul.msk.f32.vlgmr.msrb.gmra.mxu0 %vm934_vm1, %v2185_v12 }
0x150d   : > { %v2143_v15 = vpop.f32.mrf.mxu1 }
0x150e   : > { %2217 = vrot.lane.b32.xlu2 %v2143_v15, %s5225_s12 }
0x1510   : > { %v2214_v22 = vpop.permute.xlu0 %2213 }
0x1511   : > { %v2224_v24 = vsel %vm934_vm1, %v4812_v42, %v2214_v22 }
0x1524   : > { %v2209_v16 = vpop.f32.mrf.mxu0 }
0x1525   : > { %2221 = vrot.lane.b32.xlu0 %v2209_v16, %s5224_s7  ;;  %v2444_v16 = vld [vmem:[#allocation11 + $0x38] sm:$0xff] }
0x1526   : > { %2462 = vmatpush.msrb.mxu2 %v2444_v16 }
0x1528   : > { %2463 = vmatpush.msrb.mxu2 %v2443_v17 }
0x1568   : > { %v2218_v23 = vpop.permute.xlu2 %2217 }
0x1569   : > { %v2225_v26 = vsel %vm1208_vm2, %v2224_v24, %v2218_v23  ;;  %v2442_v24 = vld [vmem:[#allocation11 + $0x28] sm:$0xff] }
0x156a   : > { %2464 = vmatpush.msrb.mxu2 %v2442_v24 }
0x1597   : > { %v2222_v27 = vpop.permute.xlu0 %2221 }
0x1598   : > { %v2226_v28 = vsel %vm1210_vm3, %v2225_v26, %v2222_v27  ;;  %v2441_v26 = vld [vmem:[#allocation11 + $0x20] sm:$0xff]  ;;  %v3298_v27 = vld [vmem:[%s5219_s1 + $0x38] sm:$0xff] }
0x1599   : > { %3278 = vmatmul.msk.f32.vlgmr.msra.gmra.mxu2 %vm907_vm0, %v2226_v28  ;;  %v3297_v28 = vld [vmem:[%s5219_s1 + $0x30] sm:$0xff]  ;;  %2432 = vmatpush.msra.mxu0 %v3298_v27 }
0x159a   : > { %2465 = vmatpush.msrb.mxu2 %v2441_v26 }
0x159b   : > { %2433 = vmatpush.msra.mxu0 %v3297_v28 }
0x15a1   : > { %3300 = vmatmul.msk.f32.vlgmr.msrb.gmra.mxu2 %vm907_vm0, %v4633_v19 }
0x161c   : > { %v2257_v4 = vpop.f32.mrf.mxu2 }
0x161d   : > { %v2258_v30 = vadd.f32 %v3525_v29, %v2257_v4  ;;  %v3296_v29 = vld [vmem:[%s5219_s1 + $0x28] sm:$0xff]  ;;  %v3295_v4 = vld [vmem:[%s5219_s1 + $0x20] sm:$0xff] }
0x161e   : > { %2434 = vmatpush.msra.mxu0 %v3296_v29 }
0x161f   : > { %v2260_v31 = vadd.f32 %v2258_v30, %v4777_v14  ;;  %v3281_v14 = vld [vmem:[%s5213_s17 + $0x48] sm:$0xff] }
0x1620   : > { %2325 = vmatpush.msra.mxu1 %v3281_v14  ;;  %2435 = vmatpush.msra.mxu0 %v3295_v4 }
0x1621   : > { %v2265_v32 = vsel %vm907_vm0, %v2260_v31, 0.0 }
0x1622   : > { %2266 = vadd.xlane.f32.xlu1 %v2265_v32  ;;  %2326 = vmatpush.msra.mxu1 %v3280_v41 }
0x1695   : > { %v2267_v33 = vpop.xlane.xlu1 %2266 }
0x1696   : > { %v2268_v34 = vmul.f32 %v2267_v33, %v4571_v25 }
0x1698   : > { %v2269_v35 = vsub.f32 %v2260_v31, %v2268_v34 }
0x169a   : > { %v2270_v36 = vmul.f32 %v2269_v35, %v2269_v35  ;;  %v2292_v62 = vmul.f32 %v3526_v61, %v2269_v35 }
0x169c   : > { %v2271_v37 = vsel %vm907_vm0, %v2270_v36, 0.0 }
0x169d   : > { %2272 = vadd.xlane.f32.xlu2 %v2271_v37 }
0x1710   : > { %v2273_v42 = vpop.xlane.xlu2 %2272 }
0x1711   : > { %v2274_v43 = vmul.f32 0.032258064, %v2273_v42  ;;  %v3530_v42 = vld [vmem:[#allocation16 + $0x2] ss:$0 sm:$0xff] }
0x1713   : > { %3608 = vrsqrt.f32 %v2274_v43  ;;  %vm2282_vm15 = vcmp.eq.f32.partialorder %v2274_v43, inf  ;;  %v2285_v57 = vand.u32 2147483648, %v2274_v43  ;;  %vm2284_vm4 = vcmp.eq.f32.partialorder %v2274_v43, 0.0 }
0x1719   : > { %v3609_v47 = vpop.eup %3608 }
0x171a   : > { %v2276_v49 = vmul.f32 %v3609_v47, %v2274_v43 }
0x171c   : > { %v2277_v51 = vmul.f32 %v3609_v47, %v2276_v49  ;;  %v2467_v49 = vpop.f32.mrf.mxu2 }
0x171d   : > { %v4920_v50 = vadd.f32 %v3532_v48, %v2467_v49 }
0x171e   : > { %v2278_v52 = vmul.f32 0.5, %v2277_v51  ;;  %v3533_v51 = vld [vmem:[#allocation10 + $0x1] ss:$0 sm:$0xff] }
0x171f   : > { %3301 = vmatpush.xpose.msk.msrb.mxu1 %vm934_vm1, %v4920_v50  ;;  %2537 = vrot.lane.b32.xlu2 %v4920_v50, %s5228_s11 }
0x1720   : > { %v2279_v53 = vsub.f32 1.5, %v2278_v52 }
0x1722   : > { %v2280_v54 = vmul.f32 %v3609_v47, %v2279_v53 }
0x1724   : > { %v2281_v56 = vmul.f32 %v2280_v54, %v2274_v43 }
0x1726   : > { %v2283_v58 = vsel %vm2282_vm15, %v2274_v43, %v2281_v56 }
0x1727   : > { %v2286_v59 = vsel %vm2284_vm4, %v2285_v57, %v2283_v58 }
0x1728   : > { %v2287_v60 = vadd.f32 1e-06, %v2286_v59 }
0x172a   : > { %3610 = vrcp.f32 %v2287_v60 }
0x1730   : > { %v3611_v0 = vpop.eup %3610 }
0x1731   : > { %v2293_v1 = vmul.f32 %v3611_v0, %v2292_v62 }
0x1733   : > { %v2297_v2 = vadd.f32 %v3527_v63, %v2293_v1 }
0x1735   : > { %3285 = vmatmul.msk.f32.vlgmr.msra.gmra.mxu1 %vm907_vm0, %v2297_v2 }
0x1779   : > { %v2538_v54 = vpop.permute.xlu2 %2537 }
0x177a   : > { %3304 = vmatpush.xpose.msk.msra.mxu2 %vm934_vm1, %v2538_v54  ;;  %v3316_v54 = vld [vmem:[%s5084_s9 + $0x78] sm:$0xff] }
0x17b2   : > { %v2328_v8 = vpop.f32.mrf.mxu1 }
0x17b3   : > { %v2329_v9 = vadd.f32 %v3528_v7, %v2328_v8 }
0x17b5   : > { %v2331_v10 = vmax.f32 %v2329_v9, 0.0 }
0x17b7   : > { %3294 = vmatmul.msk.f32.vlgmr.msra.gmra.mxu3 %vm1330_vm7, %v2331_v10 }
0x183a   : > { %v2366_v11 = vpop.f32.mrf.mxu3 }
0x183b   : > { %v2367_v12 = vadd.f32 %v3529_v39, %v2366_v11 }
0x183d   : > { %v2369_v13 = vadd.f32 %v2367_v12, %v2297_v2 }
0x183f   : > { %v2374_v15 = vsel %vm907_vm0, %v2369_v13, 0.0 }
0x1840   : > { %2375 = vadd.xlane.f32.xlu0 %v2374_v15 }
0x18b3   : > { %v2376_v18 = vpop.xlane.xlu0 %2375 }
0x18b4   : > { %v2377_v20 = vmul.f32 %v2376_v18, %v4571_v25 }
0x18b6   : > { %v2378_v21 = vsub.f32 %v2369_v13, %v2377_v20 }
0x18b8   : > { %v2379_v22 = vmul.f32 %v2378_v21, %v2378_v21  ;;  %v2401_v43 = vmul.f32 %v3530_v42, %v2378_v21 }
0x18ba   : > { %v2380_v23 = vsel %vm907_vm0, %v2379_v22, 0.0 }
0x18bb   : > { %2381 = vadd.xlane.f32.xlu1 %v2380_v23 }
0x18d4   : > { %2604 = vrot.lane.b32.xlu1 %v4920_v50, %s5229_s3 }
0x192e   : > { %v2382_v19 = vpop.xlane.xlu1 %2381 }
0x192f   : > { %v2383_v30 = vmul.f32 0.032258064, %v2382_v19 }
0x1931   : > { %3612 = vrsqrt.f32 %v2383_v30  ;;  %vm2391_vm5 = vcmp.eq.f32.partialorder %v2383_v30, inf  ;;  %v2394_v38 = vand.u32 2147483648, %v2383_v30  ;;  %vm2393_vm6 = vcmp.eq.f32.partialorder %v2383_v30, 0.0 }
0x1937   : > { %v3613_v31 = vpop.eup %3612 }
0x1938   : > { %v2385_v32 = vmul.f32 %v3613_v31, %v2383_v30 }
0x193a   : > { %v2386_v33 = vmul.f32 %v3613_v31, %v2385_v32 }
0x193c   : > { %v2387_v34 = vmul.f32 0.5, %v2386_v33 }
0x193e   : > { %v2388_v35 = vsub.f32 1.5, %v2387_v34 }
0x1940   : > { %v2389_v36 = vmul.f32 %v3613_v31, %v2388_v35 }
0x1942   : > { %v2390_v37 = vmul.f32 %v2389_v36, %v2383_v30 }
0x1944   : > { %v2392_v40 = vsel %vm2391_vm5, %v2383_v30, %v2390_v37 }
0x1945   : > { %v2395_v14 = vsel %vm2393_vm6, %v2394_v38, %v2392_v40 }
0x1946   : > { %v2396_v41 = vadd.f32 1e-06, %v2395_v14  ;;  %v2605_v56 = vpop.permute.xlu1 %2604 }
0x1947   : > { %3307 = vmatpush.xpose.msk.msrb.mxu3 %vm934_vm1, %v2605_v56  ;;  %v3315_v56 = vld [vmem:[%s5084_s9 + $0x70] sm:$0xff] }
0x1948   : > { %3614 = vrcp.f32 %v2396_v41 }
0x194b   : > { %2776 = vmatpush.msra.mxu3 %v3316_v54 }
0x194d   : > { %2777 = vmatpush.msra.mxu3 %v3315_v56 }
0x194e   : > { %v3615_v45 = vpop.eup %3614 }
0x194f   : > { %v2402_v46 = vmul.f32 %v3615_v45, %v2401_v43 }
0x1951   : > { %v4916_v47 = vadd.f32 %v3531_v44, %v2402_v46 }
0x1953   : > { %3299 = vmatmul.msk.f32.vlgmr.msra.gmra.mxu0 %vm907_vm0, %v4916_v47 }
0x19d0   : > { %v2437_v52 = vpop.f32.mrf.mxu0 }
0x19d1   : > { %v2438_v53 = vadd.f32 %v3533_v51, %v2437_v52 }
0x19d3   : > { %2669 = vrot.lane.b32.xlu1 %v2438_v53, %s5230_s8  ;;  %2602 = vrot.lane.b32.xlu2 %v2438_v53, %s5229_s3 }
0x19d4   : > { %2535 = vrot.lane.b32.xlu0 %v2438_v53, %s5228_s11  ;;  %3302 = vmatmul.msk.f32.vlgmr.msrb.gmra.mxu1 %vm934_vm1, %v2438_v53 }
0x19dc   : > { %2671 = vrot.lane.b32.xlu0 %v4920_v50, %s5230_s8  ;;  %s893_s8 = scalar_lea.vmem [#allocation22], %s4448_s5 }
0x19dd   : > { %s2977_s20 = sshll.u32 %s893_s8, 4  ;;  %s2978_s20 = int_to_ptr.vmem [resolvable:$true] %s2977_s20 }
0x1a2d   : > { %v2603_v57 = vpop.permute.xlu2 %2602 }
0x1a2e   : > { %3308 = vmatmul.msk.f32.vlgmr.msrb.gmra.mxu3 %vm934_vm1, %v2603_v57  ;;  %v3314_v57 = vld [vmem:[%s5084_s9 + $0x68] sm:$0xff] }
0x1a2f   : > { %2778 = vmatpush.msra.mxu3 %v3314_v57  ;;  %v2934_v57 = vld [vmem:[#allocation20 + $0x18] sm:$0xff] }
0x1a45   : > { %v2670_v60 = vpop.permute.xlu1 %2669 }
0x1a46   : > { %v2536_v58 = vpop.permute.xlu0 %2535 }
0x1a47   : > { %3305 = vmatmul.msk.f32.vlgmr.msra.gmra.mxu2 %vm934_vm1, %v2536_v58  ;;  %v3313_v58 = vld [vmem:[%s5084_s9 + $0x60] sm:$0xff] }
0x1a48   : > { %2779 = vmatpush.msra.mxu3 %v3313_v58  ;;  %v2933_v58 = vld [vmem:[#allocation20 + $0x10] sm:$0xff] }
0x1a4e   : > { %v2672_v59 = vpop.permute.xlu0 %2671 }
0x1a4f   : > { %3310 = vmatpush.xpose.msk.msrb.mxu2 %vm934_vm1, %v2672_v59 }
0x1a51   : > { %v2493_v61 = vpop.f32.mrf.mxu1 }
0x1a52   : > { %v2496_v62 = vmul.f32 0.35355338, %v2493_v61  ;;  %3311 = vmatmul.msk.f32.vlgmr.msrb.gmra.mxu2 %vm934_vm1, %v2670_v60 }
0x1a54   : > { %v2497_v63 = vadd.f32 %v2496_v62, %v4666_v55 }
0x1a56   : > { %v2498_v0 = vsel %vm934_vm1, %v2497_v63, -inf }
0x1a57   : > { %2499 = vmax.xlane.f32.xlu0 %v2498_v0 }
0x1ab1   : > { %v2627_v1 = vpop.f32.mrf.mxu3 }
0x1ab2   : > { %v2630_v2 = vmul.f32 0.35355338, %v2627_v1  ;;  %v3534_v1 = vld [vmem:[%s5085_s10 + $0x3] ss:$0 sm:$0xff] }
0x1ab4   : > { %v2631_v3 = vadd.f32 %v2630_v2, %v4666_v55 }
0x1ab6   : > { %v2632_v5 = vsel %vm934_vm1, %v2631_v3, -inf }
0x1ab7   : > { %2633 = vmax.xlane.f32.xlu1 %v2632_v5 }
0x1aca   : > { %v2500_v6 = vpop.xlane.xlu0 %2499  ;;  %v2560_v7 = vpop.f32.mrf.mxu2 }
0x1acb   : > { %v2501_v8 = vsub.f32 %v2497_v63, %v2500_v6  ;;  %v2563_v9 = vmul.f32 0.35355338, %v2560_v7 }
0x1acd   : > { %v2502_v10 = vmul.f32 1.442695, %v2501_v8  ;;  %v2564_v39 = vadd.f32 %v2563_v9, %v4666_v55 }
0x1acf   : > { %3616 = vpow2.f32 %v2502_v10  ;;  %v2565_v11 = vsel %vm934_vm1, %v2564_v39, -inf }
0x1ad0   : > { %2566 = vmax.xlane.f32.xlu2 %v2565_v11  ;;  %v3323_v11 = vld [vmem:[%s5213_s17 + $0x78] sm:$0xff] }
0x1ad5   : > { %v3617_v12 = vpop.eup %3616  ;;  %v2694_v13 = vpop.f32.mrf.mxu2 }
0x1ad6   : > { %v2697_v15 = vmul.f32 0.35355338, %v2694_v13  ;;  %v2504_v16 = vsel %vm934_vm1, %v3617_v12, 0.0  ;;  %v3320_v13 = vld [vmem:[%s5213_s17 + $0x60] sm:$0xff] }
0x1ad8   : > { %2505 = vadd.xlane.f32.xlu2 %v2504_v16  ;;  %v2698_v17 = vadd.f32 %v2697_v15, %v4666_v55 }
0x1ada   : > { %v2699_v18 = vsel %vm934_vm1, %v2698_v17, -inf }
0x1adb   : > { %2700 = vmax.xlane.f32.xlu0 %v2699_v18  ;;  %v3332_v18 = vld [vmem:[%s5215_s24 + $0xf0] sm:$0xff] }
0x1af0   : > { %2509 = vrot.lane.b32.xlu2 %v4920_v50, %s5227_s14  ;;  %s5234_s14 = sld [smem:[#allocation56_spill]] }
0x1af6   : > { %s4020_s5 = scalar_lea.hbm %s5234_s14, 16 }
0x1af8   : > { %2710 = vrot.lane.b32.xlu2 %v4920_v50, %s5220_s0  ;;  %s3337_s0 = sshll.u32 %s4255_s4, 3 }
0x1af9   : > { %s2975_s11 = scalar_lea.hbm %s5234_s14, %s3337_s0 }
0x1afa   : > { %s2979_s28 = sshll.u32 %s2975_s11, 4  ;;  %s2980_s28 = int_to_ptr.hbm [resolvable:$true] %s2979_s28 }
0x1afb   : > { %s4014_s4 = sshra.s32 %s2980_s28, 4  ;;  %s4015_s4 = int_to_ptr.hbm [resolvable:$true] %s4014_s4 }
0x1afc   : > { %s4016_s2 = scalar_lea.hbm %s4015_s4, 8  ;;  %p4021_p7 = scmp.lt.s32.totalorder %s4015_s4, %s5234_s14 }
0x1afd   : > { %p4017_p11 = scmp.ne.s32.totalorder %s4015_s4, %s4016_s2  ;;  %p4022_p9 = scmp.lt.s32.totalorder %s4020_s5, %s4016_s2 }
0x1aff   : > { %p4018_p13 = pnand %p4017_p11, %p4328_p4  ;;  %p4023_p0 = por %p4022_p9, %p4021_p7 }
0x1b01   : > { %p4019_p3 = pneg %p4018_p13 }
0x1b03   : > { %p4024_p2 = pnand %p4023_p0, %p4019_p3 }
0x1b2a   : > { %v2634_v20 = vpop.xlane.xlu1 %2633 }
0x1b2b   : > { %v2635_v21 = vsub.f32 %v2631_v3, %v2634_v20  ;;  %v3331_v20 = vld [vmem:[%s5215_s24 + $0xe8] sm:$0xff] }
0x1b2d   : > { %v2636_v22 = vmul.f32 1.442695, %v2635_v21 }
0x1b2f   : > { %3618 = vpow2.f32 %v2636_v22  ;;  %v3330_v22 = vld [vmem:[%s5215_s24 + $0xe0] sm:$0xff] }
0x1b35   : > { %v3619_v23 = vpop.eup %3618 }
0x1b36   : > { %v2638_v24 = vsel %vm934_vm1, %v3619_v23, 0.0 }
0x1b37   : > { %2639 = vadd.xlane.f32.xlu0 %v2638_v24  ;;  %v3329_v24 = vld [vmem:[%s5215_s24 + $0xd8] sm:$0xff] }
0x1b43   : > { %v2567_v26 = vpop.xlane.xlu2 %2566 }
0x1b44   : > { %v2568_v27 = vsub.f32 %v2564_v39, %v2567_v26 }
0x1b46   : > { %v2569_v55 = vmul.f32 1.442695, %v2568_v27 }
0x1b48   : > { %3620 = vpow2.f32 %v2569_v55 }
0x1b4b   : > { %v2506_v28 = vpop.xlane.xlu2 %2505  ;;  %2576 = vrot.lane.b32.xlu0 %v4920_v50, %s5221_s26 }
0x1b4c   : > { %3622 = vrcp.f32 %v2506_v28 }
0x1b4e   : > { %v3621_v29 = vpop.eup %3620  ;;  %v2701_v4 = vpop.xlane.xlu0 %2700 }
0x1b4f   : > { %v2702_v19 = vsub.f32 %v2698_v17, %v2701_v4  ;;  %v2571_v30 = vsel %vm934_vm1, %v3621_v29, 0.0  ;;  %v3333_v17 = vld [vmem:[%s5215_s24 + $0xf8] sm:$0xff] }
0x1b50   : > { %2572 = vadd.xlane.f32.xlu1 %v2571_v30  ;;  %2881 = vmatpush.msra.mxu2 %v3333_v17 }
0x1b51   : > { %v2703_v31 = vmul.f32 1.442695, %v2702_v19 }
0x1b52   : > { %v3623_v32 = vpop.eup %3622  ;;  %2882 = vmatpush.msra.mxu2 %v3332_v18 }
0x1b53   : > { %v2508_v33 = vmul.f32 %v3623_v32, %v3617_v12  ;;  %3624 = vpow2.f32 %v2703_v31  ;;  %v2510_v34 = vpop.permute.xlu2 %2509  ;;  %v3322_v12 = vld [vmem:[%s5213_s17 + $0x70] sm:$0xff]  ;;  %v3535_v32 = vld [vmem:[%s5216_s21 + $0x3] ss:$0 sm:$0xff] }
0x1b54   : > { %2530 = vmatpush.msrb.mxu0 %v2510_v34  ;;  %2883 = vmatpush.msra.mxu2 %v3331_v20  ;;  %v3536_v34 = vld [vmem:[#allocation14 + $0x3] ss:$0 sm:$0xff] }
0x1b55   : > { %3303 = vmatmul.msk.f32.vlgmr.msrb.gmra.mxu0 %vm934_vm1, %v2508_v33 }
0x1b56   : > { %2884 = vmatpush.msra.mxu2 %v3330_v22 }
0x1b58   : > { %2885 = vmatpush.msra.mxu2 %v3329_v24 }
0x1b59   : > { %v3625_v35 = vpop.eup %3624 }
0x1b5a   : > { %v2705_v36 = vsel %vm934_vm1, %v3625_v35, 0.0 }
0x1b5b   : > { %2706 = vadd.xlane.f32.xlu1 %v2705_v36  ;;  %v2711_v40 = vpop.permute.xlu2 %2710 }
0x1b74   : > { %2643 = vrot.lane.b32.xlu1 %v4920_v50, %s5222_s15 }
0x1baa   : > { %v2640_v37 = vpop.xlane.xlu0 %2639 }
0x1bbd   : > { %v2577_v38 = vpop.permute.xlu0 %2576 }
0x1bbe   : > { %2597 = vmatpush.msra.mxu1 %v2577_v38  ;;  %v3328_v38 = vld [vmem:[%s5215_s24 + $0xd0] sm:$0xff] }
0x1bbf   : > { %2886 = vmatpush.msra.mxu2 %v3328_v38 }
0x1bc0   : > { %2731 = vmatpush.msrb.mxu1 %v2711_v40  ;;  %v3327_v40 = vld [vmem:[%s5215_s24 + $0xc8] sm:$0xff] }
0x1bc1   : > { %2887 = vmatpush.msra.mxu2 %v3327_v40 }
0x1bc3   : > { %v2573_v14 = vpop.xlane.xlu1 %2572 }
0x1bc4   : > { %3626 = vrcp.f32 %v2573_v14  ;;  %v3326_v14 = vld [vmem:[%s5215_s24 + $0xc0] sm:$0xff] }
0x1bc5   : > { %2888 = vmatpush.msra.mxu2 %v3326_v14 }
0x1bca   : > { %v3627_v41 = vpop.eup %3626 }
0x1bcb   : > { %v2575_v42 = vmul.f32 %v3627_v41, %v3621_v29  ;;  %v3537_v41 = vld [vmem:[%s5218_s23 + $0x3] ss:$0 sm:$0xff] }
0x1bcd   : > { %3306 = vmatmul.msk.f32.vlgmr.msra.gmra.mxu1 %vm934_vm1, %v2575_v42 }
0x1bce   : > { %v2707_v43 = vpop.xlane.xlu1 %2706  ;;  %2954 = vmatpush.msra.mxu1 %v2934_v57 }
0x1bcf   : > { %3628 = vrcp.f32 %v2707_v43 }
0x1bd0   : > { %3630 = vrcp.f32 %v2640_v37  ;;  %2955 = vmatpush.msra.mxu1 %v2933_v58 }
0x1bd2   : > { %v2532_v52 = vpop.f32.mrf.mxu0 }
0x1bd5   : > { %v3629_v44 = vpop.eup %3628 }
0x1bd6   : > { %v2709_v45 = vmul.f32 %v3629_v44, %v3625_v35  ;;  %v3631_v46 = vpop.eup %3630 }
0x1bd7   : > { %v2642_v48 = vmul.f32 %v3631_v46, %v3619_v23 }
0x1bd8   : > { %3312 = vmatmul.msk.f32.vlgmr.msrb.gmra.mxu1 %vm934_vm1, %v2709_v45  ;;  %v3538_v45 = vld [vmem:[#allocation19 + $0x3] ss:$0 sm:$0xff] }
0x1be6   : > { %v2644_v49 = vpop.permute.xlu1 %2643 }
0x1be7   : > { %2664 = vmatpush.msra.mxu0 %v2644_v49 }
0x1be8   : > { %3309 = vmatmul.msk.f32.vlgmr.msra.gmra.mxu0 %vm934_vm1, %v2642_v48 }
0x1be9   : > { %2847 = vmatpush.msrb.mxu0 %v3323_v11  ;;  %v3540_v11 = vld [vmem:[#allocation17 + $0x3] ss:$0 sm:$0xff] }
0x1beb   : > { %2848 = vmatpush.msrb.mxu0 %v3322_v12 }
0x1c4a   : > { %v2599_v50 = vpop.f32.mrf.mxu1 }
0x1c4b   : > { %2737 = vrot.lane.b32.xlu0 %v2599_v50, %s5223_s29 }
0x1c55   : > { %v2733_v51 = vpop.f32.mrf.mxu1 }
0x1c56   : > { %2745 = vrot.lane.b32.xlu0 %v2733_v51, %s5224_s7  ;;  %s5235_s7 = sld [smem:[#allocation55_spill]] }
0x1c65   : > { %v2666_v53 = vpop.f32.mrf.mxu0 }
0x1c66   : > { %2741 = vrot.lane.b32.xlu2 %v2666_v53, %s5225_s12 }
0x1cbd   : > { %v2738_v59 = vpop.permute.xlu0 %2737 }
0x1cbe   : > { %v2748_v61 = vsel %vm934_vm1, %v2532_v52, %v2738_v59  ;;  %v2932_v59 = vld [vmem:[#allocation20 + $0x8] sm:$0xff] }
0x1cbf   : > { %2956 = vmatpush.msra.mxu1 %v2932_v59 }
0x1cc0   : > { %v2742_v60 = vpop.permute.xlu2 %2741 }
0x1cc1   : > { %v2749_v62 = vsel %vm1208_vm2, %v2748_v61, %v2742_v60  ;;  %v2931_v60 = vld [vmem:[#allocation20] sm:$0xff] }
0x1cc2   : > { %2957 = vmatpush.msra.mxu1 %v2931_v60 }
0x1cc8   : > { %v2746_v63 = vpop.permute.xlu0 %2745 }
0x1cc9   : > { %v2750_v0 = vsel %vm1210_vm3, %v2749_v62, %v2746_v63 }
0x1cca   : > { %3318 = vmatmul.msk.f32.vlgmr.msra.gmra.mxu3 %vm907_vm0, %v2750_v0 }
0x1d4d   : > { %v2781_v2 = vpop.f32.mrf.mxu3 }
0x1d4e   : > { %v2782_v3 = vadd.f32 %v3534_v1, %v2781_v2 }
0x1d50   : > { %v2784_v5 = vadd.f32 %v2782_v3, %v4916_v47  ;;  %v3321_v47 = vld [vmem:[%s5213_s17 + $0x68] sm:$0xff] }
0x1d51   : > { %2849 = vmatpush.msrb.mxu0 %v3321_v47 }
0x1d52   : > { %v2789_v6 = vsel %vm907_vm0, %v2784_v5, 0.0 }
0x1d53   : > { %2790 = vadd.xlane.f32.xlu1 %v2789_v6  ;;  %2850 = vmatpush.msrb.mxu0 %v3320_v13 }
0x1dc6   : > { %v2791_v7 = vpop.xlane.xlu1 %2790 }
0x1dc7   : > { %v2792_v8 = vmul.f32 %v2791_v7, %v4571_v25 }
0x1dc9   : > { %v2793_v9 = vsub.f32 %v2784_v5, %v2792_v8 }
0x1dcb   : > { %v2794_v10 = vmul.f32 %v2793_v9, %v2793_v9  ;;  %v2816_v33 = vmul.f32 %v3535_v32, %v2793_v9 }
0x1dcd   : > { %v2795_v39 = vsel %vm907_vm0, %v2794_v10, 0.0  ;;  %v3539_v10 = vld [vmem:[#allocation16 + $0x3] ss:$0 sm:$0xff] }
0x1dce   : > { %2796 = vadd.xlane.f32.xlu2 %v2795_v39 }
0x1e41   : > { %v2797_v15 = vpop.xlane.xlu2 %2796 }
0x1e42   : > { %v2798_v16 = vmul.f32 0.032258064, %v2797_v15  ;;  %v3541_v15 = vld [vmem:[%s5235_s7] ss:$0 sm:$0xff] }
0x1e44   : > { %3632 = vrsqrt.f32 %v2798_v16  ;;  %vm2806_vm1 = vcmp.eq.f32.partialorder %v2798_v16, inf  ;;  %v2809_v4 = vand.u32 2147483648, %v2798_v16  ;;  %vm2808_vm2 = vcmp.eq.f32.partialorder %v2798_v16, 0.0 }
0x1e4a   : > { %v3633_v21 = vpop.eup %3632 }
0x1e4b   : > { %v2800_v23 = vmul.f32 %v3633_v21, %v2798_v16 }
0x1e4d   : > { %v2801_v26 = vmul.f32 %v3633_v21, %v2800_v23 }
0x1e4f   : > { %v2802_v27 = vmul.f32 0.5, %v2801_v26 }
0x1e51   : > { %v2803_v55 = vsub.f32 1.5, %v2802_v27 }
0x1e53   : > { %v2804_v28 = vmul.f32 %v3633_v21, %v2803_v55 }
0x1e55   : > { %v2805_v29 = vmul.f32 %v2804_v28, %v2798_v16 }
0x1e57   : > { %v2807_v19 = vsel %vm2806_vm1, %v2798_v16, %v2805_v29 }
0x1e58   : > { %v2810_v30 = vsel %vm2808_vm2, %v2809_v4, %v2807_v19 }
0x1e59   : > { %v2811_v31 = vadd.f32 1e-06, %v2810_v30 }
0x1e5b   : > { %3634 = vrcp.f32 %v2811_v31 }
0x1e61   : > { %v3635_v35 = vpop.eup %3634 }
0x1e62   : > { %v2817_v36 = vmul.f32 %v3635_v35, %v2816_v33 }
0x1e64   : > { %v2821_v37 = vadd.f32 %v3536_v34, %v2817_v36 }
0x1e66   : > { %3325 = vmatmul.msk.f32.vlgmr.msrb.gmra.mxu0 %vm907_vm0, %v2821_v37 }
0x1ee3   : > { %v2852_v42 = vpop.f32.mrf.mxu0 }
0x1ee4   : > { %v2853_v43 = vadd.f32 %v3537_v41, %v2852_v42 }
0x1ee6   : > { %v2855_v44 = vmax.f32 %v2853_v43, 0.0 }
0x1ee8   : > { %3334 = vmatmul.msk.f32.vlgmr.msra.gmra.mxu2 %vm1330_vm7, %v2855_v44 }
0x1f6b   : > { %v2890_v46 = vpop.f32.mrf.mxu2 }
0x1f6c   : > { %v2891_v48 = vadd.f32 %v3538_v45, %v2890_v46 }
0x1f6e   : > { %v2893_v49 = vadd.f32 %v2891_v48, %v2821_v37 }
0x1f70   : > { %v2898_v50 = vsel %vm907_vm0, %v2893_v49, 0.0 }
0x1f71   : > { %2899 = vadd.xlane.f32.xlu0 %v2898_v50 }
0x1fe4   : > { %v2900_v51 = vpop.xlane.xlu0 %2899 }
0x1fe5   : > { %v2901_v52 = vmul.f32 %v2900_v51, %v4571_v25 }
0x1fe7   : > { %v2902_v53 = vsub.f32 %v2893_v49, %v2901_v52 }
0x1fe9   : > { %v2903_v54 = vmul.f32 %v2902_v53, %v2902_v53  ;;  %v2925_v39 = vmul.f32 %v3539_v10, %v2902_v53 }
0x1feb   : > { %v2904_v56 = vsel %vm907_vm0, %v2903_v54, 0.0 }
0x1fec   : > { %2905 = vadd.xlane.f32.xlu1 %v2904_v56 }
0x205f   : > { %v2906_v61 = vpop.xlane.xlu1 %2905 }
0x2060   : > { %v2907_v62 = vmul.f32 0.032258064, %v2906_v61 }
0x2062   : > { %3636 = vrsqrt.f32 %v2907_v62  ;;  %vm2915_vm3 = vcmp.eq.f32.partialorder %v2907_v62, inf  ;;  %v2918_v6 = vand.u32 2147483648, %v2907_v62  ;;  %vm2917_vm7 = vcmp.eq.f32.partialorder %v2907_v62, 0.0 }
0x2068   : > { %v3637_v63 = vpop.eup %3636 }
0x2069   : > { %v2909_v0 = vmul.f32 %v3637_v63, %v2907_v62 }
0x206b   : > { %v2910_v1 = vmul.f32 %v3637_v63, %v2909_v0 }
0x206d   : > { %v2911_v25 = vmul.f32 0.5, %v2910_v1 }
0x206f   : > { %v2912_v2 = vsub.f32 1.5, %v2911_v25 }
0x2071   : > { %v2913_v3 = vmul.f32 %v3637_v63, %v2912_v2 }
0x2073   : > { %v2914_v5 = vmul.f32 %v2913_v3, %v2907_v62 }
0x2075   : > { %v2916_v7 = vsel %vm2915_vm3, %v2907_v62, %v2914_v5 }
0x2076   : > { %v2919_v8 = vsel %vm2917_vm7, %v2918_v6, %v2916_v7 }
0x2077   : > { %v2920_v9 = vadd.f32 1e-06, %v2919_v8 }
0x2079   : > { %3638 = vrcp.f32 %v2920_v9 }
0x207f   : > { %v3639_v12 = vpop.eup %3638 }
0x2080   : > { %v2926_v47 = vmul.f32 %v3639_v12, %v2925_v39 }
0x2082   : > { %v2930_v13 = vadd.f32 %v3540_v11, %v2926_v47 }
0x2084   : > { %3335 = vmatmul.msk.f32.vlgmr.msra.gmra.mxu1 %vm907_vm0, %v2930_v13 }
0x2101   : > { %v2959_v16 = vpop.f32.mrf.mxu1 }
0x2102   : > { %v2960_v17 = vadd.f32 %v3541_v15, %v2959_v16 }
0x2104   : > { %2963 = vst.msk [vmem:[%s893_s8] sm:$0xff] %vm2962_vm8, %v2960_v17 }
0x2105   : > { %4027 = shalt.err (!%p4024_p2)
}
0x2106   : > { %3382 = dma.vmem_to_hbm [thread:$0]  (%p4328_p4), %s2978_s20, 128, %s2980_s28, %s2965_s22  }
0x2107 PF: > { %s5237_s16 = sld [smem:[#allocation31_spill]]  ;;  %p5239_p1 = scmp.ge.s32.totalorder %s4090_s27, 2 }
0x2109   : > { %p3423_p12 = pnand %p5239_p1, %p4332_p5 }
0x210b   : > { %p3424_p8 = pneg %p3423_p12 }
0x210d   : > { %s2991_s0 = sand.u32 1, %s5237_s16  }
0x210e   : > { %s2992_s26 = scalar_lea.sflag [#allocation4], %s2991_s0 }
0x210f   : > { %4073 = dma.done.wait (%p3424_p8), %s2992_s26, 128  }
0x2110   : > { %4075 = vsyncadd (%p3424_p8), %s2992_s26, 4294967168  ;;  %s5240_s27 = sld [smem:[#allocation33_spill]]  ;;  %s5243_s2 = smov %s4082_s25 }
0x2111   : > { %s5241_s15 = sld [smem:[#allocation32_spill]] }
0x2112   : > { %s5242_s26 = sld [smem:[#allocation34_spill]] }
0x2116   : > { %p42_p10 = scmp.ge.s32.totalorder %s5240_s27, 4  }
0x2117   : > { %s5244_s25 = smov %s5241_s15 }
0x2118   :  { %44 = sbr.rel (!%p42_p10) target bundleno = 33 (0x21), region = 245 }
0x211d   :  { %2998 = vsyncpa [#allocation3], 1 }
0x211e   :  { %3000 = vsyncpa [#allocation3 + $0x1], 1 }
0x211f   :  { %3001 = vsyncpa [#allocation6], 1 }
0x2120   :  { %3003 = vsyncpa [#allocation6 + $0x1], 1 }
0x2121   :  { %3004 = vsyncpa [#allocation9], 1 }
0x2122   :  { %3005 = vsyncpa [#allocation12], 1 }
0x2123   :  { %3006 = vsyncpa [#allocation15], 1 }
0x2124   :  { %3007 = vsyncpa [#allocation18], 1 }
0x2125   :  { %3008 = vsyncpa [#allocation21], 1 }
0x2126   :  { %3009 = vsyncpa [#allocation4], 1 }
0x2127   :  { %3011 = vsyncpa [#allocation4 + $0x1], 1 }

</bundles_post_ra>
